<compile_context>
chip_gen: v7x
topology: tpu7x:2x2x1
jax: 0.10.0
libtpu: 0.0.40
codegen_flags: <defaults>
</compile_context>

<pallas_src>
import math

import jax
import jax.numpy as jnp
from jax.experimental import pallas as pl
from jax.experimental.pallas import tpu as pltpu  # noqa: F401  (TPU backend)

# ----------------------- small config, matching the module ------------------
INPUT_SIZE = 16
DICT_SIZE = 32       # dictionary_size
WORD_LEN = 8         # word_length
HIDDEN = 40          # hidden_size  (nhead=5 -> head_dim=8)
NHEAD = 5
HEAD_DIM = HIDDEN // NHEAD
DIM_FF = 64          # dim_feedforward (shrunk for the small test)
NUM_LAYERS = 2
BATCH = 2
LN_EPS = 1e-5


def _dot_t(x, w):
    """x @ w.T  (PyTorch nn.Linear convention: w is (out_features, in_features))."""
    return jax.lax.dot_general(
        x, w, (((1,), (1,)), ((), ())), preferred_element_type=jnp.float32)


def _layernorm(x, g, b):
    mu = jnp.mean(x, axis=-1, keepdims=True)
    var = jnp.mean(jnp.square(x - mu), axis=-1, keepdims=True)
    return (x - mu) * jax.lax.rsqrt(var + LN_EPS) * g + b


def _self_attention(x, in_w, in_b, out_w, out_b):
    """nn.MultiheadAttention(batch_first) self-attention on VMEM values.

    x: (B, W, H).  One fused QKV projection over (B*W) rows; batched einsums
    over the batch axis per head (no Python loop over batch).
    """
    bsz, w, h = x.shape
    hd = h // NHEAD
    scale = 1.0 / math.sqrt(hd)

    x2 = x.reshape(bsz * w, h)
    qkv = _dot_t(x2, in_w) + in_b                       # (B*W, 3H)

    head_outs = []
    for hi in range(NHEAD):
        q = qkv[:, hi * hd:(hi + 1) * hd].reshape(bsz, w, hd)
        k = qkv[:, h + hi * hd: h + (hi + 1) * hd].reshape(bsz, w, hd)
        v = qkv[:, 2 * h + hi * hd: 2 * h + (hi + 1) * hd].reshape(bsz, w, hd)
        s = jnp.einsum('bqd,bkd->bqk', q, k,
                       preferred_element_type=jnp.float32) * scale
        s = s - jnp.max(s, axis=-1, keepdims=True)
        p = jnp.exp(s)
        p = p * pl.reciprocal(jnp.sum(p, axis=-1, keepdims=True))
        o = jnp.einsum('bqk,bkd->bqd', p, v,
                       preferred_element_type=jnp.float32)
        head_outs.append(o.reshape(bsz * w, hd))        # back to 2-D rows

    o2 = jnp.concatenate(head_outs, axis=-1)            # (B*W, H)
    return (_dot_t(o2, out_w) + out_b).reshape(bsz, w, h)


def _cross_attention_len1(mem, in_w, in_b, out_w, out_b):
    """Cross-attention with memory length == 1.

    softmax over a single key is identically 1, so the attention output is
    out_proj(v_proj(mem) + bv) broadcast over every query position
    (bit-identical to the full nn.MultiheadAttention computation).
    """
    h = mem.shape[-1]
    v = _dot_t(mem, in_w[2 * h:, :]) + in_b[:, 2 * h:]  # (B, H)
    o = _dot_t(v, out_w) + out_b                        # (B, H)
    return o[:, None, :]                                # (B, 1, H) broadcasts in residual


# --------------------------- single fused Pallas kernel ----------------------
def _vae_fused_kernel(
        x_ref,
        in_emb_w, in_emb_b, mem_w, mem_b, tgt_emb,
        sa_w, sa_b, sa_ow, sa_ob,
        ca_w, ca_b, ca_ow, ca_ob,
        ln1g, ln1b, ln2g, ln2b, ln3g, ln3b,
        ff1w, ff1b, ff2w, ff2b,
        cls_w, cls_b, fc1_w, fc1_b, fc2_w, fc2_b, mean_w, mean_b,
        recon_ref, logits_ref, onehot_ref, msg_ref):
    bsz = x_ref.shape[0]
    w, h, d = WORD_LEN, HIDDEN, DICT_SIZE

    # ------------------------------- Encoder ---------------------------------
    emb = jnp.maximum(_dot_t(x_ref[...], in_emb_w[...]) + in_emb_b[...], 0.0)
    memory = jnp.maximum(_dot_t(emb, mem_w[...]) + mem_b[...], 0.0)      # (B, H)

    # target_embeddings(arange(word_length)) broadcast over batch
    hid = jnp.broadcast_to(tgt_emb[...][None, :, :], (bsz, w, h))        # (B, W, H)

    # post-norm nn.TransformerDecoderLayer x NUM_LAYERS (static unroll, VMEM-resident)
    for li in range(NUM_LAYERS):
        sa = _self_attention(hid, sa_w[li], sa_b[li], sa_ow[li], sa_ob[li])
        hid = _layernorm(hid + sa, ln1g[li], ln1b[li])

        ca = _cross_attention_len1(memory, ca_w[li], ca_b[li], ca_ow[li], ca_ob[li])
        hid = _layernorm(hid + ca, ln2g[li], ln2b[li])

        h2 = hid.reshape(bsz * w, h)
        ffh = jnp.maximum(_dot_t(h2, ff1w[li]) + ff1b[li], 0.0)
        ff = (_dot_t(ffh, ff2w[li]) + ff2b[li]).reshape(bsz, w, h)
        hid = _layernorm(hid + ff, ln3g[li], ln3b[li])

    # token classifier -> lane-dense (B*W, D) logits slab
    logits = _dot_t(hid.reshape(bsz * w, h), cls_w[...]) + cls_b[...]    # (B*W, D)
    logits_ref[...] = logits

    # softmax + straight_through_discretize forward values (argmax one-hot);
    # argmax(softmax(logits)) == argmax(logits), first-index tie-break like torch.
    mx = jnp.max(logits, axis=-1, keepdims=True)
    iota = jax.lax.broadcasted_iota(jnp.int32, logits.shape, 1)
    idx = jnp.min(jnp.where(logits >= mx, iota, d), axis=-1, keepdims=True)  # (B*W, 1)
    onehot = (iota == idx).astype(jnp.float32)                               # (B*W, D)
    onehot_ref[...] = onehot
    msg_ref[...] = idx

    # ------------------------------- Decoder ----------------------------------
    # z = one_hot.view(B, W*D), built with static row slices / lane concat.
    z_rows = []
    for bi in range(bsz):
        z_rows.append(jnp.concatenate(
            [onehot[bi * w + wi: bi * w + wi + 1, :] for wi in range(w)], axis=-1))
    z = jnp.concatenate(z_rows, axis=0)                                  # (B, W*D)

    d1 = jnp.maximum(_dot_t(z, fc1_w[...]) + fc1_b[...], 0.0)
    d2 = jnp.maximum(_dot_t(d1, fc2_w[...]) + fc2_b[...], 0.0)
    # reparameterize() in eval mode returns the mean; output_logvar is dead work
    # and is deliberately not computed.
    recon_ref[...] = _dot_t(d2, mean_w[...]) + mean_b[...]


# ------------------------------- full forward --------------------------------
def vae_forward(params, x):
    bsz = x.shape[0]
    recon, logits2d, onehot2d, msg2d = pl.pallas_call(
        _vae_fused_kernel,
        out_shape=(
            jax.ShapeDtypeStruct((bsz, INPUT_SIZE), jnp.float32),
            jax.ShapeDtypeStruct((bsz * WORD_LEN, DICT_SIZE), jnp.float32),
            jax.ShapeDtypeStruct((bsz * WORD_LEN, DICT_SIZE), jnp.float32),
            jax.ShapeDtypeStruct((bsz * WORD_LEN, 1), jnp.int32),
        ),
    )(x,
      params["in_emb_w"], params["in_emb_b"],
      params["mem_w"], params["mem_b"],
      params["tgt_emb"],
      params["sa_w"], params["sa_b"], params["sa_ow"], params["sa_ob"],
      params["ca_w"], params["ca_b"], params["ca_ow"], params["ca_ob"],
      params["ln1g"], params["ln1b"], params["ln2g"], params["ln2b"],
      params["ln3g"], params["ln3b"],
      params["ff1w"], params["ff1b"], params["ff2w"], params["ff2b"],
      params["cls_w"], params["cls_b"],
      params["fc1_w"], params["fc1_b"],
      params["fc2_w"], params["fc2_b"],
      params["mean_w"], params["mean_b"])

    # metadata-only reshapes back to the PyTorch output layout
    logits = logits2d.reshape(bsz, WORD_LEN, DICT_SIZE)
    one_hot = onehot2d.reshape(bsz, WORD_LEN, DICT_SIZE)
    messages = msg2d.reshape(bsz, WORD_LEN)
    return recon, one_hot, logits, messages


# ------------------------------ parameter init -------------------------------
def init_params(key):
    ks = iter(jax.random.split(key, 128))

    def dense(out_dim, in_dim, scale=0.1):
        w = jax.random.normal(next(ks), (out_dim, in_dim), jnp.float32) * scale
        b = jax.random.normal(next(ks), (1, out_dim), jnp.float32) * scale
        return w, b

    p = {}
    p["in_emb_w"], p["in_emb_b"] = dense(HIDDEN, INPUT_SIZE)
    p["mem_w"], p["mem_b"] = dense(HIDDEN, HIDDEN)
    p["tgt_emb"] = jax.random.normal(next(ks), (WORD_LEN, HIDDEN), jnp.float32) * 0.1

    layers = []
    for _ in range(NUM_LAYERS):
        lp = {}
        lp["sa_w"], lp["sa_b"] = dense(3 * HIDDEN, HIDDEN)
        lp["sa_ow"], lp["sa_ob"] = dense(HIDDEN, HIDDEN)
        lp["ca_w"], lp["ca_b"] = dense(3 * HIDDEN, HIDDEN)
        lp["ca_ow"], lp["ca_ob"] = dense(HIDDEN, HIDDEN)
        for i in (1, 2, 3):
            lp[f"ln{i}g"] = jnp.ones((1, HIDDEN), jnp.float32)
            lp[f"ln{i}b"] = jnp.zeros((1, HIDDEN), jnp.float32)
        lp["ff1w"], lp["ff1b"] = dense(DIM_FF, HIDDEN)
        lp["ff2w"], lp["ff2b"] = dense(HIDDEN, DIM_FF)
        layers.append(lp)
    # stack the per-layer params along a leading NUM_LAYERS axis
    stacked = jax.tree_util.tree_map(lambda *xs: jnp.stack(xs, axis=0), *layers)
    p.update(stacked)

    p["cls_w"], p["cls_b"] = dense(DICT_SIZE, HIDDEN)
    p["fc1_w"], p["fc1_b"] = dense(3 * HIDDEN, WORD_LEN * DICT_SIZE)
    p["fc2_w"], p["fc2_b"] = dense(HIDDEN, 3 * HIDDEN)
    p["mean_w"], p["mean_b"] = dense(INPUT_SIZE, HIDDEN)
    # output_logvar weights exist in the PyTorch module but never affect the
    # eval-mode forward output (reparameterize returns the mean), so they are
    # omitted here.
    return p


if __name__ == "__main__":
    key = jax.random.PRNGKey(0)
    pkey, xkey = jax.random.split(key)
    params = init_params(pkey)
    x = jax.random.normal(xkey, (BATCH, INPUT_SIZE), jnp.float32)

    recon, one_hot, logits, messages = jax.jit(vae_forward)(params, x)
    jax.block_until_ready((recon, one_hot, logits, messages))

    assert recon.shape == (BATCH, INPUT_SIZE)
    assert one_hot.shape == (BATCH, WORD_LEN, DICT_SIZE)
    assert logits.shape == (BATCH, WORD_LEN, DICT_SIZE)
    assert messages.shape == (BATCH, WORD_LEN)
    assert messages.dtype == jnp.int32
    # each row of one_hot sums to exactly 1 and is consistent with argmax(logits)
    assert bool(jnp.all(jnp.sum(one_hot, axis=-1) == 1.0))
    assert bool(jnp.all(jnp.argmax(logits, axis=-1).astype(jnp.int32) == messages))

    print("KERNEL_OK")
</pallas_src>

<mosaic_0001>
module attributes {stable_mosaic.version = 11 : i64} {
  func.func @_vae_fused_kernel(%arg0: memref<2x16xf32, #tpu.memory_space<vmem>>, %arg1: memref<40x16xf32, #tpu.memory_space<vmem>>, %arg2: memref<1x40xf32, #tpu.memory_space<vmem>>, %arg3: memref<40x40xf32, #tpu.memory_space<vmem>>, %arg4: memref<1x40xf32, #tpu.memory_space<vmem>>, %arg5: memref<8x40xf32, #tpu.memory_space<vmem>>, %arg6: memref<2x120x40xf32, #tpu.memory_space<vmem>>, %arg7: memref<2x1x120xf32, #tpu.memory_space<vmem>>, %arg8: memref<2x40x40xf32, #tpu.memory_space<vmem>>, %arg9: memref<2x1x40xf32, #tpu.memory_space<vmem>>, %arg10: memref<2x120x40xf32, #tpu.memory_space<vmem>>, %arg11: memref<2x1x120xf32, #tpu.memory_space<vmem>>, %arg12: memref<2x40x40xf32, #tpu.memory_space<vmem>>, %arg13: memref<2x1x40xf32, #tpu.memory_space<vmem>>, %arg14: memref<2x1x40xf32, #tpu.memory_space<vmem>>, %arg15: memref<2x1x40xf32, #tpu.memory_space<vmem>>, %arg16: memref<2x1x40xf32, #tpu.memory_space<vmem>>, %arg17: memref<2x1x40xf32, #tpu.memory_space<vmem>>, %arg18: memref<2x1x40xf32, #tpu.memory_space<vmem>>, %arg19: memref<2x1x40xf32, #tpu.memory_space<vmem>>, %arg20: memref<2x64x40xf32, #tpu.memory_space<vmem>>, %arg21: memref<2x1x64xf32, #tpu.memory_space<vmem>>, %arg22: memref<2x40x64xf32, #tpu.memory_space<vmem>>, %arg23: memref<2x1x40xf32, #tpu.memory_space<vmem>>, %arg24: memref<32x40xf32, #tpu.memory_space<vmem>>, %arg25: memref<1x32xf32, #tpu.memory_space<vmem>>, %arg26: memref<120x256xf32, #tpu.memory_space<vmem>>, %arg27: memref<1x120xf32, #tpu.memory_space<vmem>>, %arg28: memref<40x120xf32, #tpu.memory_space<vmem>>, %arg29: memref<1x40xf32, #tpu.memory_space<vmem>>, %arg30: memref<16x40xf32, #tpu.memory_space<vmem>>, %arg31: memref<1x16xf32, #tpu.memory_space<vmem>>, %arg32: memref<2x16xf32, #tpu.memory_space<vmem>>, %arg33: memref<16x32xf32, #tpu.memory_space<vmem>>, %arg34: memref<16x32xf32, #tpu.memory_space<vmem>>, %arg35: memref<16x1xi32, #tpu.memory_space<vmem>>) attributes {dimension_semantics = [], scalar_prefetch = 0 : i64, scratch_operands = 0 : i64, tpu.core_type = #tpu.core_type<tc>} {
    %c0 = arith.constant 0 : index
    %c0_0 = arith.constant 0 : index
    %0 = vector.load %arg0[%c0, %c0_0] : memref<2x16xf32, #tpu.memory_space<vmem>>, vector<2x16xf32>
    %c0_1 = arith.constant 0 : index
    %c0_2 = arith.constant 0 : index
    %1 = vector.load %arg1[%c0_1, %c0_2] : memref<40x16xf32, #tpu.memory_space<vmem>>, vector<40x16xf32>
    %cst = arith.constant dense<0.000000e+00> : vector<2x40xf32>
    %2 = tpu.matmul %0, %1, %cst {dimension_numbers = #tpu.dot_dimension_numbers<[1], [1], [0], [0], [0, 0, 1, 0], [], []>} : vector<2x16xf32>, vector<40x16xf32>, vector<2x40xf32> -> vector<2x40xf32>
    %c0_3 = arith.constant 0 : index
    %c0_4 = arith.constant 0 : index
    %3 = vector.load %arg2[%c0_3, %c0_4] : memref<1x40xf32, #tpu.memory_space<vmem>>, vector<1x40xf32>
    %4 = vector.broadcast %3 : vector<1x40xf32> to vector<2x40xf32>
    %5 = arith.addf %2, %4 : vector<2x40xf32>
    %cst_5 = arith.constant 0.000000e+00 : f32
    %6 = vector.broadcast %cst_5 : f32 to vector<2x40xf32>
    %7 = arith.maximumf %5, %6 : vector<2x40xf32>
    %c0_6 = arith.constant 0 : index
    %c0_7 = arith.constant 0 : index
    %8 = vector.load %arg3[%c0_6, %c0_7] : memref<40x40xf32, #tpu.memory_space<vmem>>, vector<40x40xf32>
    %cst_8 = arith.constant dense<0.000000e+00> : vector<2x40xf32>
    %9 = tpu.matmul %7, %8, %cst_8 {dimension_numbers = #tpu.dot_dimension_numbers<[1], [1], [0], [0], [0, 0, 1, 0], [], []>} : vector<2x40xf32>, vector<40x40xf32>, vector<2x40xf32> -> vector<2x40xf32>
    %c0_9 = arith.constant 0 : index
    %c0_10 = arith.constant 0 : index
    %10 = vector.load %arg4[%c0_9, %c0_10] : memref<1x40xf32, #tpu.memory_space<vmem>>, vector<1x40xf32>
    %11 = vector.broadcast %10 : vector<1x40xf32> to vector<2x40xf32>
    %12 = arith.addf %9, %11 : vector<2x40xf32>
    %cst_11 = arith.constant 0.000000e+00 : f32
    %13 = vector.broadcast %cst_11 : f32 to vector<2x40xf32>
    %14 = arith.maximumf %12, %13 : vector<2x40xf32>
    %c0_12 = arith.constant 0 : index
    %c0_13 = arith.constant 0 : index
    %15 = vector.load %arg5[%c0_12, %c0_13] : memref<8x40xf32, #tpu.memory_space<vmem>>, vector<8x40xf32>
    %16 = vector.shape_cast %15 : vector<8x40xf32> to vector<1x8x40xf32>
    %17 = vector.shape_cast %16 : vector<1x8x40xf32> to vector<1x8x40xf32>
    %18 = vector.broadcast %17 : vector<1x8x40xf32> to vector<2x8x40xf32>
    %c0_14 = arith.constant 0 : index
    %c0_15 = arith.constant 0 : index
    %c0_16 = arith.constant 0 : index
    %19 = vector.load %arg6[%c0_14, %c0_15, %c0_16] : memref<2x120x40xf32, #tpu.memory_space<vmem>>, vector<1x120x40xf32>
    %20 = vector.shape_cast %19 : vector<1x120x40xf32> to vector<120x40xf32>
    %c0_17 = arith.constant 0 : index
    %c0_18 = arith.constant 0 : index
    %c0_19 = arith.constant 0 : index
    %21 = vector.load %arg7[%c0_17, %c0_18, %c0_19] : memref<2x1x120xf32, #tpu.memory_space<vmem>>, vector<1x1x120xf32>
    %22 = vector.shape_cast %21 : vector<1x1x120xf32> to vector<1x120xf32>
    %c0_20 = arith.constant 0 : index
    %c0_21 = arith.constant 0 : index
    %c0_22 = arith.constant 0 : index
    %23 = vector.load %arg8[%c0_20, %c0_21, %c0_22] : memref<2x40x40xf32, #tpu.memory_space<vmem>>, vector<1x40x40xf32>
    %24 = vector.shape_cast %23 : vector<1x40x40xf32> to vector<40x40xf32>
    %c0_23 = arith.constant 0 : index
    %c0_24 = arith.constant 0 : index
    %c0_25 = arith.constant 0 : index
    %25 = vector.load %arg9[%c0_23, %c0_24, %c0_25] : memref<2x1x40xf32, #tpu.memory_space<vmem>>, vector<1x1x40xf32>
    %26 = vector.shape_cast %25 : vector<1x1x40xf32> to vector<1x40xf32>
    %27 = vector.shape_cast %18 : vector<2x8x40xf32> to vector<16x40xf32>
    %cst_26 = arith.constant dense<0.000000e+00> : vector<16x120xf32>
    %28 = tpu.matmul %27, %20, %cst_26 {dimension_numbers = #tpu.dot_dimension_numbers<[1], [1], [0], [0], [0, 0, 1, 0], [], []>} : vector<16x40xf32>, vector<120x40xf32>, vector<16x120xf32> -> vector<16x120xf32>
    %29 = vector.broadcast %22 : vector<1x120xf32> to vector<16x120xf32>
    %30 = arith.addf %28, %29 : vector<16x120xf32>
    %31 = vector.extract_strided_slice %30 {offsets = [0, 0], sizes = [16, 8], strides = [1, 1]} : vector<16x120xf32> to vector<16x8xf32>
    %32 = vector.shape_cast %31 : vector<16x8xf32> to vector<2x8x8xf32>
    %33 = vector.extract_strided_slice %30 {offsets = [0, 40], sizes = [16, 8], strides = [1, 1]} : vector<16x120xf32> to vector<16x8xf32>
    %34 = vector.shape_cast %33 : vector<16x8xf32> to vector<2x8x8xf32>
    %35 = vector.extract_strided_slice %30 {offsets = [0, 80], sizes = [16, 8], strides = [1, 1]} : vector<16x120xf32> to vector<16x8xf32>
    %36 = vector.shape_cast %35 : vector<16x8xf32> to vector<2x8x8xf32>
    "tpu.trace_start"() <{level = 10 : i32, message = "bqd,bkd->bqk"}> : () -> ()
    %cst_27 = arith.constant dense<0.000000e+00> : vector<2x8x8xf32>
    %37 = tpu.matmul %32, %34, %cst_27 {dimension_numbers = #tpu.dot_dimension_numbers<[2], [2], [1], [1], [0, 0, 0, 1, 1, 1], [0], [0]>} : vector<2x8x8xf32>, vector<2x8x8xf32>, vector<2x8x8xf32> -> vector<2x8x8xf32>
    "tpu.trace_stop"() : () -> ()
    %cst_28 = arith.constant 0.353553385 : f32
    %38 = vector.broadcast %cst_28 : f32 to vector<2x8x8xf32>
    %39 = arith.mulf %37, %38 : vector<2x8x8xf32>
    %cst_29 = arith.constant dense<0xFF800000> : vector<2x8xf32>
    %40 = vector.multi_reduction <maximumf>, %39, %cst_29 [2] : vector<2x8x8xf32> to vector<2x8xf32>
    %41 = vector.shape_cast %40 : vector<2x8xf32> to vector<2x8x1xf32>
    %42 = vector.broadcast %41 : vector<2x8x1xf32> to vector<2x8x8xf32>
    %43 = arith.subf %39, %42 : vector<2x8x8xf32>
    %44 = math.exp %43 : vector<2x8x8xf32>
    %cst_30 = arith.constant dense<0.000000e+00> : vector<2x8xf32>
    %45 = vector.multi_reduction <add>, %44, %cst_30 [2] : vector<2x8x8xf32> to vector<2x8xf32>
    %46 = vector.shape_cast %45 : vector<2x8xf32> to vector<2x8x1xf32>
    %47 = tpu.reciprocal %46 : vector<2x8x1xf32> -> vector<2x8x1xf32>
    %48 = vector.broadcast %47 : vector<2x8x1xf32> to vector<2x8x8xf32>
    %49 = arith.mulf %44, %48 : vector<2x8x8xf32>
    "tpu.trace_start"() <{level = 10 : i32, message = "bqk,bkd->bqd"}> : () -> ()
    %cst_31 = arith.constant dense<0.000000e+00> : vector<2x8x8xf32>
    %50 = tpu.matmul %49, %36, %cst_31 {dimension_numbers = #tpu.dot_dimension_numbers<[2], [1], [1], [2], [0, 0, 0, 1, 1, 2], [0], [0]>} : vector<2x8x8xf32>, vector<2x8x8xf32>, vector<2x8x8xf32> -> vector<2x8x8xf32>
    "tpu.trace_stop"() : () -> ()
    %51 = vector.shape_cast %50 : vector<2x8x8xf32> to vector<16x8xf32>
    %52 = vector.extract_strided_slice %30 {offsets = [0, 8], sizes = [16, 8], strides = [1, 1]} : vector<16x120xf32> to vector<16x8xf32>
    %53 = vector.shape_cast %52 : vector<16x8xf32> to vector<2x8x8xf32>
    %54 = vector.extract_strided_slice %30 {offsets = [0, 48], sizes = [16, 8], strides = [1, 1]} : vector<16x120xf32> to vector<16x8xf32>
    %55 = vector.shape_cast %54 : vector<16x8xf32> to vector<2x8x8xf32>
    %56 = vector.extract_strided_slice %30 {offsets = [0, 88], sizes = [16, 8], strides = [1, 1]} : vector<16x120xf32> to vector<16x8xf32>
    %57 = vector.shape_cast %56 : vector<16x8xf32> to vector<2x8x8xf32>
    "tpu.trace_start"() <{level = 10 : i32, message = "bqd,bkd->bqk"}> : () -> ()
    %cst_32 = arith.constant dense<0.000000e+00> : vector<2x8x8xf32>
    %58 = tpu.matmul %53, %55, %cst_32 {dimension_numbers = #tpu.dot_dimension_numbers<[2], [2], [1], [1], [0, 0, 0, 1, 1, 1], [0], [0]>} : vector<2x8x8xf32>, vector<2x8x8xf32>, vector<2x8x8xf32> -> vector<2x8x8xf32>
    "tpu.trace_stop"() : () -> ()
    %cst_33 = arith.constant 0.353553385 : f32
    %59 = vector.broadcast %cst_33 : f32 to vector<2x8x8xf32>
    %60 = arith.mulf %58, %59 : vector<2x8x8xf32>
    %cst_34 = arith.constant dense<0xFF800000> : vector<2x8xf32>
    %61 = vector.multi_reduction <maximumf>, %60, %cst_34 [2] : vector<2x8x8xf32> to vector<2x8xf32>
    %62 = vector.shape_cast %61 : vector<2x8xf32> to vector<2x8x1xf32>
    %63 = vector.broadcast %62 : vector<2x8x1xf32> to vector<2x8x8xf32>
    %64 = arith.subf %60, %63 : vector<2x8x8xf32>
    %65 = math.exp %64 : vector<2x8x8xf32>
    %cst_35 = arith.constant dense<0.000000e+00> : vector<2x8xf32>
    %66 = vector.multi_reduction <add>, %65, %cst_35 [2] : vector<2x8x8xf32> to vector<2x8xf32>
    %67 = vector.shape_cast %66 : vector<2x8xf32> to vector<2x8x1xf32>
    %68 = tpu.reciprocal %67 : vector<2x8x1xf32> -> vector<2x8x1xf32>
    %69 = vector.broadcast %68 : vector<2x8x1xf32> to vector<2x8x8xf32>
    %70 = arith.mulf %65, %69 : vector<2x8x8xf32>
    "tpu.trace_start"() <{level = 10 : i32, message = "bqk,bkd->bqd"}> : () -> ()
    %cst_36 = arith.constant dense<0.000000e+00> : vector<2x8x8xf32>
    %71 = tpu.matmul %70, %57, %cst_36 {dimension_numbers = #tpu.dot_dimension_numbers<[2], [1], [1], [2], [0, 0, 0, 1, 1, 2], [0], [0]>} : vector<2x8x8xf32>, vector<2x8x8xf32>, vector<2x8x8xf32> -> vector<2x8x8xf32>
    "tpu.trace_stop"() : () -> ()
    %72 = vector.shape_cast %71 : vector<2x8x8xf32> to vector<16x8xf32>
    %73 = vector.extract_strided_slice %30 {offsets = [0, 16], sizes = [16, 8], strides = [1, 1]} : vector<16x120xf32> to vector<16x8xf32>
    %74 = vector.shape_cast %73 : vector<16x8xf32> to vector<2x8x8xf32>
    %75 = vector.extract_strided_slice %30 {offsets = [0, 56], sizes = [16, 8], strides = [1, 1]} : vector<16x120xf32> to vector<16x8xf32>
    %76 = vector.shape_cast %75 : vector<16x8xf32> to vector<2x8x8xf32>
    %77 = vector.extract_strided_slice %30 {offsets = [0, 96], sizes = [16, 8], strides = [1, 1]} : vector<16x120xf32> to vector<16x8xf32>
    %78 = vector.shape_cast %77 : vector<16x8xf32> to vector<2x8x8xf32>
    "tpu.trace_start"() <{level = 10 : i32, message = "bqd,bkd->bqk"}> : () -> ()
    %cst_37 = arith.constant dense<0.000000e+00> : vector<2x8x8xf32>
    %79 = tpu.matmul %74, %76, %cst_37 {dimension_numbers = #tpu.dot_dimension_numbers<[2], [2], [1], [1], [0, 0, 0, 1, 1, 1], [0], [0]>} : vector<2x8x8xf32>, vector<2x8x8xf32>, vector<2x8x8xf32> -> vector<2x8x8xf32>
    "tpu.trace_stop"() : () -> ()
    %cst_38 = arith.constant 0.353553385 : f32
    %80 = vector.broadcast %cst_38 : f32 to vector<2x8x8xf32>
    %81 = arith.mulf %79, %80 : vector<2x8x8xf32>
    %cst_39 = arith.constant dense<0xFF800000> : vector<2x8xf32>
    %82 = vector.multi_reduction <maximumf>, %81, %cst_39 [2] : vector<2x8x8xf32> to vector<2x8xf32>
    %83 = vector.shape_cast %82 : vector<2x8xf32> to vector<2x8x1xf32>
    %84 = vector.broadcast %83 : vector<2x8x1xf32> to vector<2x8x8xf32>
    %85 = arith.subf %81, %84 : vector<2x8x8xf32>
    %86 = math.exp %85 : vector<2x8x8xf32>
    %cst_40 = arith.constant dense<0.000000e+00> : vector<2x8xf32>
    %87 = vector.multi_reduction <add>, %86, %cst_40 [2] : vector<2x8x8xf32> to vector<2x8xf32>
    %88 = vector.shape_cast %87 : vector<2x8xf32> to vector<2x8x1xf32>
    %89 = tpu.reciprocal %88 : vector<2x8x1xf32> -> vector<2x8x1xf32>
    %90 = vector.broadcast %89 : vector<2x8x1xf32> to vector<2x8x8xf32>
    %91 = arith.mulf %86, %90 : vector<2x8x8xf32>
    "tpu.trace_start"() <{level = 10 : i32, message = "bqk,bkd->bqd"}> : () -> ()
    %cst_41 = arith.constant dense<0.000000e+00> : vector<2x8x8xf32>
    %92 = tpu.matmul %91, %78, %cst_41 {dimension_numbers = #tpu.dot_dimension_numbers<[2], [1], [1], [2], [0, 0, 0, 1, 1, 2], [0], [0]>} : vector<2x8x8xf32>, vector<2x8x8xf32>, vector<2x8x8xf32> -> vector<2x8x8xf32>
    "tpu.trace_stop"() : () -> ()
    %93 = vector.shape_cast %92 : vector<2x8x8xf32> to vector<16x8xf32>
    %94 = vector.extract_strided_slice %30 {offsets = [0, 24], sizes = [16, 8], strides = [1, 1]} : vector<16x120xf32> to vector<16x8xf32>
    %95 = vector.shape_cast %94 : vector<16x8xf32> to vector<2x8x8xf32>
    %96 = vector.extract_strided_slice %30 {offsets = [0, 64], sizes = [16, 8], strides = [1, 1]} : vector<16x120xf32> to vector<16x8xf32>
    %97 = vector.shape_cast %96 : vector<16x8xf32> to vector<2x8x8xf32>
    %98 = vector.extract_strided_slice %30 {offsets = [0, 104], sizes = [16, 8], strides = [1, 1]} : vector<16x120xf32> to vector<16x8xf32>
    %99 = vector.shape_cast %98 : vector<16x8xf32> to vector<2x8x8xf32>
    "tpu.trace_start"() <{level = 10 : i32, message = "bqd,bkd->bqk"}> : () -> ()
    %cst_42 = arith.constant dense<0.000000e+00> : vector<2x8x8xf32>
    %100 = tpu.matmul %95, %97, %cst_42 {dimension_numbers = #tpu.dot_dimension_numbers<[2], [2], [1], [1], [0, 0, 0, 1, 1, 1], [0], [0]>} : vector<2x8x8xf32>, vector<2x8x8xf32>, vector<2x8x8xf32> -> vector<2x8x8xf32>
    "tpu.trace_stop"() : () -> ()
    %cst_43 = arith.constant 0.353553385 : f32
    %101 = vector.broadcast %cst_43 : f32 to vector<2x8x8xf32>
    %102 = arith.mulf %100, %101 : vector<2x8x8xf32>
    %cst_44 = arith.constant dense<0xFF800000> : vector<2x8xf32>
    %103 = vector.multi_reduction <maximumf>, %102, %cst_44 [2] : vector<2x8x8xf32> to vector<2x8xf32>
    %104 = vector.shape_cast %103 : vector<2x8xf32> to vector<2x8x1xf32>
    %105 = vector.broadcast %104 : vector<2x8x1xf32> to vector<2x8x8xf32>
    %106 = arith.subf %102, %105 : vector<2x8x8xf32>
    %107 = math.exp %106 : vector<2x8x8xf32>
    %cst_45 = arith.constant dense<0.000000e+00> : vector<2x8xf32>
    %108 = vector.multi_reduction <add>, %107, %cst_45 [2] : vector<2x8x8xf32> to vector<2x8xf32>
    %109 = vector.shape_cast %108 : vector<2x8xf32> to vector<2x8x1xf32>
    %110 = tpu.reciprocal %109 : vector<2x8x1xf32> -> vector<2x8x1xf32>
    %111 = vector.broadcast %110 : vector<2x8x1xf32> to vector<2x8x8xf32>
    %112 = arith.mulf %107, %111 : vector<2x8x8xf32>
    "tpu.trace_start"() <{level = 10 : i32, message = "bqk,bkd->bqd"}> : () -> ()
    %cst_46 = arith.constant dense<0.000000e+00> : vector<2x8x8xf32>
    %113 = tpu.matmul %112, %99, %cst_46 {dimension_numbers = #tpu.dot_dimension_numbers<[2], [1], [1], [2], [0, 0, 0, 1, 1, 2], [0], [0]>} : vector<2x8x8xf32>, vector<2x8x8xf32>, vector<2x8x8xf32> -> vector<2x8x8xf32>
    "tpu.trace_stop"() : () -> ()
    %114 = vector.shape_cast %113 : vector<2x8x8xf32> to vector<16x8xf32>
    %115 = vector.extract_strided_slice %30 {offsets = [0, 32], sizes = [16, 8], strides = [1, 1]} : vector<16x120xf32> to vector<16x8xf32>
    %116 = vector.shape_cast %115 : vector<16x8xf32> to vector<2x8x8xf32>
    %117 = vector.extract_strided_slice %30 {offsets = [0, 72], sizes = [16, 8], strides = [1, 1]} : vector<16x120xf32> to vector<16x8xf32>
    %118 = vector.shape_cast %117 : vector<16x8xf32> to vector<2x8x8xf32>
    %119 = vector.extract_strided_slice %30 {offsets = [0, 112], sizes = [16, 8], strides = [1, 1]} : vector<16x120xf32> to vector<16x8xf32>
    %120 = vector.shape_cast %119 : vector<16x8xf32> to vector<2x8x8xf32>
    "tpu.trace_start"() <{level = 10 : i32, message = "bqd,bkd->bqk"}> : () -> ()
    %cst_47 = arith.constant dense<0.000000e+00> : vector<2x8x8xf32>
    %121 = tpu.matmul %116, %118, %cst_47 {dimension_numbers = #tpu.dot_dimension_numbers<[2], [2], [1], [1], [0, 0, 0, 1, 1, 1], [0], [0]>} : vector<2x8x8xf32>, vector<2x8x8xf32>, vector<2x8x8xf32> -> vector<2x8x8xf32>
    "tpu.trace_stop"() : () -> ()
    %cst_48 = arith.constant 0.353553385 : f32
    %122 = vector.broadcast %cst_48 : f32 to vector<2x8x8xf32>
    %123 = arith.mulf %121, %122 : vector<2x8x8xf32>
    %cst_49 = arith.constant dense<0xFF800000> : vector<2x8xf32>
    %124 = vector.multi_reduction <maximumf>, %123, %cst_49 [2] : vector<2x8x8xf32> to vector<2x8xf32>
    %125 = vector.shape_cast %124 : vector<2x8xf32> to vector<2x8x1xf32>
    %126 = vector.broadcast %125 : vector<2x8x1xf32> to vector<2x8x8xf32>
    %127 = arith.subf %123, %126 : vector<2x8x8xf32>
    %128 = math.exp %127 : vector<2x8x8xf32>
    %cst_50 = arith.constant dense<0.000000e+00> : vector<2x8xf32>
    %129 = vector.multi_reduction <add>, %128, %cst_50 [2] : vector<2x8x8xf32> to vector<2x8xf32>
    %130 = vector.shape_cast %129 : vector<2x8xf32> to vector<2x8x1xf32>
    %131 = tpu.reciprocal %130 : vector<2x8x1xf32> -> vector<2x8x1xf32>
    %132 = vector.broadcast %131 : vector<2x8x1xf32> to vector<2x8x8xf32>
    %133 = arith.mulf %128, %132 : vector<2x8x8xf32>
    "tpu.trace_start"() <{level = 10 : i32, message = "bqk,bkd->bqd"}> : () -> ()
    %cst_51 = arith.constant dense<0.000000e+00> : vector<2x8x8xf32>
    %134 = tpu.matmul %133, %120, %cst_51 {dimension_numbers = #tpu.dot_dimension_numbers<[2], [1], [1], [2], [0, 0, 0, 1, 1, 2], [0], [0]>} : vector<2x8x8xf32>, vector<2x8x8xf32>, vector<2x8x8xf32> -> vector<2x8x8xf32>
    "tpu.trace_stop"() : () -> ()
    %135 = vector.shape_cast %134 : vector<2x8x8xf32> to vector<16x8xf32>
    %136 = tpu.concatenate %51, %72, %93, %114, %135 in 1 : vector<16x8xf32>, vector<16x8xf32>, vector<16x8xf32>, vector<16x8xf32>, vector<16x8xf32> -> vector<16x40xf32>
    %cst_52 = arith.constant dense<0.000000e+00> : vector<16x40xf32>
    %137 = tpu.matmul %136, %24, %cst_52 {dimension_numbers = #tpu.dot_dimension_numbers<[1], [1], [0], [0], [0, 0, 1, 0], [], []>} : vector<16x40xf32>, vector<40x40xf32>, vector<16x40xf32> -> vector<16x40xf32>
    %138 = vector.broadcast %26 : vector<1x40xf32> to vector<16x40xf32>
    %139 = arith.addf %137, %138 : vector<16x40xf32>
    %140 = vector.shape_cast %139 : vector<16x40xf32> to vector<2x8x40xf32>
    %141 = arith.addf %18, %140 : vector<2x8x40xf32>
    %c0_53 = arith.constant 0 : index
    %c0_54 = arith.constant 0 : index
    %c0_55 = arith.constant 0 : index
    %142 = vector.load %arg14[%c0_53, %c0_54, %c0_55] : memref<2x1x40xf32, #tpu.memory_space<vmem>>, vector<1x1x40xf32>
    %143 = vector.shape_cast %142 : vector<1x1x40xf32> to vector<1x40xf32>
    %c0_56 = arith.constant 0 : index
    %c0_57 = arith.constant 0 : index
    %c0_58 = arith.constant 0 : index
    %144 = vector.load %arg15[%c0_56, %c0_57, %c0_58] : memref<2x1x40xf32, #tpu.memory_space<vmem>>, vector<1x1x40xf32>
    %145 = vector.shape_cast %144 : vector<1x1x40xf32> to vector<1x40xf32>
    %cst_59 = arith.constant dense<0.000000e+00> : vector<2x8xf32>
    %146 = vector.multi_reduction <add>, %141, %cst_59 [2] : vector<2x8x40xf32> to vector<2x8xf32>
    %147 = vector.shape_cast %146 : vector<2x8xf32> to vector<2x8x1xf32>
    %cst_60 = arith.constant 4.000000e+01 : f32
    %148 = vector.broadcast %cst_60 : f32 to vector<2x8x1xf32>
    %149 = arith.divf %147, %148 : vector<2x8x1xf32>
    %150 = vector.broadcast %149 : vector<2x8x1xf32> to vector<2x8x40xf32>
    %151 = arith.subf %141, %150 : vector<2x8x40xf32>
    %152 = arith.mulf %151, %151 : vector<2x8x40xf32>
    %cst_61 = arith.constant dense<0.000000e+00> : vector<2x8xf32>
    %153 = vector.multi_reduction <add>, %152, %cst_61 [2] : vector<2x8x40xf32> to vector<2x8xf32>
    %154 = vector.shape_cast %153 : vector<2x8xf32> to vector<2x8x1xf32>
    %cst_62 = arith.constant 4.000000e+01 : f32
    %155 = vector.broadcast %cst_62 : f32 to vector<2x8x1xf32>
    %156 = arith.divf %154, %155 : vector<2x8x1xf32>
    %157 = vector.broadcast %149 : vector<2x8x1xf32> to vector<2x8x40xf32>
    %158 = arith.subf %141, %157 : vector<2x8x40xf32>
    %cst_63 = arith.constant 9.99999974E-6 : f32
    %159 = vector.broadcast %cst_63 : f32 to vector<2x8x1xf32>
    %160 = arith.addf %156, %159 : vector<2x8x1xf32>
    %161 = math.rsqrt %160 : vector<2x8x1xf32>
    %162 = vector.broadcast %161 : vector<2x8x1xf32> to vector<2x8x40xf32>
    %163 = arith.mulf %158, %162 : vector<2x8x40xf32>
    %164 = vector.shape_cast %143 : vector<1x40xf32> to vector<1x1x40xf32>
    %165 = vector.broadcast %164 : vector<1x1x40xf32> to vector<2x8x40xf32>
    %166 = arith.mulf %163, %165 : vector<2x8x40xf32>
    %167 = vector.shape_cast %145 : vector<1x40xf32> to vector<1x1x40xf32>
    %168 = vector.broadcast %167 : vector<1x1x40xf32> to vector<2x8x40xf32>
    %169 = arith.addf %166, %168 : vector<2x8x40xf32>
    %c0_64 = arith.constant 0 : index
    %c0_65 = arith.constant 0 : index
    %c0_66 = arith.constant 0 : index
    %170 = vector.load %arg10[%c0_64, %c0_65, %c0_66] : memref<2x120x40xf32, #tpu.memory_space<vmem>>, vector<1x120x40xf32>
    %171 = vector.shape_cast %170 : vector<1x120x40xf32> to vector<120x40xf32>
    %c0_67 = arith.constant 0 : index
    %c0_68 = arith.constant 0 : index
    %c0_69 = arith.constant 0 : index
    %172 = vector.load %arg11[%c0_67, %c0_68, %c0_69] : memref<2x1x120xf32, #tpu.memory_space<vmem>>, vector<1x1x120xf32>
    %173 = vector.shape_cast %172 : vector<1x1x120xf32> to vector<1x120xf32>
    %c0_70 = arith.constant 0 : index
    %c0_71 = arith.constant 0 : index
    %c0_72 = arith.constant 0 : index
    %174 = vector.load %arg12[%c0_70, %c0_71, %c0_72] : memref<2x40x40xf32, #tpu.memory_space<vmem>>, vector<1x40x40xf32>
    %175 = vector.shape_cast %174 : vector<1x40x40xf32> to vector<40x40xf32>
    %c0_73 = arith.constant 0 : index
    %c0_74 = arith.constant 0 : index
    %c0_75 = arith.constant 0 : index
    %176 = vector.load %arg13[%c0_73, %c0_74, %c0_75] : memref<2x1x40xf32, #tpu.memory_space<vmem>>, vector<1x1x40xf32>
    %177 = vector.shape_cast %176 : vector<1x1x40xf32> to vector<1x40xf32>
    %178 = vector.extract_strided_slice %171 {offsets = [80, 0], sizes = [40, 40], strides = [1, 1]} : vector<120x40xf32> to vector<40x40xf32>
    %cst_76 = arith.constant dense<0.000000e+00> : vector<2x40xf32>
    %179 = tpu.matmul %14, %178, %cst_76 {dimension_numbers = #tpu.dot_dimension_numbers<[1], [1], [0], [0], [0, 0, 1, 0], [], []>} : vector<2x40xf32>, vector<40x40xf32>, vector<2x40xf32> -> vector<2x40xf32>
    %180 = vector.extract_strided_slice %173 {offsets = [0, 80], sizes = [1, 40], strides = [1, 1]} : vector<1x120xf32> to vector<1x40xf32>
    %181 = vector.broadcast %180 : vector<1x40xf32> to vector<2x40xf32>
    %182 = arith.addf %179, %181 : vector<2x40xf32>
    %cst_77 = arith.constant dense<0.000000e+00> : vector<2x40xf32>
    %183 = tpu.matmul %182, %175, %cst_77 {dimension_numbers = #tpu.dot_dimension_numbers<[1], [1], [0], [0], [0, 0, 1, 0], [], []>} : vector<2x40xf32>, vector<40x40xf32>, vector<2x40xf32> -> vector<2x40xf32>
    %184 = vector.broadcast %177 : vector<1x40xf32> to vector<2x40xf32>
    %185 = arith.addf %183, %184 : vector<2x40xf32>
    %186 = vector.shape_cast %185 : vector<2x40xf32> to vector<2x1x40xf32>
    %187 = vector.broadcast %186 : vector<2x1x40xf32> to vector<2x8x40xf32>
    %188 = arith.addf %169, %187 : vector<2x8x40xf32>
    %c0_78 = arith.constant 0 : index
    %c0_79 = arith.constant 0 : index
    %c0_80 = arith.constant 0 : index
    %189 = vector.load %arg16[%c0_78, %c0_79, %c0_80] : memref<2x1x40xf32, #tpu.memory_space<vmem>>, vector<1x1x40xf32>
    %190 = vector.shape_cast %189 : vector<1x1x40xf32> to vector<1x40xf32>
    %c0_81 = arith.constant 0 : index
    %c0_82 = arith.constant 0 : index
    %c0_83 = arith.constant 0 : index
    %191 = vector.load %arg17[%c0_81, %c0_82, %c0_83] : memref<2x1x40xf32, #tpu.memory_space<vmem>>, vector<1x1x40xf32>
    %192 = vector.shape_cast %191 : vector<1x1x40xf32> to vector<1x40xf32>
    %cst_84 = arith.constant dense<0.000000e+00> : vector<2x8xf32>
    %193 = vector.multi_reduction <add>, %188, %cst_84 [2] : vector<2x8x40xf32> to vector<2x8xf32>
    %194 = vector.shape_cast %193 : vector<2x8xf32> to vector<2x8x1xf32>
    %cst_85 = arith.constant 4.000000e+01 : f32
    %195 = vector.broadcast %cst_85 : f32 to vector<2x8x1xf32>
    %196 = arith.divf %194, %195 : vector<2x8x1xf32>
    %197 = vector.broadcast %196 : vector<2x8x1xf32> to vector<2x8x40xf32>
    %198 = arith.subf %188, %197 : vector<2x8x40xf32>
    %199 = arith.mulf %198, %198 : vector<2x8x40xf32>
    %cst_86 = arith.constant dense<0.000000e+00> : vector<2x8xf32>
    %200 = vector.multi_reduction <add>, %199, %cst_86 [2] : vector<2x8x40xf32> to vector<2x8xf32>
    %201 = vector.shape_cast %200 : vector<2x8xf32> to vector<2x8x1xf32>
    %cst_87 = arith.constant 4.000000e+01 : f32
    %202 = vector.broadcast %cst_87 : f32 to vector<2x8x1xf32>
    %203 = arith.divf %201, %202 : vector<2x8x1xf32>
    %204 = vector.broadcast %196 : vector<2x8x1xf32> to vector<2x8x40xf32>
    %205 = arith.subf %188, %204 : vector<2x8x40xf32>
    %cst_88 = arith.constant 9.99999974E-6 : f32
    %206 = vector.broadcast %cst_88 : f32 to vector<2x8x1xf32>
    %207 = arith.addf %203, %206 : vector<2x8x1xf32>
    %208 = math.rsqrt %207 : vector<2x8x1xf32>
    %209 = vector.broadcast %208 : vector<2x8x1xf32> to vector<2x8x40xf32>
    %210 = arith.mulf %205, %209 : vector<2x8x40xf32>
    %211 = vector.shape_cast %190 : vector<1x40xf32> to vector<1x1x40xf32>
    %212 = vector.broadcast %211 : vector<1x1x40xf32> to vector<2x8x40xf32>
    %213 = arith.mulf %210, %212 : vector<2x8x40xf32>
    %214 = vector.shape_cast %192 : vector<1x40xf32> to vector<1x1x40xf32>
    %215 = vector.broadcast %214 : vector<1x1x40xf32> to vector<2x8x40xf32>
    %216 = arith.addf %213, %215 : vector<2x8x40xf32>
    %217 = vector.shape_cast %216 : vector<2x8x40xf32> to vector<16x40xf32>
    %c0_89 = arith.constant 0 : index
    %c0_90 = arith.constant 0 : index
    %c0_91 = arith.constant 0 : index
    %218 = vector.load %arg20[%c0_89, %c0_90, %c0_91] : memref<2x64x40xf32, #tpu.memory_space<vmem>>, vector<1x64x40xf32>
    %219 = vector.shape_cast %218 : vector<1x64x40xf32> to vector<64x40xf32>
    %cst_92 = arith.constant dense<0.000000e+00> : vector<16x64xf32>
    %220 = tpu.matmul %217, %219, %cst_92 {dimension_numbers = #tpu.dot_dimension_numbers<[1], [1], [0], [0], [0, 0, 1, 0], [], []>} : vector<16x40xf32>, vector<64x40xf32>, vector<16x64xf32> -> vector<16x64xf32>
    %c0_93 = arith.constant 0 : index
    %c0_94 = arith.constant 0 : index
    %c0_95 = arith.constant 0 : index
    %221 = vector.load %arg21[%c0_93, %c0_94, %c0_95] : memref<2x1x64xf32, #tpu.memory_space<vmem>>, vector<1x1x64xf32>
    %222 = vector.shape_cast %221 : vector<1x1x64xf32> to vector<1x64xf32>
    %223 = vector.broadcast %222 : vector<1x64xf32> to vector<16x64xf32>
    %224 = arith.addf %220, %223 : vector<16x64xf32>
    %cst_96 = arith.constant 0.000000e+00 : f32
    %225 = vector.broadcast %cst_96 : f32 to vector<16x64xf32>
    %226 = arith.maximumf %224, %225 : vector<16x64xf32>
    %c0_97 = arith.constant 0 : index
    %c0_98 = arith.constant 0 : index
    %c0_99 = arith.constant 0 : index
    %227 = vector.load %arg22[%c0_97, %c0_98, %c0_99] : memref<2x40x64xf32, #tpu.memory_space<vmem>>, vector<1x40x64xf32>
    %228 = vector.shape_cast %227 : vector<1x40x64xf32> to vector<40x64xf32>
    %cst_100 = arith.constant dense<0.000000e+00> : vector<16x40xf32>
    %229 = tpu.matmul %226, %228, %cst_100 {dimension_numbers = #tpu.dot_dimension_numbers<[1], [1], [0], [0], [0, 0, 1, 0], [], []>} : vector<16x64xf32>, vector<40x64xf32>, vector<16x40xf32> -> vector<16x40xf32>
    %c0_101 = arith.constant 0 : index
    %c0_102 = arith.constant 0 : index
    %c0_103 = arith.constant 0 : index
    %230 = vector.load %arg23[%c0_101, %c0_102, %c0_103] : memref<2x1x40xf32, #tpu.memory_space<vmem>>, vector<1x1x40xf32>
    %231 = vector.shape_cast %230 : vector<1x1x40xf32> to vector<1x40xf32>
    %232 = vector.broadcast %231 : vector<1x40xf32> to vector<16x40xf32>
    %233 = arith.addf %229, %232 : vector<16x40xf32>
    %234 = vector.shape_cast %233 : vector<16x40xf32> to vector<2x8x40xf32>
    %235 = arith.addf %216, %234 : vector<2x8x40xf32>
    %c0_104 = arith.constant 0 : index
    %c0_105 = arith.constant 0 : index
    %c0_106 = arith.constant 0 : index
    %236 = vector.load %arg18[%c0_104, %c0_105, %c0_106] : memref<2x1x40xf32, #tpu.memory_space<vmem>>, vector<1x1x40xf32>
    %237 = vector.shape_cast %236 : vector<1x1x40xf32> to vector<1x40xf32>
    %c0_107 = arith.constant 0 : index
    %c0_108 = arith.constant 0 : index
    %c0_109 = arith.constant 0 : index
    %238 = vector.load %arg19[%c0_107, %c0_108, %c0_109] : memref<2x1x40xf32, #tpu.memory_space<vmem>>, vector<1x1x40xf32>
    %239 = vector.shape_cast %238 : vector<1x1x40xf32> to vector<1x40xf32>
    %cst_110 = arith.constant dense<0.000000e+00> : vector<2x8xf32>
    %240 = vector.multi_reduction <add>, %235, %cst_110 [2] : vector<2x8x40xf32> to vector<2x8xf32>
    %241 = vector.shape_cast %240 : vector<2x8xf32> to vector<2x8x1xf32>
    %cst_111 = arith.constant 4.000000e+01 : f32
    %242 = vector.broadcast %cst_111 : f32 to vector<2x8x1xf32>
    %243 = arith.divf %241, %242 : vector<2x8x1xf32>
    %244 = vector.broadcast %243 : vector<2x8x1xf32> to vector<2x8x40xf32>
    %245 = arith.subf %235, %244 : vector<2x8x40xf32>
    %246 = arith.mulf %245, %245 : vector<2x8x40xf32>
    %cst_112 = arith.constant dense<0.000000e+00> : vector<2x8xf32>
    %247 = vector.multi_reduction <add>, %246, %cst_112 [2] : vector<2x8x40xf32> to vector<2x8xf32>
    %248 = vector.shape_cast %247 : vector<2x8xf32> to vector<2x8x1xf32>
    %cst_113 = arith.constant 4.000000e+01 : f32
    %249 = vector.broadcast %cst_113 : f32 to vector<2x8x1xf32>
    %250 = arith.divf %248, %249 : vector<2x8x1xf32>
    %251 = vector.broadcast %243 : vector<2x8x1xf32> to vector<2x8x40xf32>
    %252 = arith.subf %235, %251 : vector<2x8x40xf32>
    %cst_114 = arith.constant 9.99999974E-6 : f32
    %253 = vector.broadcast %cst_114 : f32 to vector<2x8x1xf32>
    %254 = arith.addf %250, %253 : vector<2x8x1xf32>
    %255 = math.rsqrt %254 : vector<2x8x1xf32>
    %256 = vector.broadcast %255 : vector<2x8x1xf32> to vector<2x8x40xf32>
    %257 = arith.mulf %252, %256 : vector<2x8x40xf32>
    %258 = vector.shape_cast %237 : vector<1x40xf32> to vector<1x1x40xf32>
    %259 = vector.broadcast %258 : vector<1x1x40xf32> to vector<2x8x40xf32>
    %260 = arith.mulf %257, %259 : vector<2x8x40xf32>
    %261 = vector.shape_cast %239 : vector<1x40xf32> to vector<1x1x40xf32>
    %262 = vector.broadcast %261 : vector<1x1x40xf32> to vector<2x8x40xf32>
    %263 = arith.addf %260, %262 : vector<2x8x40xf32>
    %c1 = arith.constant 1 : index
    %c0_115 = arith.constant 0 : index
    %c0_116 = arith.constant 0 : index
    %264 = vector.load %arg6[%c1, %c0_115, %c0_116] : memref<2x120x40xf32, #tpu.memory_space<vmem>>, vector<1x120x40xf32>
    %265 = vector.shape_cast %264 : vector<1x120x40xf32> to vector<120x40xf32>
    %c1_117 = arith.constant 1 : index
    %c0_118 = arith.constant 0 : index
    %c0_119 = arith.constant 0 : index
    %266 = vector.load %arg7[%c1_117, %c0_118, %c0_119] : memref<2x1x120xf32, #tpu.memory_space<vmem>>, vector<1x1x120xf32>
    %267 = vector.shape_cast %266 : vector<1x1x120xf32> to vector<1x120xf32>
    %c1_120 = arith.constant 1 : index
    %c0_121 = arith.constant 0 : index
    %c0_122 = arith.constant 0 : index
    %268 = vector.load %arg8[%c1_120, %c0_121, %c0_122] : memref<2x40x40xf32, #tpu.memory_space<vmem>>, vector<1x40x40xf32>
    %269 = vector.shape_cast %268 : vector<1x40x40xf32> to vector<40x40xf32>
    %c1_123 = arith.constant 1 : index
    %c0_124 = arith.constant 0 : index
    %c0_125 = arith.constant 0 : index
    %270 = vector.load %arg9[%c1_123, %c0_124, %c0_125] : memref<2x1x40xf32, #tpu.memory_space<vmem>>, vector<1x1x40xf32>
    %271 = vector.shape_cast %270 : vector<1x1x40xf32> to vector<1x40xf32>
    %272 = vector.shape_cast %263 : vector<2x8x40xf32> to vector<16x40xf32>
    %cst_126 = arith.constant dense<0.000000e+00> : vector<16x120xf32>
    %273 = tpu.matmul %272, %265, %cst_126 {dimension_numbers = #tpu.dot_dimension_numbers<[1], [1], [0], [0], [0, 0, 1, 0], [], []>} : vector<16x40xf32>, vector<120x40xf32>, vector<16x120xf32> -> vector<16x120xf32>
    %274 = vector.broadcast %267 : vector<1x120xf32> to vector<16x120xf32>
    %275 = arith.addf %273, %274 : vector<16x120xf32>
    %276 = vector.extract_strided_slice %275 {offsets = [0, 0], sizes = [16, 8], strides = [1, 1]} : vector<16x120xf32> to vector<16x8xf32>
    %277 = vector.shape_cast %276 : vector<16x8xf32> to vector<2x8x8xf32>
    %278 = vector.extract_strided_slice %275 {offsets = [0, 40], sizes = [16, 8], strides = [1, 1]} : vector<16x120xf32> to vector<16x8xf32>
    %279 = vector.shape_cast %278 : vector<16x8xf32> to vector<2x8x8xf32>
    %280 = vector.extract_strided_slice %275 {offsets = [0, 80], sizes = [16, 8], strides = [1, 1]} : vector<16x120xf32> to vector<16x8xf32>
    %281 = vector.shape_cast %280 : vector<16x8xf32> to vector<2x8x8xf32>
    "tpu.trace_start"() <{level = 10 : i32, message = "bqd,bkd->bqk"}> : () -> ()
    %cst_127 = arith.constant dense<0.000000e+00> : vector<2x8x8xf32>
    %282 = tpu.matmul %277, %279, %cst_127 {dimension_numbers = #tpu.dot_dimension_numbers<[2], [2], [1], [1], [0, 0, 0, 1, 1, 1], [0], [0]>} : vector<2x8x8xf32>, vector<2x8x8xf32>, vector<2x8x8xf32> -> vector<2x8x8xf32>
    "tpu.trace_stop"() : () -> ()
    %cst_128 = arith.constant 0.353553385 : f32
    %283 = vector.broadcast %cst_128 : f32 to vector<2x8x8xf32>
    %284 = arith.mulf %282, %283 : vector<2x8x8xf32>
    %cst_129 = arith.constant dense<0xFF800000> : vector<2x8xf32>
    %285 = vector.multi_reduction <maximumf>, %284, %cst_129 [2] : vector<2x8x8xf32> to vector<2x8xf32>
    %286 = vector.shape_cast %285 : vector<2x8xf32> to vector<2x8x1xf32>
    %287 = vector.broadcast %286 : vector<2x8x1xf32> to vector<2x8x8xf32>
    %288 = arith.subf %284, %287 : vector<2x8x8xf32>
    %289 = math.exp %288 : vector<2x8x8xf32>
    %cst_130 = arith.constant dense<0.000000e+00> : vector<2x8xf32>
    %290 = vector.multi_reduction <add>, %289, %cst_130 [2] : vector<2x8x8xf32> to vector<2x8xf32>
    %291 = vector.shape_cast %290 : vector<2x8xf32> to vector<2x8x1xf32>
    %292 = tpu.reciprocal %291 : vector<2x8x1xf32> -> vector<2x8x1xf32>
    %293 = vector.broadcast %292 : vector<2x8x1xf32> to vector<2x8x8xf32>
    %294 = arith.mulf %289, %293 : vector<2x8x8xf32>
    "tpu.trace_start"() <{level = 10 : i32, message = "bqk,bkd->bqd"}> : () -> ()
    %cst_131 = arith.constant dense<0.000000e+00> : vector<2x8x8xf32>
    %295 = tpu.matmul %294, %281, %cst_131 {dimension_numbers = #tpu.dot_dimension_numbers<[2], [1], [1], [2], [0, 0, 0, 1, 1, 2], [0], [0]>} : vector<2x8x8xf32>, vector<2x8x8xf32>, vector<2x8x8xf32> -> vector<2x8x8xf32>
    "tpu.trace_stop"() : () -> ()
    %296 = vector.shape_cast %295 : vector<2x8x8xf32> to vector<16x8xf32>
    %297 = vector.extract_strided_slice %275 {offsets = [0, 8], sizes = [16, 8], strides = [1, 1]} : vector<16x120xf32> to vector<16x8xf32>
    %298 = vector.shape_cast %297 : vector<16x8xf32> to vector<2x8x8xf32>
    %299 = vector.extract_strided_slice %275 {offsets = [0, 48], sizes = [16, 8], strides = [1, 1]} : vector<16x120xf32> to vector<16x8xf32>
    %300 = vector.shape_cast %299 : vector<16x8xf32> to vector<2x8x8xf32>
    %301 = vector.extract_strided_slice %275 {offsets = [0, 88], sizes = [16, 8], strides = [1, 1]} : vector<16x120xf32> to vector<16x8xf32>
    %302 = vector.shape_cast %301 : vector<16x8xf32> to vector<2x8x8xf32>
    "tpu.trace_start"() <{level = 10 : i32, message = "bqd,bkd->bqk"}> : () -> ()
    %cst_132 = arith.constant dense<0.000000e+00> : vector<2x8x8xf32>
    %303 = tpu.matmul %298, %300, %cst_132 {dimension_numbers = #tpu.dot_dimension_numbers<[2], [2], [1], [1], [0, 0, 0, 1, 1, 1], [0], [0]>} : vector<2x8x8xf32>, vector<2x8x8xf32>, vector<2x8x8xf32> -> vector<2x8x8xf32>
    "tpu.trace_stop"() : () -> ()
    %cst_133 = arith.constant 0.353553385 : f32
    %304 = vector.broadcast %cst_133 : f32 to vector<2x8x8xf32>
    %305 = arith.mulf %303, %304 : vector<2x8x8xf32>
    %cst_134 = arith.constant dense<0xFF800000> : vector<2x8xf32>
    %306 = vector.multi_reduction <maximumf>, %305, %cst_134 [2] : vector<2x8x8xf32> to vector<2x8xf32>
    %307 = vector.shape_cast %306 : vector<2x8xf32> to vector<2x8x1xf32>
    %308 = vector.broadcast %307 : vector<2x8x1xf32> to vector<2x8x8xf32>
    %309 = arith.subf %305, %308 : vector<2x8x8xf32>
    %310 = math.exp %309 : vector<2x8x8xf32>
    %cst_135 = arith.constant dense<0.000000e+00> : vector<2x8xf32>
    %311 = vector.multi_reduction <add>, %310, %cst_135 [2] : vector<2x8x8xf32> to vector<2x8xf32>
    %312 = vector.shape_cast %311 : vector<2x8xf32> to vector<2x8x1xf32>
    %313 = tpu.reciprocal %312 : vector<2x8x1xf32> -> vector<2x8x1xf32>
    %314 = vector.broadcast %313 : vector<2x8x1xf32> to vector<2x8x8xf32>
    %315 = arith.mulf %310, %314 : vector<2x8x8xf32>
    "tpu.trace_start"() <{level = 10 : i32, message = "bqk,bkd->bqd"}> : () -> ()
    %cst_136 = arith.constant dense<0.000000e+00> : vector<2x8x8xf32>
    %316 = tpu.matmul %315, %302, %cst_136 {dimension_numbers = #tpu.dot_dimension_numbers<[2], [1], [1], [2], [0, 0, 0, 1, 1, 2], [0], [0]>} : vector<2x8x8xf32>, vector<2x8x8xf32>, vector<2x8x8xf32> -> vector<2x8x8xf32>
    "tpu.trace_stop"() : () -> ()
    %317 = vector.shape_cast %316 : vector<2x8x8xf32> to vector<16x8xf32>
    %318 = vector.extract_strided_slice %275 {offsets = [0, 16], sizes = [16, 8], strides = [1, 1]} : vector<16x120xf32> to vector<16x8xf32>
    %319 = vector.shape_cast %318 : vector<16x8xf32> to vector<2x8x8xf32>
    %320 = vector.extract_strided_slice %275 {offsets = [0, 56], sizes = [16, 8], strides = [1, 1]} : vector<16x120xf32> to vector<16x8xf32>
    %321 = vector.shape_cast %320 : vector<16x8xf32> to vector<2x8x8xf32>
    %322 = vector.extract_strided_slice %275 {offsets = [0, 96], sizes = [16, 8], strides = [1, 1]} : vector<16x120xf32> to vector<16x8xf32>
    %323 = vector.shape_cast %322 : vector<16x8xf32> to vector<2x8x8xf32>
    "tpu.trace_start"() <{level = 10 : i32, message = "bqd,bkd->bqk"}> : () -> ()
    %cst_137 = arith.constant dense<0.000000e+00> : vector<2x8x8xf32>
    %324 = tpu.matmul %319, %321, %cst_137 {dimension_numbers = #tpu.dot_dimension_numbers<[2], [2], [1], [1], [0, 0, 0, 1, 1, 1], [0], [0]>} : vector<2x8x8xf32>, vector<2x8x8xf32>, vector<2x8x8xf32> -> vector<2x8x8xf32>
    "tpu.trace_stop"() : () -> ()
    %cst_138 = arith.constant 0.353553385 : f32
    %325 = vector.broadcast %cst_138 : f32 to vector<2x8x8xf32>
    %326 = arith.mulf %324, %325 : vector<2x8x8xf32>
    %cst_139 = arith.constant dense<0xFF800000> : vector<2x8xf32>
    %327 = vector.multi_reduction <maximumf>, %326, %cst_139 [2] : vector<2x8x8xf32> to vector<2x8xf32>
    %328 = vector.shape_cast %327 : vector<2x8xf32> to vector<2x8x1xf32>
    %329 = vector.broadcast %328 : vector<2x8x1xf32> to vector<2x8x8xf32>
    %330 = arith.subf %326, %329 : vector<2x8x8xf32>
    %331 = math.exp %330 : vector<2x8x8xf32>
    %cst_140 = arith.constant dense<0.000000e+00> : vector<2x8xf32>
    %332 = vector.multi_reduction <add>, %331, %cst_140 [2] : vector<2x8x8xf32> to vector<2x8xf32>
    %333 = vector.shape_cast %332 : vector<2x8xf32> to vector<2x8x1xf32>
    %334 = tpu.reciprocal %333 : vector<2x8x1xf32> -> vector<2x8x1xf32>
    %335 = vector.broadcast %334 : vector<2x8x1xf32> to vector<2x8x8xf32>
    %336 = arith.mulf %331, %335 : vector<2x8x8xf32>
    "tpu.trace_start"() <{level = 10 : i32, message = "bqk,bkd->bqd"}> : () -> ()
    %cst_141 = arith.constant dense<0.000000e+00> : vector<2x8x8xf32>
    %337 = tpu.matmul %336, %323, %cst_141 {dimension_numbers = #tpu.dot_dimension_numbers<[2], [1], [1], [2], [0, 0, 0, 1, 1, 2], [0], [0]>} : vector<2x8x8xf32>, vector<2x8x8xf32>, vector<2x8x8xf32> -> vector<2x8x8xf32>
    "tpu.trace_stop"() : () -> ()
    %338 = vector.shape_cast %337 : vector<2x8x8xf32> to vector<16x8xf32>
    %339 = vector.extract_strided_slice %275 {offsets = [0, 24], sizes = [16, 8], strides = [1, 1]} : vector<16x120xf32> to vector<16x8xf32>
    %340 = vector.shape_cast %339 : vector<16x8xf32> to vector<2x8x8xf32>
    %341 = vector.extract_strided_slice %275 {offsets = [0, 64], sizes = [16, 8], strides = [1, 1]} : vector<16x120xf32> to vector<16x8xf32>
    %342 = vector.shape_cast %341 : vector<16x8xf32> to vector<2x8x8xf32>
    %343 = vector.extract_strided_slice %275 {offsets = [0, 104], sizes = [16, 8], strides = [1, 1]} : vector<16x120xf32> to vector<16x8xf32>
    %344 = vector.shape_cast %343 : vector<16x8xf32> to vector<2x8x8xf32>
    "tpu.trace_start"() <{level = 10 : i32, message = "bqd,bkd->bqk"}> : () -> ()
    %cst_142 = arith.constant dense<0.000000e+00> : vector<2x8x8xf32>
    %345 = tpu.matmul %340, %342, %cst_142 {dimension_numbers = #tpu.dot_dimension_numbers<[2], [2], [1], [1], [0, 0, 0, 1, 1, 1], [0], [0]>} : vector<2x8x8xf32>, vector<2x8x8xf32>, vector<2x8x8xf32> -> vector<2x8x8xf32>
    "tpu.trace_stop"() : () -> ()
    %cst_143 = arith.constant 0.353553385 : f32
    %346 = vector.broadcast %cst_143 : f32 to vector<2x8x8xf32>
    %347 = arith.mulf %345, %346 : vector<2x8x8xf32>
    %cst_144 = arith.constant dense<0xFF800000> : vector<2x8xf32>
    %348 = vector.multi_reduction <maximumf>, %347, %cst_144 [2] : vector<2x8x8xf32> to vector<2x8xf32>
    %349 = vector.shape_cast %348 : vector<2x8xf32> to vector<2x8x1xf32>
    %350 = vector.broadcast %349 : vector<2x8x1xf32> to vector<2x8x8xf32>
    %351 = arith.subf %347, %350 : vector<2x8x8xf32>
    %352 = math.exp %351 : vector<2x8x8xf32>
    %cst_145 = arith.constant dense<0.000000e+00> : vector<2x8xf32>
    %353 = vector.multi_reduction <add>, %352, %cst_145 [2] : vector<2x8x8xf32> to vector<2x8xf32>
    %354 = vector.shape_cast %353 : vector<2x8xf32> to vector<2x8x1xf32>
    %355 = tpu.reciprocal %354 : vector<2x8x1xf32> -> vector<2x8x1xf32>
    %356 = vector.broadcast %355 : vector<2x8x1xf32> to vector<2x8x8xf32>
    %357 = arith.mulf %352, %356 : vector<2x8x8xf32>
    "tpu.trace_start"() <{level = 10 : i32, message = "bqk,bkd->bqd"}> : () -> ()
    %cst_146 = arith.constant dense<0.000000e+00> : vector<2x8x8xf32>
    %358 = tpu.matmul %357, %344, %cst_146 {dimension_numbers = #tpu.dot_dimension_numbers<[2], [1], [1], [2], [0, 0, 0, 1, 1, 2], [0], [0]>} : vector<2x8x8xf32>, vector<2x8x8xf32>, vector<2x8x8xf32> -> vector<2x8x8xf32>
    "tpu.trace_stop"() : () -> ()
    %359 = vector.shape_cast %358 : vector<2x8x8xf32> to vector<16x8xf32>
    %360 = vector.extract_strided_slice %275 {offsets = [0, 32], sizes = [16, 8], strides = [1, 1]} : vector<16x120xf32> to vector<16x8xf32>
    %361 = vector.shape_cast %360 : vector<16x8xf32> to vector<2x8x8xf32>
    %362 = vector.extract_strided_slice %275 {offsets = [0, 72], sizes = [16, 8], strides = [1, 1]} : vector<16x120xf32> to vector<16x8xf32>
    %363 = vector.shape_cast %362 : vector<16x8xf32> to vector<2x8x8xf32>
    %364 = vector.extract_strided_slice %275 {offsets = [0, 112], sizes = [16, 8], strides = [1, 1]} : vector<16x120xf32> to vector<16x8xf32>
    %365 = vector.shape_cast %364 : vector<16x8xf32> to vector<2x8x8xf32>
    "tpu.trace_start"() <{level = 10 : i32, message = "bqd,bkd->bqk"}> : () -> ()
    %cst_147 = arith.constant dense<0.000000e+00> : vector<2x8x8xf32>
    %366 = tpu.matmul %361, %363, %cst_147 {dimension_numbers = #tpu.dot_dimension_numbers<[2], [2], [1], [1], [0, 0, 0, 1, 1, 1], [0], [0]>} : vector<2x8x8xf32>, vector<2x8x8xf32>, vector<2x8x8xf32> -> vector<2x8x8xf32>
    "tpu.trace_stop"() : () -> ()
    %cst_148 = arith.constant 0.353553385 : f32
    %367 = vector.broadcast %cst_148 : f32 to vector<2x8x8xf32>
    %368 = arith.mulf %366, %367 : vector<2x8x8xf32>
    %cst_149 = arith.constant dense<0xFF800000> : vector<2x8xf32>
    %369 = vector.multi_reduction <maximumf>, %368, %cst_149 [2] : vector<2x8x8xf32> to vector<2x8xf32>
    %370 = vector.shape_cast %369 : vector<2x8xf32> to vector<2x8x1xf32>
    %371 = vector.broadcast %370 : vector<2x8x1xf32> to vector<2x8x8xf32>
    %372 = arith.subf %368, %371 : vector<2x8x8xf32>
    %373 = math.exp %372 : vector<2x8x8xf32>
    %cst_150 = arith.constant dense<0.000000e+00> : vector<2x8xf32>
    %374 = vector.multi_reduction <add>, %373, %cst_150 [2] : vector<2x8x8xf32> to vector<2x8xf32>
    %375 = vector.shape_cast %374 : vector<2x8xf32> to vector<2x8x1xf32>
    %376 = tpu.reciprocal %375 : vector<2x8x1xf32> -> vector<2x8x1xf32>
    %377 = vector.broadcast %376 : vector<2x8x1xf32> to vector<2x8x8xf32>
    %378 = arith.mulf %373, %377 : vector<2x8x8xf32>
    "tpu.trace_start"() <{level = 10 : i32, message = "bqk,bkd->bqd"}> : () -> ()
    %cst_151 = arith.constant dense<0.000000e+00> : vector<2x8x8xf32>
    %379 = tpu.matmul %378, %365, %cst_151 {dimension_numbers = #tpu.dot_dimension_numbers<[2], [1], [1], [2], [0, 0, 0, 1, 1, 2], [0], [0]>} : vector<2x8x8xf32>, vector<2x8x8xf32>, vector<2x8x8xf32> -> vector<2x8x8xf32>
    "tpu.trace_stop"() : () -> ()
    %380 = vector.shape_cast %379 : vector<2x8x8xf32> to vector<16x8xf32>
    %381 = tpu.concatenate %296, %317, %338, %359, %380 in 1 : vector<16x8xf32>, vector<16x8xf32>, vector<16x8xf32>, vector<16x8xf32>, vector<16x8xf32> -> vector<16x40xf32>
    %cst_152 = arith.constant dense<0.000000e+00> : vector<16x40xf32>
    %382 = tpu.matmul %381, %269, %cst_152 {dimension_numbers = #tpu.dot_dimension_numbers<[1], [1], [0], [0], [0, 0, 1, 0], [], []>} : vector<16x40xf32>, vector<40x40xf32>, vector<16x40xf32> -> vector<16x40xf32>
    %383 = vector.broadcast %271 : vector<1x40xf32> to vector<16x40xf32>
    %384 = arith.addf %382, %383 : vector<16x40xf32>
    %385 = vector.shape_cast %384 : vector<16x40xf32> to vector<2x8x40xf32>
    %386 = arith.addf %263, %385 : vector<2x8x40xf32>
    %c1_153 = arith.constant 1 : index
    %c0_154 = arith.constant 0 : index
    %c0_155 = arith.constant 0 : index
    %387 = vector.load %arg14[%c1_153, %c0_154, %c0_155] : memref<2x1x40xf32, #tpu.memory_space<vmem>>, vector<1x1x40xf32>
    %388 = vector.shape_cast %387 : vector<1x1x40xf32> to vector<1x40xf32>
    %c1_156 = arith.constant 1 : index
    %c0_157 = arith.constant 0 : index
    %c0_158 = arith.constant 0 : index
    %389 = vector.load %arg15[%c1_156, %c0_157, %c0_158] : memref<2x1x40xf32, #tpu.memory_space<vmem>>, vector<1x1x40xf32>
    %390 = vector.shape_cast %389 : vector<1x1x40xf32> to vector<1x40xf32>
    %cst_159 = arith.constant dense<0.000000e+00> : vector<2x8xf32>
    %391 = vector.multi_reduction <add>, %386, %cst_159 [2] : vector<2x8x40xf32> to vector<2x8xf32>
    %392 = vector.shape_cast %391 : vector<2x8xf32> to vector<2x8x1xf32>
    %cst_160 = arith.constant 4.000000e+01 : f32
    %393 = vector.broadcast %cst_160 : f32 to vector<2x8x1xf32>
    %394 = arith.divf %392, %393 : vector<2x8x1xf32>
    %395 = vector.broadcast %394 : vector<2x8x1xf32> to vector<2x8x40xf32>
    %396 = arith.subf %386, %395 : vector<2x8x40xf32>
    %397 = arith.mulf %396, %396 : vector<2x8x40xf32>
    %cst_161 = arith.constant dense<0.000000e+00> : vector<2x8xf32>
    %398 = vector.multi_reduction <add>, %397, %cst_161 [2] : vector<2x8x40xf32> to vector<2x8xf32>
    %399 = vector.shape_cast %398 : vector<2x8xf32> to vector<2x8x1xf32>
    %cst_162 = arith.constant 4.000000e+01 : f32
    %400 = vector.broadcast %cst_162 : f32 to vector<2x8x1xf32>
    %401 = arith.divf %399, %400 : vector<2x8x1xf32>
    %402 = vector.broadcast %394 : vector<2x8x1xf32> to vector<2x8x40xf32>
    %403 = arith.subf %386, %402 : vector<2x8x40xf32>
    %cst_163 = arith.constant 9.99999974E-6 : f32
    %404 = vector.broadcast %cst_163 : f32 to vector<2x8x1xf32>
    %405 = arith.addf %401, %404 : vector<2x8x1xf32>
    %406 = math.rsqrt %405 : vector<2x8x1xf32>
    %407 = vector.broadcast %406 : vector<2x8x1xf32> to vector<2x8x40xf32>
    %408 = arith.mulf %403, %407 : vector<2x8x40xf32>
    %409 = vector.shape_cast %388 : vector<1x40xf32> to vector<1x1x40xf32>
    %410 = vector.broadcast %409 : vector<1x1x40xf32> to vector<2x8x40xf32>
    %411 = arith.mulf %408, %410 : vector<2x8x40xf32>
    %412 = vector.shape_cast %390 : vector<1x40xf32> to vector<1x1x40xf32>
    %413 = vector.broadcast %412 : vector<1x1x40xf32> to vector<2x8x40xf32>
    %414 = arith.addf %411, %413 : vector<2x8x40xf32>
    %c1_164 = arith.constant 1 : index
    %c0_165 = arith.constant 0 : index
    %c0_166 = arith.constant 0 : index
    %415 = vector.load %arg10[%c1_164, %c0_165, %c0_166] : memref<2x120x40xf32, #tpu.memory_space<vmem>>, vector<1x120x40xf32>
    %416 = vector.shape_cast %415 : vector<1x120x40xf32> to vector<120x40xf32>
    %c1_167 = arith.constant 1 : index
    %c0_168 = arith.constant 0 : index
    %c0_169 = arith.constant 0 : index
    %417 = vector.load %arg11[%c1_167, %c0_168, %c0_169] : memref<2x1x120xf32, #tpu.memory_space<vmem>>, vector<1x1x120xf32>
    %418 = vector.shape_cast %417 : vector<1x1x120xf32> to vector<1x120xf32>
    %c1_170 = arith.constant 1 : index
    %c0_171 = arith.constant 0 : index
    %c0_172 = arith.constant 0 : index
    %419 = vector.load %arg12[%c1_170, %c0_171, %c0_172] : memref<2x40x40xf32, #tpu.memory_space<vmem>>, vector<1x40x40xf32>
    %420 = vector.shape_cast %419 : vector<1x40x40xf32> to vector<40x40xf32>
    %c1_173 = arith.constant 1 : index
    %c0_174 = arith.constant 0 : index
    %c0_175 = arith.constant 0 : index
    %421 = vector.load %arg13[%c1_173, %c0_174, %c0_175] : memref<2x1x40xf32, #tpu.memory_space<vmem>>, vector<1x1x40xf32>
    %422 = vector.shape_cast %421 : vector<1x1x40xf32> to vector<1x40xf32>
    %423 = vector.extract_strided_slice %416 {offsets = [80, 0], sizes = [40, 40], strides = [1, 1]} : vector<120x40xf32> to vector<40x40xf32>
    %cst_176 = arith.constant dense<0.000000e+00> : vector<2x40xf32>
    %424 = tpu.matmul %14, %423, %cst_176 {dimension_numbers = #tpu.dot_dimension_numbers<[1], [1], [0], [0], [0, 0, 1, 0], [], []>} : vector<2x40xf32>, vector<40x40xf32>, vector<2x40xf32> -> vector<2x40xf32>
    %425 = vector.extract_strided_slice %418 {offsets = [0, 80], sizes = [1, 40], strides = [1, 1]} : vector<1x120xf32> to vector<1x40xf32>
    %426 = vector.broadcast %425 : vector<1x40xf32> to vector<2x40xf32>
    %427 = arith.addf %424, %426 : vector<2x40xf32>
    %cst_177 = arith.constant dense<0.000000e+00> : vector<2x40xf32>
    %428 = tpu.matmul %427, %420, %cst_177 {dimension_numbers = #tpu.dot_dimension_numbers<[1], [1], [0], [0], [0, 0, 1, 0], [], []>} : vector<2x40xf32>, vector<40x40xf32>, vector<2x40xf32> -> vector<2x40xf32>
    %429 = vector.broadcast %422 : vector<1x40xf32> to vector<2x40xf32>
    %430 = arith.addf %428, %429 : vector<2x40xf32>
    %431 = vector.shape_cast %430 : vector<2x40xf32> to vector<2x1x40xf32>
    %432 = vector.broadcast %431 : vector<2x1x40xf32> to vector<2x8x40xf32>
    %433 = arith.addf %414, %432 : vector<2x8x40xf32>
    %c1_178 = arith.constant 1 : index
    %c0_179 = arith.constant 0 : index
    %c0_180 = arith.constant 0 : index
    %434 = vector.load %arg16[%c1_178, %c0_179, %c0_180] : memref<2x1x40xf32, #tpu.memory_space<vmem>>, vector<1x1x40xf32>
    %435 = vector.shape_cast %434 : vector<1x1x40xf32> to vector<1x40xf32>
    %c1_181 = arith.constant 1 : index
    %c0_182 = arith.constant 0 : index
    %c0_183 = arith.constant 0 : index
    %436 = vector.load %arg17[%c1_181, %c0_182, %c0_183] : memref<2x1x40xf32, #tpu.memory_space<vmem>>, vector<1x1x40xf32>
    %437 = vector.shape_cast %436 : vector<1x1x40xf32> to vector<1x40xf32>
    %cst_184 = arith.constant dense<0.000000e+00> : vector<2x8xf32>
    %438 = vector.multi_reduction <add>, %433, %cst_184 [2] : vector<2x8x40xf32> to vector<2x8xf32>
    %439 = vector.shape_cast %438 : vector<2x8xf32> to vector<2x8x1xf32>
    %cst_185 = arith.constant 4.000000e+01 : f32
    %440 = vector.broadcast %cst_185 : f32 to vector<2x8x1xf32>
    %441 = arith.divf %439, %440 : vector<2x8x1xf32>
    %442 = vector.broadcast %441 : vector<2x8x1xf32> to vector<2x8x40xf32>
    %443 = arith.subf %433, %442 : vector<2x8x40xf32>
    %444 = arith.mulf %443, %443 : vector<2x8x40xf32>
    %cst_186 = arith.constant dense<0.000000e+00> : vector<2x8xf32>
    %445 = vector.multi_reduction <add>, %444, %cst_186 [2] : vector<2x8x40xf32> to vector<2x8xf32>
    %446 = vector.shape_cast %445 : vector<2x8xf32> to vector<2x8x1xf32>
    %cst_187 = arith.constant 4.000000e+01 : f32
    %447 = vector.broadcast %cst_187 : f32 to vector<2x8x1xf32>
    %448 = arith.divf %446, %447 : vector<2x8x1xf32>
    %449 = vector.broadcast %441 : vector<2x8x1xf32> to vector<2x8x40xf32>
    %450 = arith.subf %433, %449 : vector<2x8x40xf32>
    %cst_188 = arith.constant 9.99999974E-6 : f32
    %451 = vector.broadcast %cst_188 : f32 to vector<2x8x1xf32>
    %452 = arith.addf %448, %451 : vector<2x8x1xf32>
    %453 = math.rsqrt %452 : vector<2x8x1xf32>
    %454 = vector.broadcast %453 : vector<2x8x1xf32> to vector<2x8x40xf32>
    %455 = arith.mulf %450, %454 : vector<2x8x40xf32>
    %456 = vector.shape_cast %435 : vector<1x40xf32> to vector<1x1x40xf32>
    %457 = vector.broadcast %456 : vector<1x1x40xf32> to vector<2x8x40xf32>
    %458 = arith.mulf %455, %457 : vector<2x8x40xf32>
    %459 = vector.shape_cast %437 : vector<1x40xf32> to vector<1x1x40xf32>
    %460 = vector.broadcast %459 : vector<1x1x40xf32> to vector<2x8x40xf32>
    %461 = arith.addf %458, %460 : vector<2x8x40xf32>
    %462 = vector.shape_cast %461 : vector<2x8x40xf32> to vector<16x40xf32>
    %c1_189 = arith.constant 1 : index
    %c0_190 = arith.constant 0 : index
    %c0_191 = arith.constant 0 : index
    %463 = vector.load %arg20[%c1_189, %c0_190, %c0_191] : memref<2x64x40xf32, #tpu.memory_space<vmem>>, vector<1x64x40xf32>
    %464 = vector.shape_cast %463 : vector<1x64x40xf32> to vector<64x40xf32>
    %cst_192 = arith.constant dense<0.000000e+00> : vector<16x64xf32>
    %465 = tpu.matmul %462, %464, %cst_192 {dimension_numbers = #tpu.dot_dimension_numbers<[1], [1], [0], [0], [0, 0, 1, 0], [], []>} : vector<16x40xf32>, vector<64x40xf32>, vector<16x64xf32> -> vector<16x64xf32>
    %c1_193 = arith.constant 1 : index
    %c0_194 = arith.constant 0 : index
    %c0_195 = arith.constant 0 : index
    %466 = vector.load %arg21[%c1_193, %c0_194, %c0_195] : memref<2x1x64xf32, #tpu.memory_space<vmem>>, vector<1x1x64xf32>
    %467 = vector.shape_cast %466 : vector<1x1x64xf32> to vector<1x64xf32>
    %468 = vector.broadcast %467 : vector<1x64xf32> to vector<16x64xf32>
    %469 = arith.addf %465, %468 : vector<16x64xf32>
    %cst_196 = arith.constant 0.000000e+00 : f32
    %470 = vector.broadcast %cst_196 : f32 to vector<16x64xf32>
    %471 = arith.maximumf %469, %470 : vector<16x64xf32>
    %c1_197 = arith.constant 1 : index
    %c0_198 = arith.constant 0 : index
    %c0_199 = arith.constant 0 : index
    %472 = vector.load %arg22[%c1_197, %c0_198, %c0_199] : memref<2x40x64xf32, #tpu.memory_space<vmem>>, vector<1x40x64xf32>
    %473 = vector.shape_cast %472 : vector<1x40x64xf32> to vector<40x64xf32>
    %cst_200 = arith.constant dense<0.000000e+00> : vector<16x40xf32>
    %474 = tpu.matmul %471, %473, %cst_200 {dimension_numbers = #tpu.dot_dimension_numbers<[1], [1], [0], [0], [0, 0, 1, 0], [], []>} : vector<16x64xf32>, vector<40x64xf32>, vector<16x40xf32> -> vector<16x40xf32>
    %c1_201 = arith.constant 1 : index
    %c0_202 = arith.constant 0 : index
    %c0_203 = arith.constant 0 : index
    %475 = vector.load %arg23[%c1_201, %c0_202, %c0_203] : memref<2x1x40xf32, #tpu.memory_space<vmem>>, vector<1x1x40xf32>
    %476 = vector.shape_cast %475 : vector<1x1x40xf32> to vector<1x40xf32>
    %477 = vector.broadcast %476 : vector<1x40xf32> to vector<16x40xf32>
    %478 = arith.addf %474, %477 : vector<16x40xf32>
    %479 = vector.shape_cast %478 : vector<16x40xf32> to vector<2x8x40xf32>
    %480 = arith.addf %461, %479 : vector<2x8x40xf32>
    %c1_204 = arith.constant 1 : index
    %c0_205 = arith.constant 0 : index
    %c0_206 = arith.constant 0 : index
    %481 = vector.load %arg18[%c1_204, %c0_205, %c0_206] : memref<2x1x40xf32, #tpu.memory_space<vmem>>, vector<1x1x40xf32>
    %482 = vector.shape_cast %481 : vector<1x1x40xf32> to vector<1x40xf32>
    %c1_207 = arith.constant 1 : index
    %c0_208 = arith.constant 0 : index
    %c0_209 = arith.constant 0 : index
    %483 = vector.load %arg19[%c1_207, %c0_208, %c0_209] : memref<2x1x40xf32, #tpu.memory_space<vmem>>, vector<1x1x40xf32>
    %484 = vector.shape_cast %483 : vector<1x1x40xf32> to vector<1x40xf32>
    %cst_210 = arith.constant dense<0.000000e+00> : vector<2x8xf32>
    %485 = vector.multi_reduction <add>, %480, %cst_210 [2] : vector<2x8x40xf32> to vector<2x8xf32>
    %486 = vector.shape_cast %485 : vector<2x8xf32> to vector<2x8x1xf32>
    %cst_211 = arith.constant 4.000000e+01 : f32
    %487 = vector.broadcast %cst_211 : f32 to vector<2x8x1xf32>
    %488 = arith.divf %486, %487 : vector<2x8x1xf32>
    %489 = vector.broadcast %488 : vector<2x8x1xf32> to vector<2x8x40xf32>
    %490 = arith.subf %480, %489 : vector<2x8x40xf32>
    %491 = arith.mulf %490, %490 : vector<2x8x40xf32>
    %cst_212 = arith.constant dense<0.000000e+00> : vector<2x8xf32>
    %492 = vector.multi_reduction <add>, %491, %cst_212 [2] : vector<2x8x40xf32> to vector<2x8xf32>
    %493 = vector.shape_cast %492 : vector<2x8xf32> to vector<2x8x1xf32>
    %cst_213 = arith.constant 4.000000e+01 : f32
    %494 = vector.broadcast %cst_213 : f32 to vector<2x8x1xf32>
    %495 = arith.divf %493, %494 : vector<2x8x1xf32>
    %496 = vector.broadcast %488 : vector<2x8x1xf32> to vector<2x8x40xf32>
    %497 = arith.subf %480, %496 : vector<2x8x40xf32>
    %cst_214 = arith.constant 9.99999974E-6 : f32
    %498 = vector.broadcast %cst_214 : f32 to vector<2x8x1xf32>
    %499 = arith.addf %495, %498 : vector<2x8x1xf32>
    %500 = math.rsqrt %499 : vector<2x8x1xf32>
    %501 = vector.broadcast %500 : vector<2x8x1xf32> to vector<2x8x40xf32>
    %502 = arith.mulf %497, %501 : vector<2x8x40xf32>
    %503 = vector.shape_cast %482 : vector<1x40xf32> to vector<1x1x40xf32>
    %504 = vector.broadcast %503 : vector<1x1x40xf32> to vector<2x8x40xf32>
    %505 = arith.mulf %502, %504 : vector<2x8x40xf32>
    %506 = vector.shape_cast %484 : vector<1x40xf32> to vector<1x1x40xf32>
    %507 = vector.broadcast %506 : vector<1x1x40xf32> to vector<2x8x40xf32>
    %508 = arith.addf %505, %507 : vector<2x8x40xf32>
    %509 = vector.shape_cast %508 : vector<2x8x40xf32> to vector<16x40xf32>
    %c0_215 = arith.constant 0 : index
    %c0_216 = arith.constant 0 : index
    %510 = vector.load %arg24[%c0_215, %c0_216] : memref<32x40xf32, #tpu.memory_space<vmem>>, vector<32x40xf32>
    %cst_217 = arith.constant dense<0.000000e+00> : vector<16x32xf32>
    %511 = tpu.matmul %509, %510, %cst_217 {dimension_numbers = #tpu.dot_dimension_numbers<[1], [1], [0], [0], [0, 0, 1, 0], [], []>} : vector<16x40xf32>, vector<32x40xf32>, vector<16x32xf32> -> vector<16x32xf32>
    %c0_218 = arith.constant 0 : index
    %c0_219 = arith.constant 0 : index
    %512 = vector.load %arg25[%c0_218, %c0_219] : memref<1x32xf32, #tpu.memory_space<vmem>>, vector<1x32xf32>
    %513 = vector.broadcast %512 : vector<1x32xf32> to vector<16x32xf32>
    %514 = arith.addf %511, %513 : vector<16x32xf32>
    %c0_220 = arith.constant 0 : index
    %c0_221 = arith.constant 0 : index
    %515 = vector.load %arg33[%c0_220, %c0_221] : memref<16x32xf32, #tpu.memory_space<vmem>>, vector<16x32xf32>
    tpu.vector_store %arg33[%c0_220, %c0_221], %514 {strides = array<i32>} : memref<16x32xf32, #tpu.memory_space<vmem>>, vector<16x32xf32>,
    %cst_222 = arith.constant dense<0xFF800000> : vector<16xf32>
    %516 = vector.multi_reduction <maximumf>, %514, %cst_222 [1] : vector<16x32xf32> to vector<16xf32>
    %517 = vector.shape_cast %516 : vector<16xf32> to vector<16x1xf32>
    %518 = tpu.iota {dimensions = array<i32: 1>} : vector<16x32xi32>
    %519 = vector.broadcast %517 : vector<16x1xf32> to vector<16x32xf32>
    %520 = arith.cmpf oge, %514, %519 : vector<16x32xf32>
    %c32_i32 = arith.constant 32 : i32
    %521 = vector.broadcast %c32_i32 : i32 to vector<16x32xi32>
    %522 = arith.select %520, %518, %521 : vector<16x32xi1>, vector<16x32xi32>
    %cst_223 = arith.constant dense<2147483647> : vector<16xi32>
    %523 = vector.multi_reduction <minsi>, %522, %cst_223 [1] : vector<16x32xi32> to vector<16xi32>
    %524 = vector.shape_cast %523 : vector<16xi32> to vector<16x1xi32>
    %525 = vector.broadcast %524 : vector<16x1xi32> to vector<16x32xi32>
    %526 = arith.cmpi eq, %518, %525 : vector<16x32xi32>
    %527 = arith.extui %526 : vector<16x32xi1> to vector<16x32xi32>
    %528 = arith.sitofp %527 : vector<16x32xi32> to vector<16x32xf32>
    %c0_224 = arith.constant 0 : index
    %c0_225 = arith.constant 0 : index
    %529 = vector.load %arg34[%c0_224, %c0_225] : memref<16x32xf32, #tpu.memory_space<vmem>>, vector<16x32xf32>
    tpu.vector_store %arg34[%c0_224, %c0_225], %528 {strides = array<i32>} : memref<16x32xf32, #tpu.memory_space<vmem>>, vector<16x32xf32>,
    %c0_226 = arith.constant 0 : index
    %c0_227 = arith.constant 0 : index
    %530 = vector.load %arg35[%c0_226, %c0_227] : memref<16x1xi32, #tpu.memory_space<vmem>>, vector<16x1xi32>
    tpu.vector_store %arg35[%c0_226, %c0_227], %524 {strides = array<i32>} : memref<16x1xi32, #tpu.memory_space<vmem>>, vector<16x1xi32>,
    %531 = vector.extract_strided_slice %528 {offsets = [0, 0], sizes = [1, 32], strides = [1, 1]} : vector<16x32xf32> to vector<1x32xf32>
    %532 = vector.extract_strided_slice %528 {offsets = [1, 0], sizes = [1, 32], strides = [1, 1]} : vector<16x32xf32> to vector<1x32xf32>
    %533 = vector.extract_strided_slice %528 {offsets = [2, 0], sizes = [1, 32], strides = [1, 1]} : vector<16x32xf32> to vector<1x32xf32>
    %534 = vector.extract_strided_slice %528 {offsets = [3, 0], sizes = [1, 32], strides = [1, 1]} : vector<16x32xf32> to vector<1x32xf32>
    %535 = vector.extract_strided_slice %528 {offsets = [4, 0], sizes = [1, 32], strides = [1, 1]} : vector<16x32xf32> to vector<1x32xf32>
    %536 = vector.extract_strided_slice %528 {offsets = [5, 0], sizes = [1, 32], strides = [1, 1]} : vector<16x32xf32> to vector<1x32xf32>
    %537 = vector.extract_strided_slice %528 {offsets = [6, 0], sizes = [1, 32], strides = [1, 1]} : vector<16x32xf32> to vector<1x32xf32>
    %538 = vector.extract_strided_slice %528 {offsets = [7, 0], sizes = [1, 32], strides = [1, 1]} : vector<16x32xf32> to vector<1x32xf32>
    %539 = tpu.concatenate %531, %532, %533, %534, %535, %536, %537, %538 in 1 : vector<1x32xf32>, vector<1x32xf32>, vector<1x32xf32>, vector<1x32xf32>, vector<1x32xf32>, vector<1x32xf32>, vector<1x32xf32>, vector<1x32xf32> -> vector<1x256xf32>
    %540 = vector.extract_strided_slice %528 {offsets = [8, 0], sizes = [1, 32], strides = [1, 1]} : vector<16x32xf32> to vector<1x32xf32>
    %541 = vector.extract_strided_slice %528 {offsets = [9, 0], sizes = [1, 32], strides = [1, 1]} : vector<16x32xf32> to vector<1x32xf32>
    %542 = vector.extract_strided_slice %528 {offsets = [10, 0], sizes = [1, 32], strides = [1, 1]} : vector<16x32xf32> to vector<1x32xf32>
    %543 = vector.extract_strided_slice %528 {offsets = [11, 0], sizes = [1, 32], strides = [1, 1]} : vector<16x32xf32> to vector<1x32xf32>
    %544 = vector.extract_strided_slice %528 {offsets = [12, 0], sizes = [1, 32], strides = [1, 1]} : vector<16x32xf32> to vector<1x32xf32>
    %545 = vector.extract_strided_slice %528 {offsets = [13, 0], sizes = [1, 32], strides = [1, 1]} : vector<16x32xf32> to vector<1x32xf32>
    %546 = vector.extract_strided_slice %528 {offsets = [14, 0], sizes = [1, 32], strides = [1, 1]} : vector<16x32xf32> to vector<1x32xf32>
    %547 = vector.extract_strided_slice %528 {offsets = [15, 0], sizes = [1, 32], strides = [1, 1]} : vector<16x32xf32> to vector<1x32xf32>
    %548 = tpu.concatenate %540, %541, %542, %543, %544, %545, %546, %547 in 1 : vector<1x32xf32>, vector<1x32xf32>, vector<1x32xf32>, vector<1x32xf32>, vector<1x32xf32>, vector<1x32xf32>, vector<1x32xf32>, vector<1x32xf32> -> vector<1x256xf32>
    %549 = tpu.concatenate %539, %548 in 0 : vector<1x256xf32>, vector<1x256xf32> -> vector<2x256xf32>
    %c0_228 = arith.constant 0 : index
    %c0_229 = arith.constant 0 : index
    %550 = vector.load %arg26[%c0_228, %c0_229] : memref<120x256xf32, #tpu.memory_space<vmem>>, vector<120x256xf32>
    %cst_230 = arith.constant dense<0.000000e+00> : vector<2x120xf32>
    %551 = tpu.matmul %549, %550, %cst_230 {dimension_numbers = #tpu.dot_dimension_numbers<[1], [1], [0], [0], [0, 0, 1, 0], [], []>} : vector<2x256xf32>, vector<120x256xf32>, vector<2x120xf32> -> vector<2x120xf32>
    %c0_231 = arith.constant 0 : index
    %c0_232 = arith.constant 0 : index
    %552 = vector.load %arg27[%c0_231, %c0_232] : memref<1x120xf32, #tpu.memory_space<vmem>>, vector<1x120xf32>
    %553 = vector.broadcast %552 : vector<1x120xf32> to vector<2x120xf32>
    %554 = arith.addf %551, %553 : vector<2x120xf32>
    %cst_233 = arith.constant 0.000000e+00 : f32
    %555 = vector.broadcast %cst_233 : f32 to vector<2x120xf32>
    %556 = arith.maximumf %554, %555 : vector<2x120xf32>
    %c0_234 = arith.constant 0 : index
    %c0_235 = arith.constant 0 : index
    %557 = vector.load %arg28[%c0_234, %c0_235] : memref<40x120xf32, #tpu.memory_space<vmem>>, vector<40x120xf32>
    %cst_236 = arith.constant dense<0.000000e+00> : vector<2x40xf32>
    %558 = tpu.matmul %556, %557, %cst_236 {dimension_numbers = #tpu.dot_dimension_numbers<[1], [1], [0], [0], [0, 0, 1, 0], [], []>} : vector<2x120xf32>, vector<40x120xf32>, vector<2x40xf32> -> vector<2x40xf32>
    %c0_237 = arith.constant 0 : index
    %c0_238 = arith.constant 0 : index
    %559 = vector.load %arg29[%c0_237, %c0_238] : memref<1x40xf32, #tpu.memory_space<vmem>>, vector<1x40xf32>
    %560 = vector.broadcast %559 : vector<1x40xf32> to vector<2x40xf32>
    %561 = arith.addf %558, %560 : vector<2x40xf32>
    %cst_239 = arith.constant 0.000000e+00 : f32
    %562 = vector.broadcast %cst_239 : f32 to vector<2x40xf32>
    %563 = arith.maximumf %561, %562 : vector<2x40xf32>
    %c0_240 = arith.constant 0 : index
    %c0_241 = arith.constant 0 : index
    %564 = vector.load %arg30[%c0_240, %c0_241] : memref<16x40xf32, #tpu.memory_space<vmem>>, vector<16x40xf32>
    %cst_242 = arith.constant dense<0.000000e+00> : vector<2x16xf32>
    %565 = tpu.matmul %563, %564, %cst_242 {dimension_numbers = #tpu.dot_dimension_numbers<[1], [1], [0], [0], [0, 0, 1, 0], [], []>} : vector<2x40xf32>, vector<16x40xf32>, vector<2x16xf32> -> vector<2x16xf32>
    %c0_243 = arith.constant 0 : index
    %c0_244 = arith.constant 0 : index
    %566 = vector.load %arg31[%c0_243, %c0_244] : memref<1x16xf32, #tpu.memory_space<vmem>>, vector<1x16xf32>
    %567 = vector.broadcast %566 : vector<1x16xf32> to vector<2x16xf32>
    %568 = arith.addf %565, %567 : vector<2x16xf32>
    %c0_245 = arith.constant 0 : index
    %c0_246 = arith.constant 0 : index
    %569 = vector.load %arg32[%c0_245, %c0_246] : memref<2x16xf32, #tpu.memory_space<vmem>>, vector<2x16xf32>
    tpu.vector_store %arg32[%c0_245, %c0_246], %568 {strides = array<i32>} : memref<2x16xf32, #tpu.memory_space<vmem>>, vector<2x16xf32>,
    return
  }
}

</mosaic_0001>

<bundles_post_ra>
// kernel: vae_forward.1
= control target key start
LH: loop header
LB: loop body
LE: loop exit
PB: predicated region body
PF: predicated region fallthrough
CT: control target
= control target key end

     0   :  { %s7599_s6 = smov 1   ;;  %s7600_s10 = smov 2   ;;  %s8799_s0 = inlined_call_operand.smem [shape: u32[36], index: -1, kind: input, shape index: {}] }
   0x1   :  { %s7665_s5 = sld [smem:[%s8799_s0]]   ;;  %s7601_s14 = smov 3  }
   0x2   :  { %s7670_s9 = sld [smem:[%s8799_s0 + %s7599_s6]]   ;;  %s7602_s18 = smov 4  }
   0x3   :  { %s7675_s13 = sld [smem:[%s8799_s0 + %s7600_s10]]   ;;  %s7603_s22 = smov 5  }
   0x4   :  { %s7680_s17 = sld [smem:[%s8799_s0 + %s7601_s14]]   ;;  %s7604_s26 = smov 6  }
   0x5   :  { %s7685_s21 = sld [smem:[%s8799_s0 + %s7602_s18]]   ;;  %s7605_s30 = smov 7  }
   0x6   :  { %s7690_s25 = sld [smem:[%s8799_s0 + %s7603_s22]]   ;;  %s7606_s4 = smov 8  }
   0x7   :  { %s7695_s29 = sld [smem:[%s8799_s0 + %s7604_s26]]   ;;  %s7607_s10 = smov 9  }
   0x8   :  { %s7700_s3 = sld [smem:[%s8799_s0 + %s7605_s30]]   ;;  %s7608_s15 = smov 10  }
   0x9   :  { %s7705_s8 = sld [smem:[%s8799_s0 + %s7606_s4]]   ;;  %s7609_s20 = smov 11  }
   0xa   :  { %s7710_s14 = sld [smem:[%s8799_s0 + %s7607_s10]]   ;;  %s7610_s26 = smov 12  }
   0xb   :  { %s7715_s19 = sld [smem:[%s8799_s0 + %s7608_s15]]   ;;  %s7611_s1 = smov 13  }
   0xc   :  { %s7720_s24 = sld [smem:[%s8799_s0 + %s7609_s20]]   ;;  %s7612_s7 = smov 14  }
   0xd   :  { %s7725_s30 = sld [smem:[%s8799_s0 + %s7610_s26]]   ;;  %s7613_s15 = smov 15  }
   0xe   :  { %s7730_s6 = sld [smem:[%s8799_s0 + %s7611_s1]]   ;;  %s7614_s22 = smov 16  }
   0xf   :  { %s7735_s12 = sld [smem:[%s8799_s0 + %s7612_s7]]   ;;  %s7615_s28 = smov 17  }
  0x10   :  { %s7740_s20 = sld [smem:[%s8799_s0 + %s7613_s15]]   ;;  %s7616_s7 = smov 18  }
  0x11   :  { %s7745_s27 = sld [smem:[%s8799_s0 + %s7614_s22]]   ;;  %s7617_s15 = smov 19  }
  0x12   :  { %s7750_s4 = sld [smem:[%s8799_s0 + %s7615_s28]]   ;;  %s7618_s22 = smov 20  }
  0x13   :  { %s7619_s28 = smov 21  }
  0x15   :  { %8826 = sst [smem:[#allocation9_spill]] %s7735_s12 }
  0x16   :  { %8827 = sst [smem:[#allocation10_spill]] %s7740_s20 }
  0x17   :  { %8828 = sst [smem:[#allocation11_spill]] %s7745_s27 }
  0x18   :  { %8829 = sst [smem:[#allocation12_spill]] %s7750_s4 }
  0x19   :  { %s7755_s12 = sld [smem:[%s8799_s0 + %s7616_s7]]   ;;  %s7620_s7 = smov 22  }
  0x1a   :  { %s7760_s20 = sld [smem:[%s8799_s0 + %s7617_s15]]   ;;  %s7621_s15 = smov 23  }
  0x1b   :  { %s7765_s27 = sld [smem:[%s8799_s0 + %s7618_s22]]   ;;  %s7622_s22 = smov 24  }
  0x1c   :  { %s7770_s4 = sld [smem:[%s8799_s0 + %s7619_s28]]   ;;  %s7623_s28 = smov 25  }
  0x1f   :  { %8830 = sst [smem:[#allocation13_spill]] %s7755_s12 }
  0x20   :  { %8831 = sst [smem:[#allocation14_spill]] %s7760_s20 }
  0x21   :  { %8832 = sst [smem:[#allocation15_spill]] %s7765_s27 }
  0x22   :  { %8833 = sst [smem:[#allocation16_spill]] %s7770_s4 }
  0x23   :  { %s7775_s12 = sld [smem:[%s8799_s0 + %s7620_s7]]   ;;  %s7624_s7 = smov 26  }
  0x24   :  { %s7780_s20 = sld [smem:[%s8799_s0 + %s7621_s15]]   ;;  %s7625_s15 = smov 27  }
  0x25   :  { %s7785_s27 = sld [smem:[%s8799_s0 + %s7622_s22]]   ;;  %s7626_s22 = smov 28  }
  0x26   :  { %s7790_s4 = sld [smem:[%s8799_s0 + %s7623_s28]]   ;;  %s7627_s28 = smov 29  }
  0x29   :  { %8834 = sst [smem:[#allocation17_spill]] %s7775_s12 }
  0x2a   :  { %8835 = sst [smem:[#allocation18_spill]] %s7780_s20 }
  0x2b   :  { %8836 = sst [smem:[#allocation19_spill]] %s7785_s27 }
  0x2c   :  { %8837 = sst [smem:[#allocation20_spill]] %s7790_s4 }
  0x2d   :  { %s7795_s12 = sld [smem:[%s8799_s0 + %s7624_s7]]   ;;  %s7628_s7 = smov 30  }
  0x2e   :  { %s7800_s20 = sld [smem:[%s8799_s0 + %s7625_s15]]   ;;  %s7629_s15 = smov 31  }
  0x2f   :  { %s7805_s27 = sld [smem:[%s8799_s0 + %s7626_s22]]   ;;  %s7630_s22 = smov 32  }
  0x30   :  { %s7810_s4 = sld [smem:[%s8799_s0 + %s7627_s28]]   ;;  %s7631_s28 = smov 33  }
  0x33   :  { %8838 = sst [smem:[#allocation21_spill]] %s7795_s12 }
  0x34   :  { %8839 = sst [smem:[#allocation22_spill]] %s7800_s20 }
  0x35   :  { %8840 = sst [smem:[#allocation23_spill]] %s7805_s27 }
  0x36   :  { %8841 = sst [smem:[#allocation24_spill]] %s7810_s4 }
  0x37   :  { %s7815_s12 = sld [smem:[%s8799_s0 + %s7628_s7]]   ;;  %s7632_s7 = smov 34  }
  0x38   :  { %s7820_s20 = sld [smem:[%s8799_s0 + %s7629_s15]]   ;;  %s7633_s15 = smov 35  }
  0x39   :  { %s7825_s27 = sld [smem:[%s8799_s0 + %s7630_s22]]  }
  0x3a   :  { %s7830_s4 = sld [smem:[%s8799_s0 + %s7631_s28]]  }
  0x3d   :  { %8842 = sst [smem:[#allocation25_spill]] %s7815_s12 }
  0x3e   :  { %8843 = sst [smem:[#allocation26_spill]] %s7820_s20 }
  0x3f   :  { %s7835_s12 = sld [smem:[%s8799_s0 + %s7632_s7]]  }
  0x40   :  { %s7840_s20 = sld [smem:[%s8799_s0 + %s7633_s15]]  }
  0x41   :  { %77 = vsyncpa [#allocation3], 0  ;;  %vm258_vm0 = vcmask 326656   ;;  %v349_v0 = vld [vmem:[%s7695_s29] sm:$0xff]  ;;  %v350_v1 = vld [vmem:[%s7695_s29 + $0x8] sm:$0xff]  ;;  %v7634_v6 = vmov 0.0|0.0  }
  0x42   :  { %v351_v2 = vld [vmem:[%s7695_s29 + $0x10] sm:$0xff]  ;;  %vm7847_vm1 = vmpackc.low %vm258_vm0, %vm258_vm0  ;;  %v7073_v4 = vpack.c.bf16 %v350_v1, %v349_v0  ;;  %v352_v5 = vld [vmem:[%s7695_s29 + $0x18] sm:$0xff]  ;;  %7057 = vmatprep.subr.bf16.mxu1 %v7634_v6  ;;  %vm7635_vm2 = vmmov 0   ;;  %v7636_v8 = vmov 0.0   ;;  %vm156_vm3 = vcmask 130048  }
  0x43   :  { %v7079_v7 = vpack.c.bf16 %v352_v5, %v351_v2  ;;  %6602 = vmatprep.mubr.msk.f32.mxu1 %vm7635_vm2, %v7636_v8  ;;  %v353_v9 = vld [vmem:[%s7695_s29 + $0x20] sm:$0xff]  ;;  %v354_v12 = vld [vmem:[%s7695_s29 + $0x28] sm:$0xff]  ;;  %vm7059_vm4 = vmpackc.low %vm156_vm3, %vm156_vm3 }
  0x44   :  { %7075 = vmatprep.subr.msk.bf16.mxu0 %vm7847_vm1, %v7073_v4  ;;  %v7863_v10 = vld [vmem:[%s7690_s25] sm:$0xff]  ;;  %v145_v13 = vld [vmem:[%s7670_s9 + $0x8] sm:$0xff] }
  0x45   :  { %7078 = vmatpush3.bf16.xpose.msk.msra.mxu0 %vm7847_vm1, %v7073_v4  ;;  %v144_v11 = vld [vmem:[%s7670_s9] sm:$0xff]  ;;  %6648 = vmatprep.mubr.msk.f32.mxu0 %vm258_vm0, %v7863_v10 }
  0x46   :  { %7081 = vmatprep.subr.msk.bf16.mxu0 %vm7847_vm1, %v7079_v7  ;;  %v7058_v14 = vpack.c.bf16 %v145_v13, %v144_v11 }
  0x47   :  { %78 = vsyncpa [#allocation5], 0  ;;  %v7085_v15 = vpack.c.bf16 %v354_v12, %v353_v9  ;;  %v146_v16 = vld [vmem:[%s7670_s9 + $0x10] sm:$0xff]  ;;  %v147_v17 = vld [vmem:[%s7670_s9 + $0x18] sm:$0xff]  ;;  %s7637_s0 = smov 88   ;;  %vm503_vm5 = vcmask 64512  }
  0x48   :  { %7060 = vmatpush3.bf16.xpose.msk.msra.mxu1 %vm7059_vm4, %v7058_v14  ;;  %v7062_v18 = vpack.c.bf16 %v147_v17, %v146_v16  ;;  %v355_v19 = vld [vmem:[%s7695_s29 + $0x30] sm:$0xff]  ;;  %v356_v20 = vld [vmem:[%s7695_s29 + $0x38] sm:$0xff]  ;;  %v357_v22 = vld [vmem:[%s7695_s29 + $0x40] sm:$0xff]  ;;  %s7642_s25 = smov 72   ;;  %s7643_s22 = smov 112   ;;  %vm2198_vm6 = vcmask 261120  }
  0x49   :  { %7061 = vmatprep.subr.bf16.mxu1 %v7634_v6  ;;  %v7091_v21 = vpack.c.bf16 %v356_v20, %v355_v19  ;;  %v358_v23 = vld [vmem:[%s7695_s29 + $0x48] sm:$0xff]  ;;  %v148_v24 = vld [vmem:[%s7670_s9 + $0x20] sm:$0xff]  ;;  %v359_v27 = vld [vmem:[%s7695_s29 + $0x50] sm:$0xff]  ;;  %s7639_s9 = smov 80   ;;  %s7644_s23 = smov 32   ;;  %vm2195_vm7 = vcmask 195584  }
  0x4a   :  { %v7097_v25 = vpack.c.bf16 %v358_v23, %v357_v22  ;;  %v143_v26 = vld [vmem:[%s7665_s5] sm:$0x3]  ;;  %v360_v28 = vld [vmem:[%s7695_s29 + $0x58] sm:$0xff]  ;;  %v362_v31 = vld [vmem:[%s7695_s29 + $0x68] sm:$0xff]  ;;  %s7638_s5 = smov 48   ;;  %s7645_s26 = smov 64  }
  0x4b   :  { %v7103_v29 = vpack.c.bf16 %v360_v28, %v359_v27  ;;  %v361_v30 = vld [vmem:[%s7695_s29 + $0x60] sm:$0xff]  ;;  %v363_v33 = vld [vmem:[%s7695_s29 + $0x70] sm:$0xff]  ;;  %v247_v35 = vld [vmem:[%s7680_s17 + $0x8] sm:$0xff]  ;;  %s8824_s28 = smov 104   ;;  %s8822_s1 = smov 24   ;;  %vm2765_vm8 = vcmask 523264  }
  0x4c   :  { %v7109_v32 = vpack.c.bf16 %v362_v31, %v361_v30  ;;  %v246_v34 = vld [vmem:[%s7680_s17] sm:$0xff]  ;;  %v248_v37 = vld [vmem:[%s7680_s17 + $0x10] sm:$0xff]  ;;  %v249_v38 = vld [vmem:[%s7680_s17 + $0x18] sm:$0xff]  ;;  %s8820_s2 = smov 56   ;;  %s8818_s7 = smov 96   ;;  %vm5636_vm14 = vcmask 7168  }
  0x4d   :  { %7084 = vmatpush3.bf16.xpose.msk.msra.mxu0 %vm7847_vm1, %v7079_v7  ;;  %v7066_v36 = vpack.c.bf16 %v247_v35, %v246_v34  ;;  %v7070_v39 = vpack.c.bf16 %v249_v38, %v248_v37  ;;  %v250_v40 = vld [vmem:[%s7680_s17 + $0x20] sm:$0xff]  ;;  %s7641_s17 = smov 40   ;;  %s8816_s10 = smov 16   ;;  %vm8252_vm9 = vmpackc.low %vm2765_vm8, %vm2765_vm8 }
  0x4e   :  { %7087 = vmatprep.subr.msk.bf16.mxu0 %vm7847_vm1, %v7085_v15  ;;  %v6099_v41 = vld [vmem:[%s7675_s13] ss:$0 sm:$0xff]  ;;  %s7640_s13 = smov 120   ;;  %s8814_s11 = smov 8  }
  0x4f   :  { %v6113_v46 = vld [vmem:[%s7700_s3] ss:$0 sm:$0xff]  ;;  %s8847_s15 = sld [smem:[#allocation10_spill]]  ;;  %s8848_s16 = sld [smem:[#allocation15_spill]] }
  0x50   :  { %7064 = vmatpush3.bf16.xpose.msk.msra.mxu1 %vm7059_vm4, %v7062_v18  ;;  %s8849_s18 = sld [smem:[#allocation17_spill]]  ;;  %vm5835_vm4 = vcmask 982016  }
  0x51   :  { %6600 = vmatprep.subr.mxu1 %v7636_v8 }
  0x55   :  { %7090 = vmatpush3.bf16.xpose.msk.msra.mxu0 %vm7847_vm1, %v7085_v15 }
  0x56   :  { %7093 = vmatprep.subr.msk.bf16.mxu0 %vm7847_vm1, %v7091_v21 }
  0x58   :  { %6601 = vmatpush3.xpose.msk.msra.mxu1 %vm156_vm3, %v148_v24 }
  0x59   :  { %7065 = vmatprep.subr.bf16.mxu1 %v7634_v6 }
  0x5b   :  { %6603 = vmatmul.mubr.msk.f32.vlgmr.msra.gmra.mrb[0].mxu1 %vm156_vm3, %v143_v26 }
  0x5c   :  { %6615 = vmatprep.mubr.msk.f32.mxu1 %vm7635_vm2, %v7636_v8  ;;  %7068 = vmatpush3.bf16.xpose.msk.msra.mxu1 %vm7847_vm1, %v7066_v36 }
  0x5d   :  { %7096 = vmatpush3.bf16.xpose.msk.msra.mxu0 %vm7847_vm1, %v7091_v21  ;;  %7069 = vmatprep.subr.bf16.mxu1 %v7634_v6 }
  0x5e   :  { %7099 = vmatprep.subr.msk.bf16.mxu0 %vm7847_vm1, %v7097_v25 }
  0x64   :  { %7072 = vmatpush3.bf16.xpose.msk.msra.mxu1 %vm7847_vm1, %v7070_v39 }
  0x65   :  { %7102 = vmatpush3.bf16.xpose.msk.msra.mxu0 %vm7847_vm1, %v7097_v25  ;;  %6613 = vmatprep.subr.mxu1 %v7636_v8 }
  0x66   :  { %7105 = vmatprep.subr.msk.bf16.mxu0 %vm7847_vm1, %v7103_v29 }
  0x6c   :  { %6614 = vmatpush3.xpose.msk.msra.mxu1 %vm258_vm0, %v250_v40 }
  0x6d   :  { %7108 = vmatpush3.bf16.xpose.msk.msra.mxu0 %vm7847_vm1, %v7103_v29  ;;  %6651 = vmatprep.subr.mxu1 %v7636_v8 }
  0x6e   :  { %7111 = vmatprep.subr.msk.bf16.mxu0 %vm7847_vm1, %v7109_v32 }
  0x75   :  { %7114 = vmatpush3.bf16.xpose.msk.msra.mxu0 %vm7847_vm1, %v7109_v32 }
  0x76   :  { %6646 = vmatprep.subr.msk.mxu0 %vm258_vm0, %v363_v33 }
  0x7d   :  { %6647 = vmatpush3.xpose.msk.msra.mxu0 %vm258_vm0, %v363_v33 }
  0x7e   :  { %6726 = vmatprep.subr.mxu0 %v7636_v8 }
  0x80   :  { %6649 = vmatmul.mubr.msk.f32.vlgmr.msra.gmra.mrb[0].mxu0 %vm258_vm0, %v7863_v10 }
  0x81   :  { %6728 = vmatprep.mubr.msk.f32.mxu0 %vm7635_vm2, %v7636_v8 }
 0x12e   :  { %v241_v42 = vpop.f32.mrb[0].mxu1 }
 0x12f   :  { %v242_v43 = vadd.f32 %v6099_v41, %v241_v42  ;;  %v6604_v44 = vpop.f32.mrb[1].mxu1 }
 0x131   :  { %v245_v45 = vmax.f32 %v242_v43, 0.0 }
 0x133   :  { %6616 = vmatmul.mubr.msk.f32.vlgmr.msra.gmra.mrb[2].mxu1 %vm258_vm0, %v245_v45 }
 0x134   :  { %6653 = vmatprep.mubr.msk.f32.mxu1 %vm7635_vm2, %v7636_v8 }
 0x153   :  { %v6650_v47 = vpop.f32.mrb[0].mxu0 }
 0x154   :  { %v491_v48 = vpop.f32.mrb[1].mxu0  ;;  %v7943_v50 = vadd.f32 %v6650_v47, %v6113_v46 }
 0x155   :  { %v7939_v49 = vadd.f32 %v6113_v46, %v491_v48 }
 0x157   :  { %501 = vrot.lane.b32.xlu0 %v7939_v49, %s7637_s0 }
 0x15b   :  { %579 = vrot.lane.b32.xlu0 %v7943_v50, %s7637_s0 }
 0x1c9   :  { %v502_v51 = vpop.permute.xlu0 %501 }
 0x1ca   :  { %6652 = vmatpush3.xpose.msk.msra.mxu1 %vm503_vm5, %v502_v51 }
 0x1cb   :  { %6656 = vmatprep.subr.mxu1 %v7636_v8 }
 0x1cd   :  { %v580_v52 = vpop.permute.xlu0 %579  ;;  %6654 = vmatmul.mubr.msk.f32.vlgmr.msra.gmra.mrb[4].mxu1 %vm503_vm5, %v7939_v49 }
 0x1ce   :  { %6657 = vmatpush3.xpose.msk.msra.mxu1 %vm503_vm5, %v580_v52  ;;  %6658 = vmatprep.mubr.msk.f32.mxu1 %vm7635_vm2, %v7636_v8 }
 0x1cf   :  { %6661 = vmatprep.subr.mxu1 %v7636_v8 }
 0x1d1   :  { %6659 = vmatmul.mubr.msk.f32.vlgmr.msra.gmra.mrb[6].mxu1 %vm503_vm5, %v7943_v50 }
 0x1d2   :  { %6663 = vmatprep.mubr.msk.f32.mxu1 %vm7635_vm2, %v7636_v8 }
 0x206   :  { %v7959_v53 = vpop.f32.mrb[2].mxu1 }
 0x207   :  { %v6617_v54 = vpop.f32.mrb[3].mxu1 }
 0x2a0   :  { %v574_v55 = vpop.f32.mrb[4].mxu1 }
 0x2a1   :  { %v655_v56 = vmul.f32 0.35355338, %v574_v55  ;;  %v6655_v57 = vpop.f32.mrb[5].mxu1 }
 0x2a3   :  { %v657_v58 = vsel %vm503_vm5, %v655_v56, -inf }
 0x2a4   :  { %658 = vmax.xlane.f32.xlu1 %v657_v58  ;;  %v651_v59 = vpop.f32.mrb[6].mxu1 }
 0x2a5   :  { %v656_v60 = vmul.f32 0.35355338, %v651_v59  ;;  %v6660_v61 = vpop.f32.mrb[7].mxu1 }
 0x2a7   :  { %v660_v62 = vsel %vm503_vm5, %v656_v60, -inf }
 0x2a8   :  { %661 = vmax.xlane.f32.xlu1 %v660_v62 }
 0x2b9   :  { %679 = vrot.lane.b32.xlu1 %v7939_v49, %s7638_s5 }
 0x2bd   :  { %755 = vrot.lane.b32.xlu1 %v7943_v50, %s7638_s5 }
 0x2c1   :  { %833 = vrot.lane.b32.xlu1 %v7939_v49, %s7639_s9 }
 0x331   :  { %v659_v63 = vpop.xlane.xlu1 %658 }
 0x332   :  { %v663_v0 = vsub.f32 %v655_v56, %v659_v63 }
 0x334   :  { %v665_v1 = vmul.f32 1.442695, %v663_v0 }
 0x335   :  { %v662_v2 = vpop.xlane.xlu1 %661 }
 0x336   :  { %7425 = vpow2.f32 %v665_v1  ;;  %v664_v4 = vsub.f32 %v656_v60, %v662_v2 }
 0x338   :  { %v667_v5 = vmul.f32 1.442695, %v664_v4 }
 0x339   :  { %v680_v7 = vpop.permute.xlu1 %679 }
 0x33a   :  { %7427 = vpow2.f32 %v667_v5  ;;  %6662 = vmatpush3.msra.mxu1 %v680_v7 }
 0x33b   :  { %6666 = vmatprep.subr.mxu1 %v7636_v8 }
 0x33d   :  { %v756_v14 = vpop.permute.xlu1 %755 }
 0x340   :  { %v7426_v9 = vpop.eup %7425 }
 0x341   :  { %v669_v11 = vsel %vm503_vm5, %v7426_v9, 0.0  ;;  %v834_v15 = vpop.permute.xlu1 %833 }
 0x342   :  { %670 = vadd.xlane.f32.xlu0 %v669_v11 }
 0x344   :  { %v7428_v12 = vpop.eup %7427 }
 0x345   :  { %v672_v13 = vsel %vm503_vm5, %v7428_v12, 0.0 }
 0x346   :  { %673 = vadd.xlane.f32.xlu1 %v672_v13 }
 0x357   :  { %831 = vrot.lane.b32.xlu1 %v7939_v49, %s7640_s13 }
 0x358   :  { %911 = vrot.lane.b32.xlu0 %v7943_v50, %s7639_s9 }
 0x35b   :  { %909 = vrot.lane.b32.xlu1 %v7943_v50, %s7640_s13 }
 0x3cf   :  { %v671_v16 = vpop.xlane.xlu0 %670 }
 0x3d0   :  { %7429 = vrcp.f32 %v671_v16 }
 0x3d3   :  { %v674_v17 = vpop.xlane.xlu1 %673  ;;  %v912_v23 = vpop.permute.xlu0 %911 }
 0x3d4   :  { %7431 = vrcp.f32 %v674_v17 }
 0x3d7   :  { %v832_v22 = vpop.permute.xlu1 %831 }
 0x3da   :  { %v7430_v18 = vpop.eup %7429 }
 0x3db   :  { %v677_v19 = vmul.f32 %v7430_v18, %v7426_v9  ;;  %v910_v24 = vpop.permute.xlu1 %909 }
 0x3dd   :  { %6664 = vmatmul.mubr.msk.f32.vlgmr.msra.gmra.mrb[8].mxu1 %vm503_vm5, %v677_v19 }
 0x3de   :  { %v7432_v20 = vpop.eup %7431  ;;  %6667 = vmatpush3.msra.mxu1 %v756_v14  ;;  %6668 = vmatprep.mubr.msk.f32.mxu1 %vm7635_vm2, %v7636_v8 }
 0x3df   :  { %v678_v21 = vmul.f32 %v7432_v20, %v7428_v12  ;;  %6671 = vmatprep.subr.mxu1 %v7636_v8 }
 0x3e1   :  { %6669 = vmatmul.mubr.msk.f32.vlgmr.msra.gmra.mrb[10].mxu1 %vm503_vm5, %v678_v21 }
 0x3e2   :  { %6673 = vmatprep.mubr.msk.f32.mxu1 %vm7635_vm2, %v7636_v8 }
 0x3e5   :  { %6672 = vmatpush3.xpose.msk.msra.mxu1 %vm503_vm5, %v834_v15 }
 0x3e6   :  { %6676 = vmatprep.subr.mxu1 %v7636_v8 }
 0x3e8   :  { %6674 = vmatmul.mubr.msk.f32.vlgmr.msra.gmra.mrb[12].mxu1 %vm503_vm5, %v832_v22 }
 0x3e9   :  { %6677 = vmatpush3.xpose.msk.msra.mxu1 %vm503_vm5, %v912_v23  ;;  %6678 = vmatprep.mubr.msk.f32.mxu1 %vm7635_vm2, %v7636_v8 }
 0x3ea   :  { %6681 = vmatprep.subr.mxu1 %v7636_v8 }
 0x3ec   :  { %6679 = vmatmul.mubr.msk.f32.vlgmr.msra.gmra.mrb[14].mxu1 %vm503_vm5, %v910_v24 }
 0x3ed   :  { %6683 = vmatprep.mubr.msk.f32.mxu1 %vm7635_vm2, %v7636_v8 }
 0x4b0   :  { %v7995_v25 = vpop.f32.mrb[8].mxu1 }
 0x4b1   :  { %v6665_v26 = vpop.f32.mrb[9].mxu1 }
 0x4b4   :  { %v7997_v27 = vpop.f32.mrb[10].mxu1 }
 0x4b5   :  { %v6670_v28 = vpop.f32.mrb[11].mxu1 }
 0x4bb   :  { %v905_v29 = vpop.f32.mrb[12].mxu1 }
 0x4bc   :  { %v987_v30 = vmul.f32 0.35355338, %v905_v29  ;;  %v6675_v31 = vpop.f32.mrb[13].mxu1 }
 0x4be   :  { %v989_v32 = vsel %vm503_vm5, %v987_v30, -inf }
 0x4bf   :  { %990 = vmax.xlane.f32.xlu1 %v989_v32  ;;  %v983_v33 = vpop.f32.mrb[14].mxu1 }
 0x4c0   :  { %v988_v34 = vmul.f32 0.35355338, %v983_v33  ;;  %v6680_v35 = vpop.f32.mrb[15].mxu1 }
 0x4c2   :  { %v992_v36 = vsel %vm503_vm5, %v988_v34, -inf }
 0x4c3   :  { %993 = vmax.xlane.f32.xlu0 %v992_v36 }
 0x4d0   :  { %1011 = vrot.lane.b32.xlu1 %v7939_v49, %s7641_s17 }
 0x4d4   :  { %1165 = vrot.lane.b32.xlu1 %v7939_v49, %s7642_s25 }
 0x4d9   :  { %1087 = vrot.lane.b32.xlu0 %v7943_v50, %s7641_s17 }
 0x4dd   :  { %1243 = vrot.lane.b32.xlu0 %v7943_v50, %s7642_s25 }
 0x54c   :  { %v991_v37 = vpop.xlane.xlu1 %990 }
 0x54d   :  { %v995_v38 = vsub.f32 %v987_v30, %v991_v37 }
 0x54f   :  { %v997_v39 = vmul.f32 1.442695, %v995_v38 }
 0x550   :  { %v1012_v40 = vpop.permute.xlu1 %1011  ;;  %v994_v41 = vpop.xlane.xlu0 %993 }
 0x551   :  { %7433 = vpow2.f32 %v997_v39  ;;  %v996_v42 = vsub.f32 %v988_v34, %v994_v41  ;;  %6682 = vmatpush3.msra.mxu1 %v1012_v40 }
 0x552   :  { %6686 = vmatprep.subr.mxu1 %v7636_v8 }
 0x553   :  { %v999_v43 = vmul.f32 1.442695, %v996_v42 }
 0x554   :  { %v1166_v48 = vpop.permute.xlu1 %1165  ;;  %v1088_v56 = vpop.permute.xlu0 %1087 }
 0x555   :  { %7435 = vpow2.f32 %v999_v43 }
 0x558   :  { %v1244_v60 = vpop.permute.xlu0 %1243 }
 0x55b   :  { %v7434_v44 = vpop.eup %7433 }
 0x55c   :  { %v1001_v45 = vsel %vm503_vm5, %v7434_v44, 0.0 }
 0x55d   :  { %1002 = vadd.xlane.f32.xlu1 %v1001_v45 }
 0x55f   :  { %v7436_v46 = vpop.eup %7435 }
 0x560   :  { %v1004_v47 = vsel %vm503_vm5, %v7436_v46, 0.0 }
 0x561   :  { %1005 = vadd.xlane.f32.xlu1 %v1004_v47 }
 0x572   :  { %1163 = vrot.lane.b32.xlu1 %v7939_v49, %s7643_s22 }
 0x576   :  { %1241 = vrot.lane.b32.xlu1 %v7943_v50, %s7643_s22 }
 0x5ea   :  { %v1003_v51 = vpop.xlane.xlu1 %1002 }
 0x5eb   :  { %7437 = vrcp.f32 %v1003_v51 }
 0x5ee   :  { %v1006_v52 = vpop.xlane.xlu1 %1005 }
 0x5ef   :  { %7439 = vrcp.f32 %v1006_v52 }
 0x5f2   :  { %v1164_v59 = vpop.permute.xlu1 %1163 }
 0x5f5   :  { %v7438_v54 = vpop.eup %7437 }
 0x5f6   :  { %v1009_v55 = vmul.f32 %v7438_v54, %v7434_v44  ;;  %v1242_v61 = vpop.permute.xlu1 %1241 }
 0x5f8   :  { %6684 = vmatmul.mubr.msk.f32.vlgmr.msra.gmra.mrb[16].mxu1 %vm503_vm5, %v1009_v55 }
 0x5f9   :  { %v7440_v57 = vpop.eup %7439  ;;  %6687 = vmatpush3.msra.mxu1 %v1088_v56  ;;  %6688 = vmatprep.mubr.msk.f32.mxu1 %vm7635_vm2, %v7636_v8 }
 0x5fa   :  { %v1010_v58 = vmul.f32 %v7440_v57, %v7436_v46  ;;  %6691 = vmatprep.subr.mxu1 %v7636_v8 }
 0x5fc   :  { %6689 = vmatmul.mubr.msk.f32.vlgmr.msra.gmra.mrb[18].mxu1 %vm503_vm5, %v1010_v58 }
 0x5fd   :  { %6693 = vmatprep.mubr.msk.f32.mxu1 %vm7635_vm2, %v7636_v8 }
 0x600   :  { %6692 = vmatpush3.xpose.msk.msra.mxu1 %vm503_vm5, %v1166_v48 }
 0x601   :  { %6696 = vmatprep.subr.mxu1 %v7636_v8 }
 0x603   :  { %6694 = vmatmul.mubr.msk.f32.vlgmr.msra.gmra.mrb[20].mxu1 %vm503_vm5, %v1164_v59 }
 0x604   :  { %6697 = vmatpush3.xpose.msk.msra.mxu1 %vm503_vm5, %v1244_v60  ;;  %6698 = vmatprep.mubr.msk.f32.mxu1 %vm7635_vm2, %v7636_v8 }
 0x605   :  { %6701 = vmatprep.subr.mxu1 %v7636_v8 }
 0x607   :  { %6699 = vmatmul.mubr.msk.f32.vlgmr.msra.gmra.mrb[22].mxu1 %vm503_vm5, %v1242_v61 }
 0x608   :  { %6703 = vmatprep.mubr.msk.f32.mxu1 %vm7635_vm2, %v7636_v8 }
 0x6cb   :  { %v8033_v62 = vpop.f32.mrb[16].mxu1 }
 0x6cc   :  { %v6685_v63 = vpop.f32.mrb[17].mxu1 }
 0x6cf   :  { %v8035_v0 = vpop.f32.mrb[18].mxu1 }
 0x6d0   :  { %v6690_v1 = vpop.f32.mrb[19].mxu1 }
 0x6d6   :  { %v1237_v2 = vpop.f32.mrb[20].mxu1 }
 0x6d7   :  { %v1319_v4 = vmul.f32 0.35355338, %v1237_v2  ;;  %v6695_v5 = vpop.f32.mrb[21].mxu1 }
 0x6d9   :  { %v1321_v7 = vsel %vm503_vm5, %v1319_v4, -inf }
 0x6da   :  { %1322 = vmax.xlane.f32.xlu0 %v1321_v7  ;;  %v1315_v9 = vpop.f32.mrb[22].mxu1 }
 0x6db   :  { %v1320_v11 = vmul.f32 0.35355338, %v1315_v9  ;;  %v6700_v12 = vpop.f32.mrb[23].mxu1 }
 0x6dd   :  { %v1324_v13 = vsel %vm503_vm5, %v1320_v11, -inf }
 0x6de   :  { %1325 = vmax.xlane.f32.xlu1 %v1324_v13 }
 0x6ef   :  { %1343 = vrot.lane.b32.xlu1 %v7939_v49, %s7644_s23 }
 0x6f3   :  { %1497 = vrot.lane.b32.xlu1 %v7939_v49, %s7645_s26 }
 0x6f7   :  { %1495 = vrot.lane.b32.xlu1 %v7939_v49, %s8824_s28 }
 0x6fb   :  { %1573 = vrot.lane.b32.xlu1 %v7943_v50, %s8824_s28  ;;  %s8857_s28 = sld [smem:[#allocation14_spill]] }
 0x767   :  { %v1323_v14 = vpop.xlane.xlu0 %1322 }
 0x768   :  { %v1327_v15 = vsub.f32 %v1319_v4, %v1323_v14 }
 0x76a   :  { %v1329_v16 = vmul.f32 1.442695, %v1327_v15 }
 0x76b   :  { %v1326_v17 = vpop.xlane.xlu1 %1325 }
 0x76c   :  { %7441 = vpow2.f32 %v1329_v16  ;;  %v1328_v18 = vsub.f32 %v1320_v11, %v1326_v17 }
 0x76e   :  { %v1331_v19 = vmul.f32 1.442695, %v1328_v18 }
 0x76f   :  { %v1344_v20 = vpop.permute.xlu1 %1343 }
 0x770   :  { %7443 = vpow2.f32 %v1331_v19  ;;  %6702 = vmatpush3.msra.mxu1 %v1344_v20 }
 0x771   :  { %6706 = vmatprep.subr.mxu1 %v7636_v8 }
 0x773   :  { %v1498_v33 = vpop.permute.xlu1 %1497 }
 0x776   :  { %v7442_v21 = vpop.eup %7441 }
 0x777   :  { %v1333_v22 = vsel %vm503_vm5, %v7442_v21, 0.0  ;;  %v1496_v35 = vpop.permute.xlu1 %1495 }
 0x778   :  { %1334 = vadd.xlane.f32.xlu0 %v1333_v22 }
 0x77a   :  { %v7444_v23 = vpop.eup %7443 }
 0x77b   :  { %v1336_v24 = vsel %vm503_vm5, %v7444_v23, 0.0  ;;  %v1574_v37 = vpop.permute.xlu1 %1573 }
 0x77c   :  { %1337 = vadd.xlane.f32.xlu0 %v1336_v24 }
 0x792   :  { %1419 = vrot.lane.b32.xlu0 %v7943_v50, %s7644_s23 }
 0x796   :  { %1575 = vrot.lane.b32.xlu0 %v7943_v50, %s7645_s26 }
 0x805   :  { %v1335_v26 = vpop.xlane.xlu0 %1334 }
 0x806   :  { %7445 = vrcp.f32 %v1335_v26 }
 0x809   :  { %v1338_v28 = vpop.xlane.xlu0 %1337 }
 0x80a   :  { %7447 = vrcp.f32 %v1338_v28 }
 0x80d   :  { %v1420_v31 = vpop.permute.xlu0 %1419 }
 0x810   :  { %v7446_v29 = vpop.eup %7445 }
 0x811   :  { %v1341_v30 = vmul.f32 %v7446_v29, %v7442_v21  ;;  %v1576_v36 = vpop.permute.xlu0 %1575 }
 0x813   :  { %6704 = vmatmul.mubr.msk.f32.vlgmr.msra.gmra.mrb[24].mxu1 %vm503_vm5, %v1341_v30 }
 0x814   :  { %v7448_v32 = vpop.eup %7447  ;;  %6707 = vmatpush3.msra.mxu1 %v1420_v31  ;;  %6708 = vmatprep.mubr.msk.f32.mxu1 %vm7635_vm2, %v7636_v8 }
 0x815   :  { %v1342_v34 = vmul.f32 %v7448_v32, %v7444_v23  ;;  %6711 = vmatprep.subr.mxu1 %v7636_v8 }
 0x817   :  { %6709 = vmatmul.mubr.msk.f32.vlgmr.msra.gmra.mrb[26].mxu1 %vm503_vm5, %v1342_v34 }
 0x818   :  { %6713 = vmatprep.mubr.msk.f32.mxu1 %vm7635_vm2, %v7636_v8 }
 0x81b   :  { %6712 = vmatpush3.xpose.msk.msra.mxu1 %vm503_vm5, %v1498_v33 }
 0x81c   :  { %6716 = vmatprep.subr.mxu1 %v7636_v8 }
 0x81e   :  { %6714 = vmatmul.mubr.msk.f32.vlgmr.msra.gmra.mrb[28].mxu1 %vm503_vm5, %v1496_v35 }
 0x81f   :  { %6717 = vmatpush3.xpose.msk.msra.mxu1 %vm503_vm5, %v1576_v36  ;;  %6718 = vmatprep.mubr.msk.f32.mxu1 %vm7635_vm2, %v7636_v8 }
 0x820   :  { %6721 = vmatprep.subr.mxu1 %v7636_v8 }
 0x822   :  { %6719 = vmatmul.mubr.msk.f32.vlgmr.msra.gmra.mrb[30].mxu1 %vm503_vm5, %v1574_v37 }
 0x823   :  { %6723 = vmatprep.mubr.msk.f32.mxu1 %vm7635_vm2, %v7636_v8 }
 0x8e6   :  { %v8071_v38 = vpop.f32.mrb[24].mxu1 }
 0x8e7   :  { %v6705_v39 = vpop.f32.mrb[25].mxu1 }
 0x8ea   :  { %v8073_v40 = vpop.f32.mrb[26].mxu1 }
 0x8eb   :  { %v6710_v41 = vpop.f32.mrb[27].mxu1 }
 0x8f1   :  { %v1569_v42 = vpop.f32.mrb[28].mxu1 }
 0x8f2   :  { %v1651_v43 = vmul.f32 0.35355338, %v1569_v42  ;;  %v6715_v44 = vpop.f32.mrb[29].mxu1 }
 0x8f4   :  { %v1653_v45 = vsel %vm503_vm5, %v1651_v43, -inf }
 0x8f5   :  { %1654 = vmax.xlane.f32.xlu0 %v1653_v45  ;;  %v1647_v46 = vpop.f32.mrb[30].mxu1  ;;  %v2350_v45 = vld [vmem:[%s7715_s19 + $0x50] sm:$0xff] }
 0x8f6   :  { %v1652_v47 = vmul.f32 0.35355338, %v1647_v46  ;;  %v6720_v48 = vpop.f32.mrb[31].mxu1 }
 0x8f7   :  { %v2352_v48 = vld [vmem:[%s7715_s19 + $0x60] sm:$0xff] }
 0x8f8   :  { %v1656_v51 = vsel %vm503_vm5, %v1652_v47, -inf }
 0x8f9   :  { %1657 = vmax.xlane.f32.xlu1 %v1656_v51  ;;  %v2353_v51 = vld [vmem:[%s7715_s19 + $0x68] sm:$0xff] }
 0x90a   :  { %1675 = vrot.lane.b32.xlu1 %v7939_v49, %s8822_s1 }
 0x90b   :  { %1751 = vrot.lane.b32.xlu0 %v7943_v50, %s8822_s1 }
 0x90e   :  { %1829 = vrot.lane.b32.xlu1 %v7939_v49, %s8820_s2 }
 0x912   :  { %1907 = vrot.lane.b32.xlu1 %v7943_v50, %s8820_s2  ;;  %s8855_s2 = sld [smem:[#allocation18_spill]] }
 0x916   :  { %1905 = vrot.lane.b32.xlu1 %v7943_v50, %s8818_s7 }
 0x982   :  { %v1655_v52 = vpop.xlane.xlu0 %1654 }
 0x983   :  { %v1659_v54 = vsub.f32 %v1651_v43, %v1655_v52  ;;  %v7132_v52 = vpack.c.bf16 %v2353_v51, %v2352_v48 }
 0x985   :  { %v1661_v55 = vmul.f32 1.442695, %v1659_v54  ;;  %v6106_v54 = vld [vmem:[%s7685_s21] ss:$0 sm:$0xff]  ;;  %s8846_s21 = sld [smem:[#allocation9_spill]] }
 0x986   :  { %v1752_v56 = vpop.permute.xlu0 %1751  ;;  %v1658_v57 = vpop.xlane.xlu1 %1657 }
 0x987   :  { %7449 = vpow2.f32 %v1661_v55  ;;  %v1660_v58 = vsub.f32 %v1652_v47, %v1658_v57  ;;  %6727 = vmatpush3.msra.mxu0 %v1752_v56  ;;  %v8144_v55 = vadd.f32 %v6106_v54, %v7959_v53  ;;  %v2354_v56 = vld [vmem:[%s7715_s19 + $0x70] sm:$0xff]  ;;  %v369_v53 = vld [vmem:[%s7705_s8 + $0x20] sm:$0xff] }
 0x988   :  { %6736 = vmatprep.subr.mxu0 %v7636_v8 }
 0x989   :  { %v1663_v59 = vmul.f32 1.442695, %v1660_v58  ;;  %v347_v57 = vmax.f32 %v8144_v55, 0.0  ;;  %v365_v58 = vld [vmem:[%s7705_s8] sm:$0xff]  ;;  %v6228_v55 = vld [vmem:[%s7705_s8 + $0x48] sm:$0xff] }
 0x98a   :  { %v1676_v60 = vpop.permute.xlu1 %1675 }
 0x98b   :  { %7451 = vpow2.f32 %v1663_v59  ;;  %6722 = vmatpush3.msra.mxu1 %v1676_v60  ;;  %v366_v59 = vld [vmem:[%s7705_s8 + $0x8] sm:$0xff]  ;;  %v367_v60 = vld [vmem:[%s7705_s8 + $0x10] sm:$0xff] }
 0x98c   :  { %6731 = vmatprep.subr.mxu1 %v7636_v8 }
 0x98e   :  { %v1830_v7 = vpop.permute.xlu1 %1829 }
 0x991   :  { %v7450_v61 = vpop.eup %7449 }
 0x992   :  { %v1665_v63 = vsel %vm503_vm5, %v7450_v61, 0.0  ;;  %v1908_v13 = vpop.permute.xlu1 %1907 }
 0x993   :  { %1666 = vadd.xlane.f32.xlu0 %v1665_v63  ;;  %v368_v63 = vld [vmem:[%s7705_s8 + $0x18] sm:$0xff] }
 0x995   :  { %v7452_v1 = vpop.eup %7451 }
 0x996   :  { %v1668_v2 = vsel %vm503_vm5, %v7452_v1, 0.0  ;;  %v1906_v16 = vpop.permute.xlu1 %1905 }
 0x997   :  { %1669 = vadd.xlane.f32.xlu0 %v1668_v2 }
 0x9ad   :  { %1827 = vrot.lane.b32.xlu0 %v7939_v49, %s8818_s7  ;;  %s8854_s7 = sld [smem:[#allocation16_spill]] }
 0xa20   :  { %v1667_v4 = vpop.xlane.xlu0 %1666 }
 0xa21   :  { %7453 = vrcp.f32 %v1667_v4 }
 0xa24   :  { %v1670_v5 = vpop.xlane.xlu0 %1669 }
 0xa25   :  { %7455 = vrcp.f32 %v1670_v5  ;;  %v6171_v5 = vld [vmem:[%s7720_s24] ss:$0 sm:$0xff] }
 0xa28   :  { %v1828_v15 = vpop.permute.xlu0 %1827 }
 0xa2b   :  { %v7454_v9 = vpop.eup %7453 }
 0xa2c   :  { %v1673_v11 = vmul.f32 %v7454_v9, %v7450_v61  ;;  %v7115_v61 = vpack.c.bf16 %v366_v59, %v365_v58  ;;  %v7652_v59 = vmov 1966171168  }
 0xa2e   :  { %6724 = vmatmul.mubr.msk.f32.vlgmr.msra.gmra.mrb[32].mxu1 %vm503_vm5, %v1673_v11 }
 0xa2f   :  { %v7456_v12 = vpop.eup %7455  ;;  %6732 = vmatpush3.xpose.msk.msra.mxu1 %vm503_vm5, %v1830_v7  ;;  %6733 = vmatprep.mubr.msk.f32.mxu1 %vm7635_vm2, %v7636_v8 }
 0xa30   :  { %v1674_v14 = vmul.f32 %v7456_v12, %v7452_v1  ;;  %6741 = vmatprep.subr.mxu1 %v7636_v8  ;;  %v7121_v1 = vpack.c.bf16 %v368_v63, %v367_v60  ;;  %v2554_v60 = vunpack.c.l.s4 %v7652_v59  ;;  %v2755_v59 = vld [vmem:[%s8849_s18 + $0x10] sm:$0xff] }
 0xa32   :  { %6729 = vmatmul.mubr.msk.f32.vlgmr.msra.gmra.mrb[2].mxu0 %vm503_vm5, %v1674_v14  ;;  %6734 = vmatmul.mubr.msk.f32.vlgmr.msra.gmra.mrb[34].mxu1 %vm503_vm5, %v1828_v15  ;;  %v2555_v63 = vunpack.c.0.s8 %v2554_v60 }
 0xa33   :  { %6737 = vmatpush3.xpose.msk.msra.mxu0 %vm503_vm5, %v1908_v13  ;;  %6738 = vmatprep.mubr.msk.f32.mxu0 %vm7635_vm2, %v7636_v8 }
 0xa34   :  { %6746 = vmatprep.subr.mxu0 %v7636_v8  ;;  %6743 = vmatprep.mubr.msk.f32.mxu1 %vm7635_vm2, %v7636_v8 }
 0xa36   :  { %6739 = vmatmul.mubr.msk.f32.vlgmr.msra.gmra.mrb[4].mxu0 %vm503_vm5, %v1906_v16 }
 0xa37   :  { %6748 = vmatprep.mubr.msk.f32.mxu0 %vm7635_vm2, %v7636_v8 }
 0xb01   :  { %v1747_v17 = vpop.f32.mrb[32].mxu1 }
 0xb02   :  { %v6725_v18 = vpop.f32.mrb[33].mxu1 }
 0xb05   :  { %v1823_v19 = vpop.f32.mrb[2].mxu0  ;;  %v1901_v20 = vpop.f32.mrb[34].mxu1 }
 0xb06   :  { %v1983_v21 = vmul.f32 0.35355338, %v1901_v20  ;;  %v6730_v22 = vpop.f32.mrb[3].mxu0  ;;  %v6735_v23 = vpop.f32.mrb[35].mxu1 }
 0xb07   :  { %v2356_v23 = vld [vmem:[%s7725_s30] sm:$0xff] }
 0xb08   :  { %v1985_v24 = vsel %vm503_vm5, %v1983_v21, -inf }
 0xb09   :  { %v1979_v26 = vpop.f32.mrb[4].mxu0  ;;  %1986 = vmax.xlane.f32.xlu0 %v1985_v24  ;;  %v2357_v24 = vld [vmem:[%s7725_s30 + $0x8] sm:$0xff] }
 0xb0a   :  { %v1984_v28 = vmul.f32 0.35355338, %v1979_v26  ;;  %v6740_v29 = vpop.f32.mrb[5].mxu0 }
 0xb0b   :  { %v7136_v29 = vpack.c.bf16 %v2357_v24, %v2356_v23 }
 0xb0c   :  { %v1988_v30 = vsel %vm503_vm5, %v1984_v28, -inf }
 0xb0d   :  { %1989 = vmax.xlane.f32.xlu1 %v1988_v30 }
 0xb1e   :  { %2007 = vrot.lane.b32.xlu1 %v7939_v49, %s8816_s10 }
 0xb22   :  { %2161 = vrot.lane.b32.xlu1 %v8033_v62, %s8814_s11 }
 0xb26   :  { %2163 = vrot.lane.b32.xlu1 %v8035_v0, %s8814_s11  ;;  %s8852_s11 = sld [smem:[#allocation11_spill]] }
 0xb2a   :  { %2171 = vrot.lane.b32.xlu1 %v8073_v40, %s8816_s10 }
 0xb2e   :  { %2179 = vrot.lane.b32.xlu1 %v1823_v19, %s8822_s1 }
 0xb96   :  { %v1987_v31 = vpop.xlane.xlu0 %1986 }
 0xb97   :  { %v1991_v32 = vsub.f32 %v1983_v21, %v1987_v31 }
 0xb99   :  { %v1993_v33 = vmul.f32 1.442695, %v1991_v32 }
 0xb9a   :  { %v1990_v34 = vpop.xlane.xlu1 %1989 }
 0xb9b   :  { %7457 = vpow2.f32 %v1993_v33  ;;  %v1992_v35 = vsub.f32 %v1984_v28, %v1990_v34  ;;  %v2359_v33 = vld [vmem:[%s7725_s30 + $0x18] sm:$0xff] }
 0xb9d   :  { %v1995_v36 = vmul.f32 1.442695, %v1992_v35  ;;  %v2360_v35 = vld [vmem:[%s7725_s30 + $0x20] sm:$0xff] }
 0xb9e   :  { %v2008_v49 = vpop.permute.xlu1 %2007 }
 0xb9f   :  { %7459 = vpow2.f32 %v1995_v36  ;;  %6742 = vmatpush3.msra.mxu1 %v2008_v49 }
 0xba0   :  { %7117 = vmatprep.subr.msk.bf16.mxu1 %vm7847_vm1, %v7115_v61 }
 0xba2   :  { %v2162_v13 = vpop.permute.xlu1 %2161 }
 0xba3   :  { %v2191_v18 = vsel %vm503_vm5, %v7995_v25, %v2162_v13 }
 0xba5   :  { %v7458_v37 = vpop.eup %7457 }
 0xba6   :  { %v1997_v62 = vsel %vm503_vm5, %v7458_v37, 0.0  ;;  %v2164_v14 = vpop.permute.xlu1 %2163 }
 0xba7   :  { %1998 = vadd.xlane.f32.xlu0 %v1997_v62  ;;  %v2192_v28 = vsel %vm503_vm5, %v7997_v27, %v2164_v14  ;;  %v2358_v27 = vld [vmem:[%s7725_s30 + $0x10] sm:$0xff] }
 0xba8   :  { %v7140_v34 = vpack.c.bf16 %v2359_v33, %v2358_v27 }
 0xba9   :  { %v7460_v0 = vpop.eup %7459 }
 0xbaa   :  { %v2000_v39 = vsel %vm503_vm5, %v7460_v0, 0.0  ;;  %v2172_v16 = vpop.permute.xlu1 %2171 }
 0xbab   :  { %2001 = vadd.xlane.f32.xlu0 %v2000_v39  ;;  %v2194_v25 = vsel %vm156_vm3, %v2192_v28, %v2172_v16 }
 0xbae   :  { %v2180_v20 = vpop.permute.xlu1 %2179 }
 0xbaf   :  { %v2197_v30 = vsel %vm2195_vm7, %v2194_v25, %v2180_v20 }
 0xbc1   :  { %2083 = vrot.lane.b32.xlu0 %v7943_v50, %s8816_s10  ;;  %v2351_v50 = vld [vmem:[%s7715_s19 + $0x58] sm:$0xff] }
 0xbc2   :  { %v7128_v46 = vpack.c.bf16 %v2351_v50, %v2350_v45 }
 0xbc5   :  { %2169 = vrot.lane.b32.xlu0 %v8071_v38, %s8816_s10  ;;  %s8853_s10 = sld [smem:[#allocation12_spill]] }
 0xbc9   :  { %2177 = vrot.lane.b32.xlu0 %v1747_v17, %s8822_s1  ;;  %s8856_s1 = sld [smem:[#allocation13_spill]] }
 0xc34   :  { %v1999_v40 = vpop.xlane.xlu0 %1998 }
 0xc35   :  { %7461 = vrcp.f32 %v1999_v40 }
 0xc38   :  { %v2002_v41 = vpop.xlane.xlu0 %2001 }
 0xc39   :  { %7463 = vrcp.f32 %v2002_v41 }
 0xc3c   :  { %v2084_v42 = vpop.permute.xlu0 %2083 }
 0xc3d   :  { %6747 = vmatpush3.msra.mxu0 %v2084_v42 }
 0xc3e   :  { %7127 = vmatprep.subr.bf16.mxu0 %v7634_v6 }
 0xc3f   :  { %v7462_v43 = vpop.eup %7461 }
 0xc40   :  { %v2005_v44 = vmul.f32 %v7462_v43, %v7458_v37  ;;  %v2170_v15 = vpop.permute.xlu0 %2169  ;;  %v6161_v37 = vld [vmem:[%s7710_s14] ss:$0 sm:$0xff] }
 0xc41   :  { %v2193_v19 = vsel %vm156_vm3, %v2191_v18, %v2170_v15 }
 0xc42   :  { %6744 = vmatmul.mubr.msk.f32.vlgmr.msra.gmra.mrb[36].mxu1 %vm503_vm5, %v2005_v44 }
 0xc43   :  { %v7464_v38 = vpop.eup %7463  ;;  %7120 = vmatpush3.bf16.xpose.msk.msra.mxu1 %vm7847_vm1, %v7115_v61  ;;  %v2556_v61 = vlaneseq }
 0xc44   :  { %v2006_v47 = vmul.f32 %v7464_v38, %v7460_v0  ;;  %7123 = vmatprep.subr.msk.bf16.mxu1 %vm7847_vm1, %v7121_v1  ;;  %v2178_v17 = vpop.permute.xlu0 %2177 }
 0xc45   :  { %v2196_v21 = vsel %vm2195_vm7, %v2193_v19, %v2178_v17  ;;  %v6169_v17 = vld [vmem:[%s8846_s21] ss:$0 sm:$0xff] }
 0xc46   :  { %6749 = vmatmul.mubr.msk.f32.vlgmr.msra.gmra.mrb[6].mxu0 %vm503_vm5, %v2006_v47 }
 0xc47   :  { %7130 = vmatpush3.bf16.xpose.msk.msra.mxu0 %vm7847_vm1, %v7128_v46  ;;  %6774 = vmatprep.mubr.msk.f32.mxu0 %vm7635_vm2, %v7636_v8 }
 0xc48   :  { %7131 = vmatprep.subr.bf16.mxu0 %v7634_v6 }
 0xc4b   :  { %7126 = vmatpush3.bf16.xpose.msk.msra.mxu1 %vm7847_vm1, %v7121_v1  ;;  %v2557_v1 = vshrl.u32 %v2556_v61, 7 }
 0xc4c   :  { %6759 = vmatprep.subr.msk.mxu1 %vm258_vm0, %v369_v53 }
 0xc4d   :  { %v8215_v23 = vsub.s32 0, %v2557_v1 }
 0xc4f   :  { %7134 = vmatpush3.bf16.xpose.msk.msra.mxu0 %vm7847_vm1, %v7132_v52 }
 0xc50   :  { %6772 = vmatprep.subr.mxu0 %v7636_v8 }
 0xc53   :  { %6760 = vmatpush3.xpose.msk.msra.mxu1 %vm258_vm0, %v369_v53 }
 0xc54   :  { %7135 = vmatprep.subr.bf16.mxu1 %v7634_v6 }
 0xc57   :  { %6773 = vmatpush3.xpose.msk.msra.mxu0 %vm258_vm0, %v2354_v56 }
 0xc5a   :  { %6775 = vmatmul.mubr.msk.f32.vlgmr.msra.gmra.mrb[8].mxu0 %vm258_vm0, %v347_v57 }
 0xd15   :  { %v2079_v2 = vpop.f32.mrb[36].mxu1 }
 0xd16   :  { %2185 = vrot.lane.b32.xlu0 %v2079_v2, %s7644_s23  ;;  %v6745_v4 = vpop.f32.mrb[37].mxu1  ;;  %v6178_v2 = vld [vmem:[%s7730_s6] ss:$0 sm:$0xff] }
 0xd19   :  { %v2155_v7 = vpop.f32.mrb[6].mxu0 }
 0xd1a   :  { %2187 = vrot.lane.b32.xlu1 %v2155_v7, %s7644_s23  ;;  %v6750_v9 = vpop.f32.mrb[7].mxu0  ;;  %2367 = vrot.lane.b32.xlu0 %v6171_v5, %s7638_s5 }
 0xd2d   :  { %v2454_v11 = vpop.f32.mrb[8].mxu0 }
 0xd2e   :  { %v6776_v12 = vpop.f32.mrb[9].mxu0 }
 0xd2f   :  { %v8208_v12 = vsub.s32 %v2555_v63, %v2557_v1  ;;  %v2756_v1 = vld [vmem:[%s8849_s18 + $0x18] sm:$0xff] }
 0xd88   :  { %v2186_v22 = vpop.permute.xlu0 %2185 }
 0xd89   :  { %v2199_v26 = vsel %vm2198_vm6, %v2196_v21, %v2186_v22  ;;  %v6170_v22 = vld [vmem:[%s8847_s15] ss:$0 sm:$0xff] }
 0xd8a   :  { %6761 = vmatprep.mubr.msk.f32.mxu1 %vm258_vm0, %v2199_v26 }
 0xd8c   :  { %v2188_v31 = vpop.permute.xlu1 %2187  ;;  %v2368_v36 = vpop.permute.xlu0 %2367 }
 0xd8d   :  { %v2200_v32 = vsel %vm2198_vm6, %v2197_v30, %v2188_v31  ;;  %v2455_v49 = vadd.f32 %v2454_v11, %v2368_v36  ;;  %v2632_v36 = vld [vmem:[%s8848_s16 + $0x8] sm:$0xff] }
 0xd8e   :  { %6762 = vmatmul.mubr.msk.f32.vlgmr.msra.gmra.mrb[38].mxu1 %vm258_vm0, %v2200_v32 }
 0xd8f   :  { %7138 = vmatpush3.bf16.xpose.msk.msra.mxu1 %vm7847_vm1, %v7136_v29  ;;  %6787 = vmatprep.mubr.msk.f32.mxu1 %vm7635_vm2, %v7636_v8 }
 0xd90   :  { %7139 = vmatprep.subr.bf16.mxu1 %v7634_v6 }
 0xd97   :  { %7142 = vmatpush3.bf16.xpose.msk.msra.mxu1 %vm7847_vm1, %v7140_v34 }
 0xd98   :  { %6785 = vmatprep.subr.mxu1 %v7636_v8 }
 0xd9f   :  { %6786 = vmatpush3.xpose.msk.msra.mxu1 %vm258_vm0, %v2360_v35  ;;  %v2631_v35 = vld [vmem:[%s8848_s16] sm:$0xff] }
 0xda2   :  { %6788 = vmatmul.mubr.msk.f32.vlgmr.msra.gmra.mrb[40].mxu1 %vm258_vm0, %v2455_v49  ;;  %v2633_v49 = vld [vmem:[%s8848_s16 + $0x10] sm:$0xff] }
 0xe61   :  { %v6763_v62 = vpop.f32.mrb[38].mxu1 }
 0xe62   :  { %v2300_v0 = vadd.f32 %v6763_v62, %v6161_v37  ;;  %v2294_v39 = vpop.f32.mrb[39].mxu1  ;;  %v2634_v62 = vld [vmem:[%s8848_s16 + $0x18] sm:$0xff] }
 0xe63   :  { %v2295_v40 = vadd.f32 %v6161_v37, %v2294_v39  ;;  %v7143_v37 = vpack.c.bf16 %v2632_v36, %v2631_v35 }
 0xe64   :  { %v2304_v41 = vadd.f32 %v2300_v0, %v7863_v10  ;;  %v7149_v0 = vpack.c.bf16 %v2634_v62, %v2633_v49 }
 0xe65   :  { %v2303_v42 = vadd.f32 %v2295_v40, %v7863_v10  ;;  %7145 = vmatprep.subr.msk.bf16.mxu0 %vm7847_vm1, %v7143_v37 }
 0xe66   :  { %v2310_v43 = vsel %vm258_vm0, %v2304_v41, 0.0  ;;  %7148 = vmatpush3.bf16.xpose.msk.msra.mxu0 %vm7847_vm1, %v7143_v37 }
 0xe67   :  { %2311 = vadd.xlane.f32.xlu0 %v2310_v43  ;;  %v2307_v44 = vsel %vm258_vm0, %v2303_v42, 0.0  ;;  %7151 = vmatprep.subr.msk.bf16.mxu0 %vm7847_vm1, %v7149_v0 }
 0xe68   :  { %2308 = vadd.xlane.f32.xlu1 %v2307_v44 }
 0xe6e   :  { %7154 = vmatpush3.bf16.xpose.msk.msra.mxu0 %vm7847_vm1, %v7149_v0 }
 0xe75   :  { %v2548_v45 = vpop.f32.mrb[40].mxu1 }
 0xe76   :  { %v6789_v50 = vpop.f32.mrb[41].mxu1  ;;  %v2549_v11 = vadd.f32 %v6178_v2, %v2548_v45 }
 0xe78   :  { %v2559_v14 = vrot.slane %v2549_v11, %v8208_v12 }
 0xe7a   :  { %v2560_v15 = vcombine.high %v2559_v14, %v2559_v14  ;;  %v2567_v21 = vrot.slane %v2559_v14, %v8208_v12  ;;  %v6185_v14 = vld [vmem:[%s8852_s11] ss:$0 sm:$0xff] }
 0xe7c   :  { %v2574_v20 = vrot.slane %v2560_v15, %v8208_v12  ;;  %v2578_v31 = vrot.slane %v2567_v21, %v8215_v23 }
 0xe7e   :  { %v2582_v29 = vrot.slane %v2574_v20, %v8215_v23 }
 0xef4   :  { %v2312_v38 = vpop.xlane.xlu0 %2311 }
 0xef5   :  { %v2315_v46 = vmul.f32 0.025, %v2312_v38  ;;  %v2309_v47 = vpop.xlane.xlu1 %2308 }
 0xef6   :  { %v2314_v48 = vmul.f32 0.025, %v2309_v47  ;;  %v2635_v47 = vld [vmem:[%s8848_s16 + $0x20] sm:$0xff] }
 0xef7   :  { %v2317_v51 = vsub.f32 %v2304_v41, %v2315_v46 }
 0xef8   :  { %v2316_v52 = vsub.f32 %v2303_v42, %v2314_v48  ;;  %v2636_v48 = vld [vmem:[%s8848_s16 + $0x28] sm:$0xff] }
 0xef9   :  { %v2319_v54 = vmul.f32 %v2317_v51, %v2317_v51 }
 0xefa   :  { %v2318_v56 = vmul.f32 %v2316_v52, %v2316_v52 }
 0xefb   :  { %v2323_v58 = vsel %vm258_vm0, %v2319_v54, 0.0  ;;  %v2638_v54 = vld [vmem:[%s8848_s16 + $0x38] sm:$0xff] }
 0xefc   :  { %2324 = vadd.xlane.f32.xlu1 %v2323_v58  ;;  %v2320_v10 = vsel %vm258_vm0, %v2318_v56, 0.0  ;;  %v2753_v58 = vld [vmem:[%s8849_s18] sm:$0xff] }
 0xefd   :  { %2321 = vadd.xlane.f32.xlu0 %v2320_v10  ;;  %v2754_v10 = vld [vmem:[%s8849_s18 + $0x8] sm:$0xff] }
 0xefe   :  { %v7167_v60 = vpack.c.bf16 %v2754_v10, %v2753_v58 }
 0xf00   :  { %7169 = vmatprep.subr.msk.bf16.mxu1 %vm8252_vm9, %v7167_v60 }
 0xf01   :  { %7172 = vmatpush3.bf16.xpose.msk.msra.mxu1 %vm8252_vm9, %v7167_v60 }
 0xf89   :  { %v2325_v53 = vpop.xlane.xlu1 %2324 }
 0xf8a   :  { %v2327_v4 = vmul.f32 0.025, %v2325_v53  ;;  %v2322_v5 = vpop.xlane.xlu0 %2321  ;;  %v7173_v53 = vpack.c.bf16 %v2756_v1, %v2755_v59 }
 0xf8b   :  { %v2326_v7 = vmul.f32 0.025, %v2322_v5 }
 0xf8c   :  { %v2329_v9 = vadd.f32 1e-05, %v2327_v4  ;;  %7175 = vmatprep.subr.msk.bf16.mxu1 %vm8252_vm9, %v7173_v53 }
 0xf8d   :  { %v2328_v13 = vadd.f32 1e-05, %v2326_v7  ;;  %7178 = vmatpush3.bf16.xpose.msk.msra.mxu1 %vm8252_vm9, %v7173_v53 }
 0xf8e   :  { %7465 = vrsqrt.f32 %v2329_v9 }
 0xf8f   :  { %7467 = vrsqrt.f32 %v2328_v13 }
 0xf98   :  { %v7466_v16 = vpop.eup %7465 }
 0xf99   :  { %v7468_v18 = vpop.eup %7467  ;;  %v2333_v19 = vmul.f32 %v7466_v16, %v2317_v51  ;;  %v7155_v51 = vpack.c.bf16 %v2636_v48, %v2635_v47  ;;  %v6215_v47 = vld [vmem:[%s7695_s29 + $0xb0] sm:$0xff] }
 0xf9a   :  { %v2332_v24 = vmul.f32 %v7468_v18, %v2316_v52  ;;  %v2637_v52 = vld [vmem:[%s8848_s16 + $0x30] sm:$0xff]  ;;  %v6186_v18 = vld [vmem:[%s8853_s10] ss:$0 sm:$0xff] }
 0xf9b   :  { %v2341_v26 = vmul.f32 %v6169_v17, %v2333_v19  ;;  %7157 = vmatprep.subr.msk.bf16.mxu0 %vm7847_vm1, %v7155_v51  ;;  %v7161_v56 = vpack.c.bf16 %v2638_v54, %v2637_v52  ;;  %v6217_v52 = vld [vmem:[%s7695_s29 + $0xc0] sm:$0xff] }
 0xf9c   :  { %v2340_v28 = vmul.f32 %v6169_v17, %v2332_v24  ;;  %7160 = vmatpush3.bf16.xpose.msk.msra.mxu0 %vm7847_vm1, %v7155_v51  ;;  %v2757_v24 = vld [vmem:[%s8849_s18 + $0x20] sm:$0xff]  ;;  %v6216_v51 = vld [vmem:[%s7695_s29 + $0xb8] sm:$0xff] }
 0xf9d   :  { %v2349_v25 = vadd.f32 %v6170_v22, %v2341_v26  ;;  %7163 = vmatprep.subr.msk.bf16.mxu0 %vm7847_vm1, %v7161_v56  ;;  %6817 = vmatprep.subr.msk.mxu1 %vm2765_vm8, %v2757_v24  ;;  %v6187_v26 = vld [vmem:[%s8854_s7] ss:$0 sm:$0xff]  ;;  %v7203_v54 = vpack.c.bf16 %v6217_v52, %v6216_v51 }
 0xf9e   :  { %v2348_v30 = vadd.f32 %v6170_v22, %v2340_v28  ;;  %6818 = vmatpush3.xpose.msk.msra.mxu1 %vm2765_vm8, %v2757_v24 }
 0xf9f   :  { %v2586_v32 = vadd.f32 %v2582_v29, %v2349_v25  ;;  %6855 = vmatprep.subr.mxu1 %v7636_v8 }
 0xfa0   :  { %v2585_v27 = vadd.f32 %v2578_v31, %v2348_v30 }
 0xfa1   :  { %v2592_v33 = vsel %vm258_vm0, %v2586_v32, 0.0 }
 0xfa2   :  { %2593 = vadd.xlane.f32.xlu1 %v2592_v33  ;;  %v2589_v34 = vsel %vm258_vm0, %v2585_v27, 0.0 }
 0xfa3   :  { %2590 = vadd.xlane.f32.xlu0 %v2589_v34 }
 0xfa4   :  { %7166 = vmatpush3.bf16.xpose.msk.msra.mxu0 %vm7847_vm1, %v7161_v56 }
0x102f   :  { %v2594_v39 = vpop.xlane.xlu1 %2593 }
0x1030   :  { %v2596_v40 = vmul.f32 0.025, %v2594_v39  ;;  %v2591_v41 = vpop.xlane.xlu0 %2590  ;;  %v6208_v39 = vld [vmem:[%s7695_s29 + $0x78] sm:$0xff] }
0x1031   :  { %v2595_v42 = vmul.f32 0.025, %v2591_v41  ;;  %v6210_v41 = vld [vmem:[%s7695_s29 + $0x88] sm:$0xff] }
0x1032   :  { %v2598_v43 = vsub.f32 %v2586_v32, %v2596_v40  ;;  %v6209_v40 = vld [vmem:[%s7695_s29 + $0x80] sm:$0xff] }
0x1033   :  { %v2597_v44 = vsub.f32 %v2585_v27, %v2595_v42  ;;  %v6198_v27 = vld [vmem:[%s8855_s2] ss:$0 sm:$0xff]  ;;  %v7179_v42 = vpack.c.bf16 %v6209_v40, %v6208_v39 }
0x1034   :  { %v2600_v45 = vmul.f32 %v2598_v43, %v2598_v43 }
0x1035   :  { %v2599_v50 = vmul.f32 %v2597_v44, %v2597_v44  ;;  %7181 = vmatprep.subr.msk.bf16.mxu0 %vm7847_vm1, %v7179_v42 }
0x1036   :  { %v2604_v38 = vsel %vm258_vm0, %v2600_v45, 0.0  ;;  %v6212_v45 = vld [vmem:[%s7695_s29 + $0x98] sm:$0xff] }
0x1037   :  { %2605 = vadd.xlane.f32.xlu1 %v2604_v38  ;;  %v2601_v46 = vsel %vm258_vm0, %v2599_v50, 0.0  ;;  %v6213_v50 = vld [vmem:[%s7695_s29 + $0xa0] sm:$0xff] }
0x1038   :  { %2602 = vadd.xlane.f32.xlu0 %v2601_v46  ;;  %v7191_v38 = vpack.c.bf16 %v6213_v50, %v6212_v45  ;;  %v6214_v46 = vld [vmem:[%s7695_s29 + $0xa8] sm:$0xff] }
0x1039   :  { %v7197_v48 = vpack.c.bf16 %v6215_v47, %v6214_v46 }
0x10c4   :  { %v2606_v2 = vpop.xlane.xlu1 %2605 }
0x10c5   :  { %v2608_v4 = vmul.f32 0.025, %v2606_v2  ;;  %v2603_v5 = vpop.xlane.xlu0 %2602 }
0x10c6   :  { %v2607_v7 = vmul.f32 0.025, %v2603_v5 }
0x10c7   :  { %v2610_v9 = vadd.f32 1e-05, %v2608_v4 }
0x10c8   :  { %v2609_v11 = vadd.f32 1e-05, %v2607_v7  ;;  %v6218_v7 = vld [vmem:[%s7695_s29 + $0xc8] sm:$0xff] }
0x10c9   :  { %7469 = vrsqrt.f32 %v2610_v9  ;;  %v6219_v9 = vld [vmem:[%s7695_s29 + $0xd0] sm:$0xff] }
0x10ca   :  { %7471 = vrsqrt.f32 %v2609_v11  ;;  %v7209_v11 = vpack.c.bf16 %v6219_v9, %v6218_v7 }
0x10d3   :  { %v7470_v13 = vpop.eup %7469 }
0x10d4   :  { %v7472_v15 = vpop.eup %7471  ;;  %v2614_v16 = vmul.f32 %v7470_v13, %v2598_v43  ;;  %v6211_v43 = vld [vmem:[%s7695_s29 + $0x90] sm:$0xff]  ;;  %v6220_v13 = vld [vmem:[%s7695_s29 + $0xd8] sm:$0xff] }
0x10d5   :  { %v2613_v17 = vmul.f32 %v7472_v15, %v2597_v44  ;;  %v7185_v44 = vpack.c.bf16 %v6211_v43, %v6210_v41 }
0x10d6   :  { %v2622_v19 = vmul.f32 %v6185_v14, %v2614_v16  ;;  %v6222_v16 = vld [vmem:[%s7695_s29 + $0xe8] sm:$0xff] }
0x10d7   :  { %v2621_v20 = vmul.f32 %v6185_v14, %v2613_v17  ;;  %v6221_v14 = vld [vmem:[%s7695_s29 + $0xe0] sm:$0xff]  ;;  %s8858_s29 = smov 104  }
0x10d8   :  { %v2630_v22 = vadd.f32 %v6186_v18, %v2622_v19  ;;  %v7215_v15 = vpack.c.bf16 %v6221_v14, %v6220_v13 }
0x10d9   :  { %v2629_v21 = vadd.f32 %v6186_v18, %v2621_v20 }
0x10db   :  { %6806 = vmatprep.mubr.msk.f32.mxu0 %vm258_vm0, %v2629_v21 }
0x10dc   :  { %6807 = vmatmul.mubr.msk.f32.vlgmr.msra.gmra.mrb[10].mxu0 %vm258_vm0, %v2630_v22 }
0x10dd   :  { %7184 = vmatpush3.bf16.xpose.msk.msra.mxu0 %vm7847_vm1, %v7179_v42 }
0x10de   :  { %7187 = vmatprep.subr.msk.bf16.mxu0 %vm7847_vm1, %v7185_v44 }
0x10e5   :  { %7190 = vmatpush3.bf16.xpose.msk.msra.mxu0 %vm7847_vm1, %v7185_v44 }
0x10e6   :  { %7193 = vmatprep.subr.msk.bf16.mxu0 %vm7847_vm1, %v7191_v38 }
0x10ed   :  { %7196 = vmatpush3.bf16.xpose.msk.msra.mxu0 %vm7847_vm1, %v7191_v38 }
0x10ee   :  { %7199 = vmatprep.subr.msk.bf16.mxu0 %vm7847_vm1, %v7197_v48 }
0x10f5   :  { %7202 = vmatpush3.bf16.xpose.msk.msra.mxu0 %vm7847_vm1, %v7197_v48 }
0x10f6   :  { %7205 = vmatprep.subr.msk.bf16.mxu0 %vm7847_vm1, %v7203_v54 }
0x10fd   :  { %7208 = vmatpush3.bf16.xpose.msk.msra.mxu0 %vm7847_vm1, %v7203_v54 }
0x10fe   :  { %7211 = vmatprep.subr.msk.bf16.mxu0 %vm7847_vm1, %v7209_v11 }
0x1105   :  { %7214 = vmatpush3.bf16.xpose.msk.msra.mxu0 %vm7847_vm1, %v7209_v11 }
0x1106   :  { %7217 = vmatprep.subr.msk.bf16.mxu0 %vm7847_vm1, %v7215_v15 }
0x110d   :  { %7220 = vmatpush3.bf16.xpose.msk.msra.mxu0 %vm7847_vm1, %v7215_v15 }
0x110e   :  { %6850 = vmatprep.subr.msk.mxu0 %vm258_vm0, %v6222_v16 }
0x1115   :  { %6851 = vmatpush3.xpose.msk.msra.mxu0 %vm258_vm0, %v6222_v16 }
0x1116   :  { %6925 = vmatprep.subr.mxu0 %v7636_v8 }
0x11af   :  { %v6808_v28 = vpop.f32.mrb[10].mxu0 }
0x11b0   :  { %v2748_v25 = vadd.f32 %v6808_v28, %v6187_v26  ;;  %v2742_v29 = vpop.f32.mrb[11].mxu0 }
0x11b1   :  { %v2743_v30 = vadd.f32 %v6187_v26, %v2742_v29  ;;  %v6206_v26 = vld [vmem:[%s8856_s1] ss:$0 sm:$0xff] }
0x11b2   :  { %v2752_v32 = vmax.f32 %v2748_v25, 0.0 }
0x11b3   :  { %v2751_v31 = vmax.f32 %v2743_v30, 0.0  ;;  %v6207_v30 = vld [vmem:[%s8857_s28] ss:$0 sm:$0xff] }
0x11b5   :  { %6819 = vmatprep.mubr.msk.f32.mxu1 %vm2765_vm8, %v2751_v31 }
0x11b6   :  { %6820 = vmatmul.mubr.msk.f32.vlgmr.msra.gmra.mrb[42].mxu1 %vm2765_vm8, %v2752_v32 }
0x11b7   :  { %6857 = vmatprep.mubr.msk.f32.mxu1 %vm7635_vm2, %v7636_v8 }
0x1289   :  { %v6821_v33 = vpop.f32.mrb[42].mxu1 }
0x128a   :  { %v2859_v34 = vadd.f32 %v6821_v33, %v6198_v27  ;;  %v2853_v35 = vpop.f32.mrb[43].mxu1 }
0x128b   :  { %v2854_v36 = vadd.f32 %v6198_v27, %v2853_v35 }
0x128c   :  { %v2863_v49 = vadd.f32 %v2859_v34, %v2630_v22  ;;  %v6230_v34 = vld [vmem:[%s7700_s3 + $0x1] ss:$0 sm:$0xff]  ;;  %s8859_s3 = smov 24  }
0x128d   :  { %v2862_v37 = vadd.f32 %v2854_v36, %v2629_v21 }
0x128e   :  { %v2869_v62 = vsel %vm258_vm0, %v2863_v49, 0.0 }
0x128f   :  { %2870 = vadd.xlane.f32.xlu1 %v2869_v62  ;;  %v2866_v0 = vsel %vm258_vm0, %v2862_v37, 0.0 }
0x1290   :  { %2867 = vadd.xlane.f32.xlu0 %v2866_v0 }
0x131c   :  { %v2871_v56 = vpop.xlane.xlu1 %2870 }
0x131d   :  { %v2873_v58 = vmul.f32 0.025, %v2871_v56  ;;  %v2868_v10 = vpop.xlane.xlu0 %2867 }
0x131e   :  { %v2872_v59 = vmul.f32 0.025, %v2868_v10 }
0x131f   :  { %v2875_v60 = vsub.f32 %v2863_v49, %v2873_v58 }
0x1320   :  { %v2874_v1 = vsub.f32 %v2862_v37, %v2872_v59 }
0x1321   :  { %v2877_v53 = vmul.f32 %v2875_v60, %v2875_v60 }
0x1322   :  { %v2876_v2 = vmul.f32 %v2874_v1, %v2874_v1 }
0x1323   :  { %v2881_v4 = vsel %vm258_vm0, %v2877_v53, 0.0 }
0x1324   :  { %2882 = vadd.xlane.f32.xlu1 %v2881_v4  ;;  %v2878_v5 = vsel %vm258_vm0, %v2876_v2, 0.0 }
0x1325   :  { %2879 = vadd.xlane.f32.xlu0 %v2878_v5 }
0x13b1   :  { %v2883_v17 = vpop.xlane.xlu1 %2882 }
0x13b2   :  { %v2885_v18 = vmul.f32 0.025, %v2883_v17  ;;  %v2880_v19 = vpop.xlane.xlu0 %2879 }
0x13b3   :  { %v2884_v20 = vmul.f32 0.025, %v2880_v19 }
0x13b4   :  { %v2887_v21 = vadd.f32 1e-05, %v2885_v18 }
0x13b5   :  { %v2886_v22 = vadd.f32 1e-05, %v2884_v20 }
0x13b6   :  { %7473 = vrsqrt.f32 %v2887_v21 }
0x13b7   :  { %7475 = vrsqrt.f32 %v2886_v22 }
0x13c0   :  { %v7474_v24 = vpop.eup %7473 }
0x13c1   :  { %v7476_v28 = vpop.eup %7475  ;;  %v2891_v25 = vmul.f32 %v7474_v24, %v2875_v60 }
0x13c2   :  { %v2890_v29 = vmul.f32 %v7476_v28, %v2874_v1 }
0x13c3   :  { %v2899_v31 = vmul.f32 %v6206_v26, %v2891_v25 }
0x13c4   :  { %v2898_v32 = vmul.f32 %v6206_v26, %v2890_v29 }
0x13c5   :  { %v8333_v33 = vadd.f32 %v6207_v30, %v2899_v31 }
0x13c6   :  { %v8331_v27 = vadd.f32 %v6207_v30, %v2898_v32 }
0x13c8   :  { %6852 = vmatprep.mubr.msk.f32.mxu0 %vm258_vm0, %v8331_v27 }
0x13c9   :  { %6853 = vmatmul.mubr.msk.f32.vlgmr.msra.gmra.mrb[12].mxu0 %vm258_vm0, %v8333_v33 }
0x13ca   :  { %6927 = vmatprep.mubr.msk.f32.mxu0 %vm7635_vm2, %v7636_v8 }
0x149c   :  { %v6854_v35 = vpop.f32.mrb[12].mxu0 }
0x149d   :  { %v8342_v36 = vadd.f32 %v6854_v35, %v6230_v34  ;;  %v3057_v49 = vpop.f32.mrb[13].mxu0 }
0x149e   :  { %v8344_v37 = vadd.f32 %v6230_v34, %v3057_v49 }
0x149f   :  { %3144 = vrot.lane.b32.xlu1 %v8342_v36, %s7637_s0 }
0x14a0   :  { %3067 = vrot.lane.b32.xlu0 %v8344_v37, %s7637_s0  ;;  %s8860_s0 = smov 56  }
0x1511   :  { %v3145_v0 = vpop.permute.xlu1 %3144 }
0x1512   :  { %v3068_v62 = vpop.permute.xlu0 %3067 }
0x1513   :  { %6856 = vmatpush3.xpose.msk.msra.mxu1 %vm503_vm5, %v3068_v62 }
0x1514   :  { %6860 = vmatprep.subr.mxu1 %v7636_v8 }
0x1516   :  { %6858 = vmatmul.mubr.msk.f32.vlgmr.msra.gmra.mrb[44].mxu1 %vm503_vm5, %v8344_v37 }
0x1517   :  { %6861 = vmatpush3.xpose.msk.msra.mxu1 %vm503_vm5, %v3145_v0  ;;  %6862 = vmatprep.mubr.msk.f32.mxu1 %vm7635_vm2, %v7636_v8 }
0x1518   :  { %6865 = vmatprep.subr.mxu1 %v7636_v8 }
0x151a   :  { %6863 = vmatmul.mubr.msk.f32.vlgmr.msra.gmra.mrb[46].mxu1 %vm503_vm5, %v8342_v36 }
0x151b   :  { %6867 = vmatprep.mubr.msk.f32.mxu1 %vm7635_vm2, %v7636_v8 }
0x15e9   :  { %v3139_v39 = vpop.f32.mrb[44].mxu1 }
0x15ea   :  { %v3220_v40 = vmul.f32 0.35355338, %v3139_v39  ;;  %v6859_v41 = vpop.f32.mrb[45].mxu1 }
0x15ec   :  { %v3222_v42 = vsel %vm503_vm5, %v3220_v40, -inf }
0x15ed   :  { %3223 = vmax.xlane.f32.xlu1 %v3222_v42  ;;  %v3216_v43 = vpop.f32.mrb[46].mxu1 }
0x15ee   :  { %v3221_v44 = vmul.f32 0.35355338, %v3216_v43  ;;  %v6864_v45 = vpop.f32.mrb[47].mxu1 }
0x15f0   :  { %v3225_v50 = vsel %vm503_vm5, %v3221_v44, -inf }
0x15f1   :  { %3226 = vmax.xlane.f32.xlu0 %v3225_v50 }
0x15fe   :  { %3320 = vrot.lane.b32.xlu1 %v8342_v36, %s7638_s5 }
0x1602   :  { %3398 = vrot.lane.b32.xlu1 %v8344_v37, %s7639_s9 }
0x167a   :  { %v3224_v38 = vpop.xlane.xlu1 %3223 }
0x167b   :  { %v3228_v46 = vsub.f32 %v3220_v40, %v3224_v38 }
0x167d   :  { %v3230_v47 = vmul.f32 1.442695, %v3228_v46 }
0x167e   :  { %v3227_v48 = vpop.xlane.xlu0 %3226  ;;  %v3321_v59 = vpop.permute.xlu1 %3320 }
0x167f   :  { %7477 = vpow2.f32 %v3230_v47  ;;  %v3229_v51 = vsub.f32 %v3221_v44, %v3227_v48 }
0x1681   :  { %v3232_v52 = vmul.f32 1.442695, %v3229_v51 }
0x1682   :  { %v3399_v60 = vpop.permute.xlu1 %3398 }
0x1683   :  { %7479 = vpow2.f32 %v3232_v52 }
0x1689   :  { %v7478_v54 = vpop.eup %7477 }
0x168a   :  { %v3234_v56 = vsel %vm503_vm5, %v7478_v54, 0.0 }
0x168b   :  { %3235 = vadd.xlane.f32.xlu0 %v3234_v56 }
0x168d   :  { %v7480_v58 = vpop.eup %7479 }
0x168e   :  { %v3237_v10 = vsel %vm503_vm5, %v7480_v58, 0.0 }
0x168f   :  { %3238 = vadd.xlane.f32.xlu1 %v3237_v10 }
0x16a0   :  { %3476 = vrot.lane.b32.xlu1 %v8342_v36, %s7639_s9  ;;  %s8861_s9 = smov 96  }
0x16a1   :  { %3244 = vrot.lane.b32.xlu0 %v8344_v37, %s7638_s5 }
0x16a5   :  { %3396 = vrot.lane.b32.xlu0 %v8344_v37, %s7640_s13 }
0x16a9   :  { %3474 = vrot.lane.b32.xlu0 %v8342_v36, %s7640_s13  ;;  %s8862_s13 = smov 16  }
0x1718   :  { %v3236_v1 = vpop.xlane.xlu0 %3235 }
0x1719   :  { %7481 = vrcp.f32 %v3236_v1 }
0x171c   :  { %v3239_v53 = vpop.xlane.xlu1 %3238  ;;  %v3245_v2 = vpop.permute.xlu0 %3244 }
0x171d   :  { %7483 = vrcp.f32 %v3239_v53  ;;  %6866 = vmatpush3.msra.mxu1 %v3245_v2 }
0x171e   :  { %6870 = vmatprep.subr.mxu1 %v7636_v8 }
0x1720   :  { %v3397_v11 = vpop.permute.xlu0 %3396  ;;  %v3477_v13 = vpop.permute.xlu1 %3476 }
0x1723   :  { %v7482_v4 = vpop.eup %7481 }
0x1724   :  { %v3242_v5 = vmul.f32 %v7482_v4, %v7478_v54  ;;  %v3475_v14 = vpop.permute.xlu0 %3474 }
0x1726   :  { %6868 = vmatmul.mubr.msk.f32.vlgmr.msra.gmra.mrb[48].mxu1 %vm503_vm5, %v3242_v5 }
0x1727   :  { %v7484_v7 = vpop.eup %7483  ;;  %6871 = vmatpush3.msra.mxu1 %v3321_v59  ;;  %6872 = vmatprep.mubr.msk.f32.mxu1 %vm7635_vm2, %v7636_v8 }
0x1728   :  { %v3243_v9 = vmul.f32 %v7484_v7, %v7480_v58  ;;  %6875 = vmatprep.subr.mxu1 %v7636_v8 }
0x172a   :  { %6873 = vmatmul.mubr.msk.f32.vlgmr.msra.gmra.mrb[50].mxu1 %vm503_vm5, %v3243_v9 }
0x172b   :  { %6877 = vmatprep.mubr.msk.f32.mxu1 %vm7635_vm2, %v7636_v8 }
0x172e   :  { %6876 = vmatpush3.xpose.msk.msra.mxu1 %vm503_vm5, %v3399_v60 }
0x172f   :  { %6880 = vmatprep.subr.mxu1 %v7636_v8 }
0x1731   :  { %6878 = vmatmul.mubr.msk.f32.vlgmr.msra.gmra.mrb[52].mxu1 %vm503_vm5, %v3397_v11 }
0x1732   :  { %6881 = vmatpush3.xpose.msk.msra.mxu1 %vm503_vm5, %v3477_v13  ;;  %6882 = vmatprep.mubr.msk.f32.mxu1 %vm7635_vm2, %v7636_v8 }
0x1733   :  { %6885 = vmatprep.subr.mxu1 %v7636_v8 }
0x1735   :  { %6883 = vmatmul.mubr.msk.f32.vlgmr.msra.gmra.mrb[54].mxu1 %vm503_vm5, %v3475_v14 }
0x1736   :  { %6887 = vmatprep.mubr.msk.f32.mxu1 %vm7635_vm2, %v7636_v8 }
0x17f9   :  { %v8396_v15 = vpop.f32.mrb[48].mxu1 }
0x17fa   :  { %v6869_v16 = vpop.f32.mrb[49].mxu1 }
0x17fd   :  { %v8398_v17 = vpop.f32.mrb[50].mxu1 }
0x17fe   :  { %v6874_v18 = vpop.f32.mrb[51].mxu1 }
0x1804   :  { %v3470_v19 = vpop.f32.mrb[52].mxu1 }
0x1805   :  { %v3552_v20 = vmul.f32 0.35355338, %v3470_v19  ;;  %v6879_v21 = vpop.f32.mrb[53].mxu1 }
0x1807   :  { %v3554_v22 = vsel %vm503_vm5, %v3552_v20, -inf }
0x1808   :  { %3555 = vmax.xlane.f32.xlu1 %v3554_v22  ;;  %v3548_v24 = vpop.f32.mrb[54].mxu1 }
0x1809   :  { %v3553_v26 = vmul.f32 0.35355338, %v3548_v24  ;;  %v6884_v28 = vpop.f32.mrb[55].mxu1 }
0x180b   :  { %v3557_v25 = vsel %vm503_vm5, %v3553_v26, -inf }
0x180c   :  { %3558 = vmax.xlane.f32.xlu0 %v3557_v25 }
0x1819   :  { %3652 = vrot.lane.b32.xlu1 %v8342_v36, %s7641_s17 }
0x181d   :  { %3730 = vrot.lane.b32.xlu1 %v8344_v37, %s7642_s25 }
0x1895   :  { %v3556_v29 = vpop.xlane.xlu1 %3555 }
0x1896   :  { %v3560_v30 = vsub.f32 %v3552_v20, %v3556_v29 }
0x1898   :  { %v3562_v31 = vmul.f32 1.442695, %v3560_v30 }
0x1899   :  { %v3559_v32 = vpop.xlane.xlu0 %3558  ;;  %v3653_v40 = vpop.permute.xlu1 %3652 }
0x189a   :  { %7485 = vpow2.f32 %v3562_v31  ;;  %v3561_v34 = vsub.f32 %v3553_v26, %v3559_v32 }
0x189c   :  { %v3564_v35 = vmul.f32 1.442695, %v3561_v34 }
0x189d   :  { %v3731_v41 = vpop.permute.xlu1 %3730 }
0x189e   :  { %7487 = vpow2.f32 %v3564_v35 }
0x18a4   :  { %v7486_v49 = vpop.eup %7485 }
0x18a5   :  { %v3566_v62 = vsel %vm503_vm5, %v7486_v49, 0.0 }
0x18a6   :  { %3567 = vadd.xlane.f32.xlu0 %v3566_v62 }
0x18a8   :  { %v7488_v0 = vpop.eup %7487 }
0x18a9   :  { %v3569_v39 = vsel %vm503_vm5, %v7488_v0, 0.0 }
0x18aa   :  { %3570 = vadd.xlane.f32.xlu1 %v3569_v39 }
0x18bb   :  { %3808 = vrot.lane.b32.xlu1 %v8342_v36, %s7642_s25 }
0x18bc   :  { %3576 = vrot.lane.b32.xlu0 %v8344_v37, %s7641_s17  ;;  %s8863_s17 = smov 8  }
0x18c0   :  { %3728 = vrot.lane.b32.xlu0 %v8344_v37, %s7643_s22 }
0x18c4   :  { %3806 = vrot.lane.b32.xlu0 %v8342_v36, %s7643_s22 }
0x1933   :  { %v3568_v42 = vpop.xlane.xlu0 %3567 }
0x1934   :  { %7489 = vrcp.f32 %v3568_v42 }
0x1937   :  { %v3571_v43 = vpop.xlane.xlu1 %3570  ;;  %v3577_v44 = vpop.permute.xlu0 %3576 }
0x1938   :  { %7491 = vrcp.f32 %v3571_v43  ;;  %6886 = vmatpush3.msra.mxu1 %v3577_v44 }
0x1939   :  { %6890 = vmatprep.subr.mxu1 %v7636_v8 }
0x193b   :  { %v3729_v47 = vpop.permute.xlu0 %3728  ;;  %v3809_v48 = vpop.permute.xlu1 %3808 }
0x193e   :  { %v7490_v45 = vpop.eup %7489 }
0x193f   :  { %v3574_v50 = vmul.f32 %v7490_v45, %v7486_v49  ;;  %v3807_v51 = vpop.permute.xlu0 %3806 }
0x1941   :  { %6888 = vmatmul.mubr.msk.f32.vlgmr.msra.gmra.mrb[56].mxu1 %vm503_vm5, %v3574_v50 }
0x1942   :  { %v7492_v38 = vpop.eup %7491  ;;  %6891 = vmatpush3.msra.mxu1 %v3653_v40  ;;  %6892 = vmatprep.mubr.msk.f32.mxu1 %vm7635_vm2, %v7636_v8 }
0x1943   :  { %v3575_v46 = vmul.f32 %v7492_v38, %v7488_v0  ;;  %6895 = vmatprep.subr.mxu1 %v7636_v8 }
0x1945   :  { %6893 = vmatmul.mubr.msk.f32.vlgmr.msra.gmra.mrb[58].mxu1 %vm503_vm5, %v3575_v46 }
0x1946   :  { %6897 = vmatprep.mubr.msk.f32.mxu1 %vm7635_vm2, %v7636_v8 }
0x1949   :  { %6896 = vmatpush3.xpose.msk.msra.mxu1 %vm503_vm5, %v3731_v41 }
0x194a   :  { %6900 = vmatprep.subr.mxu1 %v7636_v8 }
0x194c   :  { %6898 = vmatmul.mubr.msk.f32.vlgmr.msra.gmra.mrb[60].mxu1 %vm503_vm5, %v3729_v47 }
0x194d   :  { %6901 = vmatpush3.xpose.msk.msra.mxu1 %vm503_vm5, %v3809_v48  ;;  %6902 = vmatprep.mubr.msk.f32.mxu1 %vm7635_vm2, %v7636_v8 }
0x194e   :  { %6905 = vmatprep.subr.mxu1 %v7636_v8 }
0x1950   :  { %6903 = vmatmul.mubr.msk.f32.vlgmr.msra.gmra.mrb[62].mxu1 %vm503_vm5, %v3807_v51 }
0x1951   :  { %6907 = vmatprep.mubr.msk.f32.mxu1 %vm7635_vm2, %v7636_v8 }
0x1a14   :  { %v8434_v52 = vpop.f32.mrb[56].mxu1 }
0x1a15   :  { %v6889_v54 = vpop.f32.mrb[57].mxu1 }
0x1a18   :  { %v8436_v56 = vpop.f32.mrb[58].mxu1 }
0x1a19   :  { %v6894_v58 = vpop.f32.mrb[59].mxu1 }
0x1a1f   :  { %v3802_v10 = vpop.f32.mrb[60].mxu1 }
0x1a20   :  { %v3884_v59 = vmul.f32 0.35355338, %v3802_v10  ;;  %v6899_v60 = vpop.f32.mrb[61].mxu1 }
0x1a22   :  { %v3886_v1 = vsel %vm503_vm5, %v3884_v59, -inf }
0x1a23   :  { %3887 = vmax.xlane.f32.xlu1 %v3886_v1  ;;  %v3880_v53 = vpop.f32.mrb[62].mxu1 }
0x1a24   :  { %v3885_v2 = vmul.f32 0.35355338, %v3880_v53  ;;  %v6904_v4 = vpop.f32.mrb[63].mxu1 }
0x1a26   :  { %v3889_v5 = vsel %vm503_vm5, %v3885_v2, -inf }
0x1a27   :  { %3890 = vmax.xlane.f32.xlu0 %v3889_v5 }
0x1a34   :  { %3984 = vrot.lane.b32.xlu1 %v8342_v36, %s7644_s23 }
0x1a38   :  { %4062 = vrot.lane.b32.xlu1 %v8344_v37, %s7645_s26 }
0x1ab0   :  { %v3888_v7 = vpop.xlane.xlu1 %3887 }
0x1ab1   :  { %v3892_v9 = vsub.f32 %v3884_v59, %v3888_v7 }
0x1ab3   :  { %v3894_v11 = vmul.f32 1.442695, %v3892_v9 }
0x1ab4   :  { %v3891_v13 = vpop.xlane.xlu0 %3890  ;;  %v3985_v22 = vpop.permute.xlu1 %3984 }
0x1ab5   :  { %7493 = vpow2.f32 %v3894_v11  ;;  %v3893_v14 = vsub.f32 %v3885_v2, %v3891_v13 }
0x1ab7   :  { %v3896_v16 = vmul.f32 1.442695, %v3893_v14 }
0x1ab8   :  { %v4063_v24 = vpop.permute.xlu1 %4062 }
0x1ab9   :  { %7495 = vpow2.f32 %v3896_v16 }
0x1abf   :  { %v7494_v18 = vpop.eup %7493 }
0x1ac0   :  { %v3898_v19 = vsel %vm503_vm5, %v7494_v18, 0.0 }
0x1ac1   :  { %3899 = vadd.xlane.f32.xlu0 %v3898_v19 }
0x1ac3   :  { %v7496_v20 = vpop.eup %7495 }
0x1ac4   :  { %v3901_v21 = vsel %vm503_vm5, %v7496_v20, 0.0 }
0x1ac5   :  { %3902 = vadd.xlane.f32.xlu1 %v3901_v21 }
0x1ad6   :  { %4140 = vrot.lane.b32.xlu1 %v8342_v36, %s7645_s26 }
0x1ad7   :  { %3908 = vrot.lane.b32.xlu0 %v8344_v37, %s7644_s23 }
0x1adb   :  { %4060 = vrot.lane.b32.xlu0 %v8344_v37, %s8858_s29 }
0x1adf   :  { %4138 = vrot.lane.b32.xlu0 %v8342_v36, %s8858_s29 }
0x1b4e   :  { %v3900_v26 = vpop.xlane.xlu0 %3899 }
0x1b4f   :  { %7497 = vrcp.f32 %v3900_v26 }
0x1b52   :  { %v3903_v28 = vpop.xlane.xlu1 %3902  ;;  %v3909_v25 = vpop.permute.xlu0 %3908 }
0x1b53   :  { %7499 = vrcp.f32 %v3903_v28  ;;  %6906 = vmatpush3.msra.mxu1 %v3909_v25 }
0x1b54   :  { %6910 = vmatprep.subr.mxu1 %v7636_v8 }
0x1b56   :  { %v4061_v34 = vpop.permute.xlu0 %4060  ;;  %v4141_v35 = vpop.permute.xlu1 %4140 }
0x1b59   :  { %v7498_v29 = vpop.eup %7497 }
0x1b5a   :  { %v3906_v30 = vmul.f32 %v7498_v29, %v7494_v18  ;;  %v4139_v49 = vpop.permute.xlu0 %4138 }
0x1b5c   :  { %6908 = vmatmul.mubr.msk.f32.vlgmr.msra.gmra.mrb[64].mxu1 %vm503_vm5, %v3906_v30 }
0x1b5d   :  { %v7500_v31 = vpop.eup %7499  ;;  %6911 = vmatpush3.msra.mxu1 %v3985_v22  ;;  %6912 = vmatprep.mubr.msk.f32.mxu1 %vm7635_vm2, %v7636_v8 }
0x1b5e   :  { %v3907_v32 = vmul.f32 %v7500_v31, %v7496_v20  ;;  %6915 = vmatprep.subr.mxu1 %v7636_v8 }
0x1b60   :  { %6913 = vmatmul.mubr.msk.f32.vlgmr.msra.gmra.mrb[66].mxu1 %vm503_vm5, %v3907_v32 }
0x1b61   :  { %6917 = vmatprep.mubr.msk.f32.mxu1 %vm7635_vm2, %v7636_v8 }
0x1b64   :  { %6916 = vmatpush3.xpose.msk.msra.mxu1 %vm503_vm5, %v4063_v24 }
0x1b65   :  { %6920 = vmatprep.subr.mxu1 %v7636_v8 }
0x1b67   :  { %6918 = vmatmul.mubr.msk.f32.vlgmr.msra.gmra.mrb[68].mxu1 %vm503_vm5, %v4061_v34 }
0x1b68   :  { %6921 = vmatpush3.xpose.msk.msra.mxu1 %vm503_vm5, %v4141_v35  ;;  %6922 = vmatprep.mubr.msk.f32.mxu1 %vm7635_vm2, %v7636_v8 }
0x1b69   :  { %6930 = vmatprep.subr.mxu1 %v7636_v8 }
0x1b6b   :  { %6923 = vmatmul.mubr.msk.f32.vlgmr.msra.gmra.mrb[70].mxu1 %vm503_vm5, %v4139_v49 }
0x1b6c   :  { %6932 = vmatprep.mubr.msk.f32.mxu1 %vm7635_vm2, %v7636_v8 }
0x1c2f   :  { %v8472_v62 = vpop.f32.mrb[64].mxu1 }
0x1c30   :  { %v6909_v0 = vpop.f32.mrb[65].mxu1 }
0x1c33   :  { %v8474_v39 = vpop.f32.mrb[66].mxu1 }
0x1c34   :  { %v6914_v40 = vpop.f32.mrb[67].mxu1 }
0x1c3a   :  { %v4134_v41 = vpop.f32.mrb[68].mxu1 }
0x1c3b   :  { %v4216_v42 = vmul.f32 0.35355338, %v4134_v41  ;;  %v6919_v43 = vpop.f32.mrb[69].mxu1 }
0x1c3d   :  { %v4218_v44 = vsel %vm503_vm5, %v4216_v42, -inf }
0x1c3e   :  { %4219 = vmax.xlane.f32.xlu1 %v4218_v44  ;;  %v4212_v45 = vpop.f32.mrb[70].mxu1 }
0x1c3f   :  { %v4217_v50 = vmul.f32 0.35355338, %v4212_v45  ;;  %v6924_v38 = vpop.f32.mrb[71].mxu1 }
0x1c41   :  { %v4221_v46 = vsel %vm503_vm5, %v4217_v50, -inf }
0x1c42   :  { %4222 = vmax.xlane.f32.xlu0 %v4221_v46 }
0x1c4f   :  { %4316 = vrot.lane.b32.xlu1 %v8342_v36, %s8859_s3 }
0x1c53   :  { %4394 = vrot.lane.b32.xlu1 %v8344_v37, %s8860_s0 }
0x1c58   :  { %4240 = vrot.lane.b32.xlu0 %v8344_v37, %s8859_s3 }
0x1ccb   :  { %v4220_v47 = vpop.xlane.xlu1 %4219 }
0x1ccc   :  { %v4224_v48 = vsub.f32 %v4216_v42, %v4220_v47  ;;  %v6291_v47 = vld [vmem:[%s7715_s19 + $0xd0] sm:$0xff] }
0x1cce   :  { %v4226_v51 = vmul.f32 1.442695, %v4224_v48 }
0x1ccf   :  { %v4317_v54 = vpop.permute.xlu1 %4316  ;;  %v4223_v58 = vpop.xlane.xlu0 %4222 }
0x1cd0   :  { %7501 = vpow2.f32 %v4226_v51  ;;  %v4225_v10 = vsub.f32 %v4217_v50, %v4223_v58  ;;  %6931 = vmatpush3.msra.mxu1 %v4317_v54  ;;  %v6292_v58 = vld [vmem:[%s7715_s19 + $0xd8] sm:$0xff] }
0x1cd1   :  { %6940 = vmatprep.subr.mxu1 %v7636_v8 }
0x1cd2   :  { %v4228_v59 = vmul.f32 1.442695, %v4225_v10  ;;  %v6293_v10 = vld [vmem:[%s7715_s19 + $0xe0] sm:$0xff] }
0x1cd3   :  { %v4241_v60 = vpop.permute.xlu0 %4240  ;;  %v4395_v5 = vpop.permute.xlu1 %4394 }
0x1cd4   :  { %7503 = vpow2.f32 %v4228_v59  ;;  %6926 = vmatpush3.msra.mxu0 %v4241_v60  ;;  %v7238_v59 = vpack.c.bf16 %v6293_v10, %v6292_v58  ;;  %v6294_v60 = vld [vmem:[%s7715_s19 + $0xe8] sm:$0xff] }
0x1cd5   :  { %6935 = vmatprep.subr.mxu0 %v7636_v8 }
0x1cda   :  { %v7502_v1 = vpop.eup %7501 }
0x1cdb   :  { %v4230_v53 = vsel %vm503_vm5, %v7502_v1, 0.0 }
0x1cdc   :  { %4231 = vadd.xlane.f32.xlu0 %v4230_v53  ;;  %v6225_v53 = vld [vmem:[%s7705_s8 + $0x30] sm:$0xff] }
0x1cde   :  { %v7504_v2 = vpop.eup %7503 }
0x1cdf   :  { %v4233_v4 = vsel %vm503_vm5, %v7504_v2, 0.0 }
0x1ce0   :  { %4234 = vadd.xlane.f32.xlu1 %v4233_v4 }
0x1cf1   :  { %4392 = vrot.lane.b32.xlu1 %v8344_v37, %s8861_s9 }
0x1cf2   :  { %4472 = vrot.lane.b32.xlu0 %v8342_v36, %s8860_s0 }
0x1cf6   :  { %4470 = vrot.lane.b32.xlu0 %v8342_v36, %s8861_s9 }
0x1d69   :  { %v4232_v7 = vpop.xlane.xlu0 %4231 }
0x1d6a   :  { %7505 = vrcp.f32 %v4232_v7 }
0x1d6d   :  { %v4235_v9 = vpop.xlane.xlu1 %4234  ;;  %v4473_v16 = vpop.permute.xlu0 %4472 }
0x1d6e   :  { %7507 = vrcp.f32 %v4235_v9 }
0x1d71   :  { %v4393_v19 = vpop.permute.xlu1 %4392  ;;  %v4471_v20 = vpop.permute.xlu0 %4470 }
0x1d74   :  { %v7506_v11 = vpop.eup %7505 }
0x1d75   :  { %v4238_v13 = vmul.f32 %v7506_v11, %v7502_v1  ;;  %v6224_v1 = vld [vmem:[%s7705_s8 + $0x28] sm:$0xff]  ;;  %v6302_v11 = vld [vmem:[%s7720_s24 + $0x1] ss:$0 sm:$0xff]  ;;  %s8867_s24 = sld [smem:[#allocation23_spill]] }
0x1d76   :  { %v7221_v4 = vpack.c.bf16 %v6225_v53, %v6224_v1 }
0x1d77   :  { %6928 = vmatmul.mubr.msk.f32.vlgmr.msra.gmra.mrb[14].mxu0 %vm503_vm5, %v4238_v13 }
0x1d78   :  { %v7508_v14 = vpop.eup %7507  ;;  %6936 = vmatpush3.xpose.msk.msra.mxu0 %vm503_vm5, %v4395_v5  ;;  %6937 = vmatprep.mubr.msk.f32.mxu0 %vm7635_vm2, %v7636_v8  ;;  %v6227_v5 = vld [vmem:[%s7705_s8 + $0x40] sm:$0xff] }
0x1d79   :  { %v4239_v18 = vmul.f32 %v7508_v14, %v7504_v2  ;;  %6945 = vmatprep.subr.mxu0 %v7636_v8  ;;  %v6226_v2 = vld [vmem:[%s7705_s8 + $0x38] sm:$0xff]  ;;  %s8864_s8 = sld [smem:[#allocation19_spill]] }
0x1d7a   :  { %v7227_v7 = vpack.c.bf16 %v6227_v5, %v6226_v2 }
0x1d7b   :  { %6933 = vmatmul.mubr.msk.f32.vlgmr.msra.gmra.mrb[72].mxu1 %vm503_vm5, %v4239_v18  ;;  %6938 = vmatmul.mubr.msk.f32.vlgmr.msra.gmra.mrb[16].mxu0 %vm503_vm5, %v4393_v19 }
0x1d7c   :  { %6941 = vmatpush3.xpose.msk.msra.mxu1 %vm503_vm5, %v4473_v16  ;;  %6942 = vmatprep.mubr.msk.f32.mxu1 %vm7635_vm2, %v7636_v8 }
0x1d7d   :  { %6950 = vmatprep.subr.mxu1 %v7636_v8  ;;  %6947 = vmatprep.mubr.msk.f32.mxu0 %vm7635_vm2, %v7636_v8 }
0x1d7f   :  { %6943 = vmatmul.mubr.msk.f32.vlgmr.msra.gmra.mrb[74].mxu1 %vm503_vm5, %v4471_v20 }
0x1d80   :  { %6952 = vmatprep.mubr.msk.f32.mxu1 %vm7635_vm2, %v7636_v8 }
0x1e4a   :  { %v4312_v21 = vpop.f32.mrb[14].mxu0 }
0x1e4b   :  { %v6929_v22 = vpop.f32.mrb[15].mxu0 }
0x1e4e   :  { %v4388_v24 = vpop.f32.mrb[72].mxu1  ;;  %v4466_v26 = vpop.f32.mrb[16].mxu0 }
0x1e4f   :  { %v4548_v28 = vmul.f32 0.35355338, %v4466_v26  ;;  %v6934_v25 = vpop.f32.mrb[73].mxu1  ;;  %v6939_v29 = vpop.f32.mrb[17].mxu0 }
0x1e51   :  { %v4550_v30 = vsel %vm503_vm5, %v4548_v28, -inf }
0x1e52   :  { %4551 = vmax.xlane.f32.xlu1 %v4550_v30  ;;  %v4544_v31 = vpop.f32.mrb[74].mxu1 }
0x1e53   :  { %v4549_v32 = vmul.f32 0.35355338, %v4544_v31  ;;  %v6944_v34 = vpop.f32.mrb[75].mxu1  ;;  %v6296_v31 = vld [vmem:[%s7725_s30 + $0x28] sm:$0xff] }
0x1e55   :  { %v4553_v35 = vsel %vm503_vm5, %v4549_v32, -inf }
0x1e56   :  { %4554 = vmax.xlane.f32.xlu0 %v4553_v35 }
0x1edf   :  { %v4552_v49 = vpop.xlane.xlu1 %4551 }
0x1ee0   :  { %v4556_v0 = vsub.f32 %v4548_v28, %v4552_v49 }
0x1ee2   :  { %v4558_v40 = vmul.f32 1.442695, %v4556_v0 }
0x1ee3   :  { %v4555_v41 = vpop.xlane.xlu0 %4554 }
0x1ee4   :  { %7509 = vpow2.f32 %v4558_v40  ;;  %v4557_v42 = vsub.f32 %v4549_v32, %v4555_v41  ;;  %v6297_v32 = vld [vmem:[%s7725_s30 + $0x30] sm:$0xff] }
0x1ee5   :  { %v7242_v49 = vpack.c.bf16 %v6297_v32, %v6296_v31 }
0x1ee6   :  { %v4560_v43 = vmul.f32 1.442695, %v4557_v42  ;;  %v6299_v42 = vld [vmem:[%s7725_s30 + $0x40] sm:$0xff] }
0x1ee8   :  { %7511 = vpow2.f32 %v4560_v43 }
0x1eee   :  { %v7510_v44 = vpop.eup %7509 }
0x1eef   :  { %v4562_v45 = vsel %vm503_vm5, %v7510_v44, 0.0 }
0x1ef0   :  { %4563 = vadd.xlane.f32.xlu0 %v4562_v45 }
0x1ef2   :  { %v7512_v50 = vpop.eup %7511 }
0x1ef3   :  { %v4565_v38 = vsel %vm503_vm5, %v7512_v50, 0.0 }
0x1ef4   :  { %4566 = vadd.xlane.f32.xlu1 %v4565_v38  ;;  %v6278_v38 = vld [vmem:[%s7710_s14 + $0x1] ss:$0 sm:$0xff]  ;;  %s8865_s14 = sld [smem:[#allocation20_spill]] }
0x1f05   :  { %4648 = vrot.lane.b32.xlu1 %v8342_v36, %s8862_s13 }
0x1f06   :  { %4572 = vrot.lane.b32.xlu0 %v8344_v37, %s8862_s13 }
0x1f09   :  { %4726 = vrot.lane.b32.xlu1 %v8434_v52, %s8863_s17 }
0x1f0a   :  { %4728 = vrot.lane.b32.xlu0 %v8436_v56, %s8863_s17 }
0x1f0d   :  { %4734 = vrot.lane.b32.xlu1 %v8472_v62, %s8862_s13 }
0x1f0e   :  { %4736 = vrot.lane.b32.xlu0 %v8474_v39, %s8862_s13  ;;  %v6290_v39 = vld [vmem:[%s7715_s19 + $0xc8] sm:$0xff]  ;;  %s8866_s19 = sld [smem:[#allocation21_spill]] }
0x1f0f   :  { %v7234_v51 = vpack.c.bf16 %v6291_v47, %v6290_v39 }
0x1f11   :  { %4742 = vrot.lane.b32.xlu1 %v4312_v21, %s8859_s3 }
0x1f12   :  { %4744 = vrot.lane.b32.xlu0 %v4388_v24, %s8859_s3 }
0x1f7d   :  { %v4564_v36 = vpop.xlane.xlu0 %4563 }
0x1f7e   :  { %7513 = vrcp.f32 %v4564_v36 }
0x1f81   :  { %v4567_v37 = vpop.xlane.xlu1 %4566  ;;  %v4573_v46 = vpop.permute.xlu0 %4572 }
0x1f82   :  { %7515 = vrcp.f32 %v4567_v37  ;;  %6946 = vmatpush3.msra.mxu0 %v4573_v46 }
0x1f83   :  { %7223 = vmatprep.subr.msk.bf16.mxu0 %vm7847_vm1, %v7221_v4 }
0x1f85   :  { %v4649_v52 = vpop.permute.xlu1 %4648  ;;  %v4729_v20 = vpop.permute.xlu0 %4728 }
0x1f86   :  { %6951 = vmatpush3.msra.mxu1 %v4649_v52  ;;  %v4757_v35 = vsel %vm503_vm5, %v8398_v17, %v4729_v20  ;;  %v6298_v17 = vld [vmem:[%s7725_s30 + $0x38] sm:$0xff] }
0x1f87   :  { %7233 = vmatprep.subr.bf16.mxu1 %v7634_v6  ;;  %v7246_v43 = vpack.c.bf16 %v6299_v42, %v6298_v17 }
0x1f88   :  { %v7514_v56 = vpop.eup %7513 }
0x1f89   :  { %v4570_v62 = vmul.f32 %v7514_v56, %v7510_v44  ;;  %v4727_v19 = vpop.permute.xlu1 %4726  ;;  %v4737_v22 = vpop.permute.xlu0 %4736  ;;  %v6300_v44 = vld [vmem:[%s7725_s30 + $0x48] sm:$0xff]  ;;  %s8868_s30 = sld [smem:[#allocation25_spill]] }
0x1f8a   :  { %v4756_v26 = vsel %vm503_vm5, %v8396_v15, %v4727_v19  ;;  %v4759_v15 = vsel %vm156_vm3, %v4757_v35, %v4737_v22  ;;  %v6289_v22 = vld [vmem:[%s8847_s15 + $0x1] ss:$0 sm:$0xff] }
0x1f8b   :  { %6948 = vmatmul.mubr.msk.f32.vlgmr.msra.gmra.mrb[18].mxu0 %vm503_vm5, %v4570_v62 }
0x1f8c   :  { %v7516_v48 = vpop.eup %7515  ;;  %7226 = vmatpush3.bf16.xpose.msk.msra.mxu0 %vm7847_vm1, %v7221_v4 }
0x1f8d   :  { %v4571_v54 = vmul.f32 %v7516_v48, %v7512_v50  ;;  %7229 = vmatprep.subr.msk.bf16.mxu0 %vm7847_vm1, %v7227_v7  ;;  %v4735_v21 = vpop.permute.xlu1 %4734  ;;  %v4745_v25 = vpop.permute.xlu0 %4744 }
0x1f8e   :  { %v4758_v28 = vsel %vm156_vm3, %v4756_v26, %v4735_v21  ;;  %v4761_v0 = vsel %vm2195_vm7, %v4759_v15, %v4745_v25 }
0x1f8f   :  { %6953 = vmatmul.mubr.msk.f32.vlgmr.msra.gmra.mrb[76].mxu1 %vm503_vm5, %v4571_v54  ;;  %vm7327_vm5 = vmpackc.low %vm5835_vm4, %vm5835_vm4 }
0x1f90   :  { %7236 = vmatpush3.bf16.xpose.msk.msra.mxu1 %vm7847_vm1, %v7234_v51  ;;  %6978 = vmatprep.mubr.msk.f32.mxu1 %vm7635_vm2, %v7636_v8 }
0x1f91   :  { %7237 = vmatprep.subr.bf16.mxu1 %v7634_v6  ;;  %v4743_v24 = vpop.permute.xlu1 %4742 }
0x1f92   :  { %v4760_v29 = vsel %vm2195_vm7, %v4758_v28, %v4743_v24  ;;  %vm5668_vm7 = vcmask 785408  }
0x1f94   :  { %7232 = vmatpush3.bf16.xpose.msk.msra.mxu0 %vm7847_vm1, %v7227_v7 }
0x1f95   :  { %6963 = vmatprep.subr.msk.mxu0 %vm258_vm0, %v6228_v55 }
0x1f98   :  { %7240 = vmatpush3.bf16.xpose.msk.msra.mxu1 %vm7847_vm1, %v7238_v59 }
0x1f99   :  { %6976 = vmatprep.subr.mxu1 %v7636_v8 }
0x1f9c   :  { %6964 = vmatpush3.xpose.msk.msra.mxu0 %vm258_vm0, %v6228_v55 }
0x1f9d   :  { %7241 = vmatprep.subr.bf16.mxu0 %v7634_v6 }
0x1fa0   :  { %6977 = vmatpush3.xpose.msk.msra.mxu1 %vm258_vm0, %v6294_v60 }
0x1fa3   :  { %6979 = vmatmul.mubr.msk.f32.vlgmr.msra.gmra.mrb[78].mxu1 %vm258_vm0, %v347_v57 }
0x205e   :  { %v4644_v57 = vpop.f32.mrb[18].mxu0 }
0x205f   :  { %4750 = vrot.lane.b32.xlu1 %v4644_v57, %s7644_s23  ;;  %v6949_v9 = vpop.f32.mrb[19].mxu0  ;;  %v6309_v57 = vld [vmem:[%s7730_s6 + $0x1] ss:$0 sm:$0xff]  ;;  %s8869_s6 = sld [smem:[#allocation22_spill]] }
0x2062   :  { %v4720_v13 = vpop.f32.mrb[76].mxu1 }
0x2063   :  { %4935 = vrot.lane.b32.xlu1 %v6302_v11, %s7638_s5  ;;  %4752 = vrot.lane.b32.xlu0 %v4720_v13, %s7644_s23  ;;  %v6954_v14 = vpop.f32.mrb[77].mxu1  ;;  %s7653_s5 = smov [#allocation4]  }
0x2064   :  { %s6030_s25 = sshll.u32 %s7653_s5, 4  ;;  %s6031_s25 = int_to_ptr.vmem [resolvable:$true] %s6030_s25 }
0x2065   :  { %s7529_s22 = scalar_lea.vmem %s6031_s25, 256  ;;  %p7534_p1 = scmp.lt.s32.totalorder %s6031_s25, %s6031_s25 }
0x2066   :  { %p7530_p0 = scmp.ne.s32.totalorder %s6031_s25, %s7529_s22  ;;  %p7535_p2 = scmp.lt.s32.totalorder %s7529_s22, %s7529_s22 }
0x2068   :  { %p7536_p3 = por %p7535_p2, %p7534_p1 }
0x206a   :  { %p7537_p4 = pnand %p7536_p3, %p7530_p0 }
0x2076   :  { %v5019_v16 = vpop.f32.mrb[78].mxu1 }
0x2077   :  { %v6980_v18 = vpop.f32.mrb[79].mxu1 }
0x2078   :  { %v6288_v18 = vld [vmem:[%s8846_s21 + $0x1] ss:$0 sm:$0xff] }
0x20d1   :  { %v4751_v30 = vpop.permute.xlu1 %4750 }
0x20d2   :  { %v4762_v34 = vsel %vm2198_vm6, %v4760_v29, %v4751_v30 }
0x20d3   :  { %6965 = vmatprep.mubr.msk.f32.mxu0 %vm258_vm0, %v4762_v34 }
0x20d5   :  { %v4753_v40 = vpop.permute.xlu0 %4752  ;;  %v4936_v45 = vpop.permute.xlu1 %4935 }
0x20d6   :  { %v4763_v41 = vsel %vm2198_vm6, %v4761_v0, %v4753_v40  ;;  %v5020_v50 = vadd.f32 %v5019_v16, %v4936_v45  ;;  %v6320_v40 = vld [vmem:[%s8848_s16 + $0x40] sm:$0xff] }
0x20d7   :  { %6966 = vmatmul.mubr.msk.f32.vlgmr.msra.gmra.mrb[20].mxu0 %vm258_vm0, %v4763_v41  ;;  %v6321_v41 = vld [vmem:[%s8848_s16 + $0x48] sm:$0xff] }
0x20d8   :  { %7244 = vmatpush3.bf16.xpose.msk.msra.mxu0 %vm7847_vm1, %v7242_v49  ;;  %6991 = vmatprep.mubr.msk.f32.mxu0 %vm7635_vm2, %v7636_v8 }
0x20d9   :  { %7245 = vmatprep.subr.bf16.mxu0 %v7634_v6 }
0x20e0   :  { %7248 = vmatpush3.bf16.xpose.msk.msra.mxu0 %vm7847_vm1, %v7246_v43 }
0x20e1   :  { %6989 = vmatprep.subr.mxu0 %v7636_v8 }
0x20e8   :  { %6990 = vmatpush3.xpose.msk.msra.mxu0 %vm258_vm0, %v6300_v44 }
0x20eb   :  { %6992 = vmatmul.mubr.msk.f32.vlgmr.msra.gmra.mrb[22].mxu0 %vm258_vm0, %v5020_v50 }
0x21aa   :  { %v6967_v36 = vpop.f32.mrb[20].mxu0 }
0x21ab   :  { %v4863_v37 = vadd.f32 %v6967_v36, %v6278_v38  ;;  %v4857_v46 = vpop.f32.mrb[21].mxu0 }
0x21ac   :  { %v4858_v52 = vadd.f32 %v6278_v38, %v4857_v46  ;;  %v6322_v46 = vld [vmem:[%s8848_s16 + $0x50] sm:$0xff] }
0x21ad   :  { %v4867_v56 = vadd.f32 %v4863_v37, %v8333_v33 }
0x21ae   :  { %v4866_v62 = vadd.f32 %v4858_v52, %v8331_v27  ;;  %v6323_v52 = vld [vmem:[%s8848_s16 + $0x58] sm:$0xff] }
0x21af   :  { %v4875_v39 = vsel %vm258_vm0, %v4867_v56, 0.0 }
0x21b0   :  { %4876 = vadd.xlane.f32.xlu1 %v4875_v39  ;;  %v4872_v47 = vsel %vm258_vm0, %v4866_v62, 0.0  ;;  %v6325_v39 = vld [vmem:[%s8848_s16 + $0x68] sm:$0xff] }
0x21b1   :  { %4873 = vadd.xlane.f32.xlu0 %v4872_v47 }
0x21be   :  { %v5113_v48 = vpop.f32.mrb[22].mxu0 }
0x21bf   :  { %v6993_v51 = vpop.f32.mrb[23].mxu0  ;;  %v5114_v13 = vadd.f32 %v6309_v57, %v5113_v48  ;;  %v6326_v48 = vld [vmem:[%s8848_s16 + $0x70] sm:$0xff]  ;;  %v6318_v57 = vld [vmem:[%s8852_s11 + $0x1] ss:$0 sm:$0xff] }
0x21c0   :  { %v6327_v51 = vld [vmem:[%s8848_s16 + $0x78] sm:$0xff] }
0x21c1   :  { %v5124_v14 = vrot.slane %v5114_v13, %v8208_v12 }
0x21c3   :  { %v5125_v19 = vcombine.high %v5124_v14, %v5124_v14  ;;  %v5132_v20 = vrot.slane %v5124_v14, %v8208_v12 }
0x21c5   :  { %v5139_v28 = vrot.slane %v5125_v19, %v8208_v12  ;;  %v5143_v29 = vrot.slane %v5132_v20, %v8215_v23  ;;  %v7249_v12 = vpack.c.bf16 %v6321_v41, %v6320_v40  ;;  %v6344_v20 = vld [vmem:[%s8849_s18 + $0x48] sm:$0xff] }
0x21c7   :  { %v5147_v15 = vrot.slane %v5139_v28, %v8215_v23  ;;  %7251 = vmatprep.subr.msk.bf16.mxu1 %vm7847_vm1, %v7249_v12 }
0x21c8   :  { %7254 = vmatpush3.bf16.xpose.msk.msra.mxu1 %vm7847_vm1, %v7249_v12 }
0x223d   :  { %v4877_v54 = vpop.xlane.xlu1 %4876 }
0x223e   :  { %v4879_v58 = vmul.f32 0.025, %v4877_v54  ;;  %v4874_v10 = vpop.xlane.xlu0 %4873  ;;  %v7267_v54 = vpack.c.bf16 %v6327_v51, %v6326_v48 }
0x223f   :  { %v4878_v59 = vmul.f32 0.025, %v4874_v10  ;;  %v6341_v10 = vld [vmem:[%s8849_s18 + $0x30] sm:$0xff] }
0x2240   :  { %v4881_v60 = vsub.f32 %v4867_v56, %v4879_v58  ;;  %v7255_v56 = vpack.c.bf16 %v6323_v52, %v6322_v46  ;;  %v6340_v58 = vld [vmem:[%s8849_s18 + $0x28] sm:$0xff]  ;;  %v5482_v52 = vld [vmem:[%s8864_s8 + $0x10] sm:$0xff] }
0x2241   :  { %v4880_v1 = vsub.f32 %v4866_v62, %v4878_v59  ;;  %v6324_v62 = vld [vmem:[%s8848_s16 + $0x60] sm:$0xff]  ;;  %v6342_v59 = vld [vmem:[%s8849_s18 + $0x38] sm:$0xff] }
0x2242   :  { %v4883_v2 = vmul.f32 %v4881_v60, %v4881_v60  ;;  %7257 = vmatprep.subr.msk.bf16.mxu1 %vm7847_vm1, %v7255_v56  ;;  %v7261_v47 = vpack.c.bf16 %v6325_v39, %v6324_v62 }
0x2243   :  { %v4882_v53 = vmul.f32 %v4880_v1, %v4880_v1  ;;  %7260 = vmatpush3.bf16.xpose.msk.msra.mxu1 %vm7847_vm1, %v7255_v56  ;;  %v5483_v56 = vld [vmem:[%s8864_s8 + $0x18] sm:$0xff] }
0x2244   :  { %v4887_v27 = vsel %vm258_vm0, %v4883_v2, 0.0  ;;  %7263 = vmatprep.subr.msk.bf16.mxu1 %vm7847_vm1, %v7261_v47  ;;  %v7291_v62 = vpack.c.bf16 %v5483_v56, %v5482_v52  ;;  %v5725_v52 = vld [vmem:[%s8866_s19 + $0x50] sm:$0xff]  ;;  %v5728_v56 = vld [vmem:[%s8866_s19 + $0x68] sm:$0xff] }
0x2245   :  { %v4884_v33 = vsel %vm258_vm0, %v4882_v53, 0.0 }
0x2246   :  { %4885 = vadd.xlane.f32.xlu0 %v4884_v33 }
0x224a   :  { %4888 = vadd.xlane.f32.xlu0 %v4887_v27 }
0x224b   :  { %7266 = vmatpush3.bf16.xpose.msk.msra.mxu1 %vm7847_vm1, %v7261_v47 }
0x224c   :  { %7269 = vmatprep.subr.msk.bf16.mxu1 %vm7847_vm1, %v7267_v54 }
0x2253   :  { %7272 = vmatpush3.bf16.xpose.msk.msra.mxu1 %vm7847_vm1, %v7267_v54 }
0x22d3   :  { %v4886_v4 = vpop.xlane.xlu0 %4885 }
0x22d4   :  { %v4890_v5 = vmul.f32 0.025, %v4886_v4 }
0x22d6   :  { %v4892_v7 = vadd.f32 1e-05, %v4890_v5 }
0x22d7   :  { %v4889_v55 = vpop.xlane.xlu0 %4888 }
0x22d8   :  { %7517 = vrsqrt.f32 %v4892_v7  ;;  %v4891_v9 = vmul.f32 0.025, %v4889_v55 }
0x22da   :  { %v4893_v11 = vadd.f32 1e-05, %v4891_v9 }
0x22dc   :  { %7519 = vrsqrt.f32 %v4893_v11  ;;  %v6319_v11 = vld [vmem:[%s8853_s10 + $0x1] ss:$0 sm:$0xff] }
0x22e2   :  { %v7518_v16 = vpop.eup %7517 }
0x22e3   :  { %v4896_v21 = vmul.f32 %v7518_v16, %v4880_v1  ;;  %v6343_v1 = vld [vmem:[%s8849_s18 + $0x40] sm:$0xff] }
0x22e4   :  { %v7279_v53 = vpack.c.bf16 %v6343_v1, %v6342_v59  ;;  %v6356_v59 = vld [vmem:[%s8856_s1 + $0x1] ss:$0 sm:$0xff] }
0x22e5   :  { %v4904_v24 = vmul.f32 %v6288_v18, %v4896_v21  ;;  %v6329_v21 = vld [vmem:[%s8854_s7 + $0x1] ss:$0 sm:$0xff] }
0x22e6   :  { %v7520_v26 = vpop.eup %7519 }
0x22e7   :  { %v4912_v25 = vadd.f32 %v6289_v22, %v4904_v24  ;;  %v4897_v30 = vmul.f32 %v7520_v26, %v4881_v60  ;;  %v7273_v60 = vpack.c.bf16 %v6341_v10, %v6340_v58 }
0x22e9   :  { %v5150_v31 = vadd.f32 %v5143_v29, %v4912_v25  ;;  %v4905_v32 = vmul.f32 %v6288_v18, %v4897_v30  ;;  %7275 = vmatprep.subr.msk.bf16.mxu0 %vm8252_vm9, %v7273_v60  ;;  %v6346_v30 = vld [vmem:[%s8855_s2 + $0x1] ss:$0 sm:$0xff] }
0x22ea   :  { %7278 = vmatpush3.bf16.xpose.msk.msra.mxu0 %vm8252_vm9, %v7273_v60 }
0x22eb   :  { %v5156_v34 = vsel %vm258_vm0, %v5150_v31, 0.0  ;;  %v4913_v35 = vadd.f32 %v6289_v22, %v4905_v32  ;;  %7281 = vmatprep.subr.msk.bf16.mxu0 %vm8252_vm9, %v7279_v53 }
0x22ec   :  { %5157 = vadd.xlane.f32.xlu1 %v5156_v34 }
0x22ed   :  { %v5151_v49 = vadd.f32 %v5147_v15, %v4913_v35 }
0x22ef   :  { %v5159_v0 = vsel %vm258_vm0, %v5151_v49, 0.0 }
0x22f0   :  { %5160 = vadd.xlane.f32.xlu0 %v5159_v0 }
0x22f2   :  { %7284 = vmatpush3.bf16.xpose.msk.msra.mxu0 %vm8252_vm9, %v7279_v53  ;;  %vm5712_vm9 = vcmask 1040384  }
0x22f3   :  { %7021 = vmatprep.subr.msk.mxu0 %vm2765_vm8, %v6344_v20 }
0x22fa   :  { %7022 = vmatpush3.xpose.msk.msra.mxu0 %vm2765_vm8, %v6344_v20 }
0x2379   :  { %v5158_v17 = vpop.xlane.xlu1 %5157 }
0x237a   :  { %v5162_v42 = vmul.f32 0.025, %v5158_v17 }
0x237c   :  { %v5164_v23 = vsub.f32 %v5150_v31, %v5162_v42 }
0x237d   :  { %v5161_v43 = vpop.xlane.xlu0 %5160 }
0x237e   :  { %v5163_v44 = vmul.f32 0.025, %v5161_v43  ;;  %v5166_v45 = vmul.f32 %v5164_v23, %v5164_v23 }
0x2380   :  { %v5165_v50 = vsub.f32 %v5151_v49, %v5163_v44  ;;  %v5168_v38 = vsel %vm258_vm0, %v5166_v45, 0.0 }
0x2381   :  { %5169 = vadd.xlane.f32.xlu1 %v5168_v38 }
0x2382   :  { %v5167_v36 = vmul.f32 %v5165_v50, %v5165_v50 }
0x2384   :  { %v5171_v37 = vsel %vm258_vm0, %v5167_v36, 0.0  ;;  %v5480_v36 = vld [vmem:[%s8864_s8] sm:$0xff] }
0x2385   :  { %5172 = vadd.xlane.f32.xlu0 %v5171_v37  ;;  %v5481_v37 = vld [vmem:[%s8864_s8 + $0x8] sm:$0xff] }
0x2386   :  { %v7285_v46 = vpack.c.bf16 %v5481_v37, %v5480_v36 }
0x2388   :  { %7287 = vmatprep.subr.msk.bf16.mxu1 %vm7847_vm1, %v7285_v46 }
0x240e   :  { %v5170_v33 = vpop.xlane.xlu1 %5169 }
0x240f   :  { %v5174_v2 = vmul.f32 0.025, %v5170_v33  ;;  %v6357_v33 = vld [vmem:[%s8857_s28 + $0x1] ss:$0 sm:$0xff] }
0x2411   :  { %v5176_v27 = vadd.f32 1e-05, %v5174_v2 }
0x2412   :  { %v5173_v4 = vpop.xlane.xlu0 %5172 }
0x2413   :  { %7521 = vrsqrt.f32 %v5176_v27  ;;  %v5175_v5 = vmul.f32 0.025, %v5173_v4 }
0x2415   :  { %v5177_v7 = vadd.f32 1e-05, %v5175_v5 }
0x2417   :  { %7523 = vrsqrt.f32 %v5177_v7  ;;  %v6358_v7 = vld [vmem:[%s8865_s14] ss:$0 sm:$0xff] }
0x241d   :  { %v7522_v55 = vpop.eup %7521 }
0x241e   :  { %v5180_v9 = vmul.f32 %v7522_v55, %v5164_v23 }
0x2420   :  { %v5188_v13 = vmul.f32 %v6318_v57, %v5180_v9 }
0x2421   :  { %v7524_v14 = vpop.eup %7523 }
0x2422   :  { %v5181_v16 = vmul.f32 %v7524_v14, %v5165_v50  ;;  %v5196_v18 = vadd.f32 %v6319_v11, %v5188_v13 }
0x2424   :  { %v5189_v63 = vmul.f32 %v6318_v57, %v5181_v16  ;;  %7010 = vmatprep.mubr.msk.f32.mxu1 %vm258_vm0, %v5196_v18  ;;  %v8690_v16 = vand.u32 127, %v2556_v61 }
0x2426   :  { %v5197_v19 = vadd.f32 %v6319_v11, %v5189_v63 }
0x2428   :  { %7011 = vmatmul.mubr.msk.f32.vlgmr.msra.gmra.mrb[80].mxu1 %vm258_vm0, %v5197_v19 }
0x2429   :  { %7290 = vmatpush3.bf16.xpose.msk.msra.mxu1 %vm7847_vm1, %v7285_v46  ;;  %v5723_v46 = vld [vmem:[%s8866_s19 + $0x40] sm:$0xff] }
0x242a   :  { %7293 = vmatprep.subr.msk.bf16.mxu1 %vm7847_vm1, %v7291_v62 }
0x2431   :  { %7296 = vmatpush3.bf16.xpose.msk.msra.mxu1 %vm7847_vm1, %v7291_v62  ;;  %v5730_v62 = vld [vmem:[%s8866_s19 + $0x78] sm:$0xff] }
0x2432   :  { %7325 = vmatprep.subr.bf16.mxu1 %v7634_v6 }
0x24fb   :  { %v7012_v22 = vpop.f32.mrb[80].mxu1 }
0x24fc   :  { %v5317_v24 = vadd.f32 %v7012_v22, %v6329_v21  ;;  %v5311_v26 = vpop.f32.mrb[81].mxu1 }
0x24fd   :  { %v5312_v28 = vadd.f32 %v6329_v21, %v5311_v26 }
0x24fe   :  { %v5321_v29 = vmax.f32 %v5317_v24, 0.0 }
0x24ff   :  { %v5320_v25 = vmax.f32 %v5312_v28, 0.0 }
0x2501   :  { %7023 = vmatprep.mubr.msk.f32.mxu0 %vm2765_vm8, %v5320_v25 }
0x2502   :  { %7024 = vmatmul.mubr.msk.f32.vlgmr.msra.gmra.mrb[24].mxu0 %vm2765_vm8, %v5321_v29 }
0x25d5   :  { %v7025_v31 = vpop.f32.mrb[24].mxu0 }
0x25d6   :  { %v5429_v32 = vadd.f32 %v7025_v31, %v6346_v30  ;;  %v5423_v34 = vpop.f32.mrb[25].mxu0 }
0x25d7   :  { %v5424_v35 = vadd.f32 %v6346_v30, %v5423_v34 }
0x25d8   :  { %v5433_v15 = vadd.f32 %v5429_v32, %v5197_v19 }
0x25d9   :  { %v5432_v49 = vadd.f32 %v5424_v35, %v5196_v18 }
0x25da   :  { %v5441_v0 = vsel %vm258_vm0, %v5433_v15, 0.0 }
0x25db   :  { %5442 = vadd.xlane.f32.xlu0 %v5441_v0  ;;  %v5438_v40 = vsel %vm258_vm0, %v5432_v49, 0.0  ;;  %v5718_v0 = vld [vmem:[%s8866_s19 + $0x18] sm:$0xff] }
0x25dc   :  { %5439 = vadd.xlane.f32.xlu1 %v5438_v40  ;;  %v5715_v40 = vld [vmem:[%s8866_s19] sm:$0xff] }
0x2668   :  { %v5443_v41 = vpop.xlane.xlu0 %5442 }
0x2669   :  { %v5445_v12 = vmul.f32 0.025, %v5443_v41  ;;  %v5440_v17 = vpop.xlane.xlu1 %5439 }
0x266a   :  { %v5444_v42 = vmul.f32 0.025, %v5440_v17  ;;  %v5720_v17 = vld [vmem:[%s8866_s19 + $0x28] sm:$0xff] }
0x266b   :  { %v5447_v23 = vsub.f32 %v5433_v15, %v5445_v12  ;;  %v5717_v12 = vld [vmem:[%s8866_s19 + $0x10] sm:$0xff] }
0x266c   :  { %v5446_v43 = vsub.f32 %v5432_v49, %v5444_v42  ;;  %v5716_v49 = vld [vmem:[%s8866_s19 + $0x8] sm:$0xff]  ;;  %v5722_v42 = vld [vmem:[%s8866_s19 + $0x38] sm:$0xff] }
0x266d   :  { %v5449_v44 = vmul.f32 %v5447_v23, %v5447_v23  ;;  %v7297_v41 = vpack.c.bf16 %v5718_v0, %v5716_v49 }
0x266e   :  { %v5448_v45 = vmul.f32 %v5446_v43, %v5446_v43 }
0x266f   :  { %v5453_v50 = vsel %vm258_vm0, %v5449_v44, 0.0  ;;  %7298 = vmatprep.subr.bf16.mxu0 %v7297_v41  ;;  %v5719_v44 = vld [vmem:[%s8866_s19 + $0x20] sm:$0xff]  ;;  %v5744_v41 = vld [vmem:[%s8866_s19 + $0xe8] sm:$0xff] }
0x2670   :  { %5454 = vadd.xlane.f32.xlu0 %v5453_v50  ;;  %v5450_v38 = vsel %vm258_vm0, %v5448_v45, 0.0  ;;  %v5721_v45 = vld [vmem:[%s8866_s19 + $0x30] sm:$0xff]  ;;  %v5724_v50 = vld [vmem:[%s8866_s19 + $0x48] sm:$0xff] }
0x2671   :  { %5451 = vadd.xlane.f32.xlu1 %v5450_v38  ;;  %v5726_v38 = vld [vmem:[%s8866_s19 + $0x58] sm:$0xff]  ;;  %v7303_v36 = vpack.c.bf16 %v5721_v45, %v5719_v44  ;;  %v5823_v44 = vld [vmem:[%s8867_s24] sm:$0xff]  ;;  %v5824_v45 = vld [vmem:[%s8867_s24 + $0x8] sm:$0xff] }
0x2672   :  { %v7305_v37 = vpack.c.bf16 %v5726_v38, %v5724_v50  ;;  %v7326_v50 = vpack.c.bf16 %v5824_v45, %v5823_v44 }
0x26fd   :  { %v5455_v39 = vpop.xlane.xlu0 %5454 }
0x26fe   :  { %v5457_v47 = vmul.f32 0.025, %v5455_v39  ;;  %v5452_v48 = vpop.xlane.xlu1 %5451  ;;  %v7307_v39 = vpack.c.bf16 %v5725_v52, %v5723_v46  ;;  %v5825_v46 = vld [vmem:[%s8867_s24 + $0x10] sm:$0xff]  ;;  %v5826_v52 = vld [vmem:[%s8867_s24 + $0x18] sm:$0xff] }
0x26ff   :  { %v5456_v51 = vmul.f32 0.025, %v5452_v48  ;;  %v5727_v48 = vld [vmem:[%s8866_s19 + $0x60] sm:$0xff] }
0x2700   :  { %v5459_v54 = vadd.f32 1e-05, %v5457_v47  ;;  %v7309_v47 = vpack.c.bf16 %v5730_v62, %v5728_v56  ;;  %v7330_v62 = vpack.c.bf16 %v5826_v52, %v5825_v46 }
0x2701   :  { %v5458_v58 = vadd.f32 1e-05, %v5456_v51  ;;  %v5729_v51 = vld [vmem:[%s8866_s19 + $0x70] sm:$0xff] }
0x2702   :  { %7525 = vrsqrt.f32 %v5459_v54  ;;  %v5732_v54 = vld [vmem:[%s8866_s19 + $0x88] sm:$0xff] }
0x2703   :  { %7527 = vrsqrt.f32 %v5458_v58  ;;  %v5734_v58 = vld [vmem:[%s8866_s19 + $0x98] sm:$0xff] }
0x270c   :  { %v7526_v10 = vpop.eup %7525 }
0x270d   :  { %v7528_v60 = vpop.eup %7527  ;;  %v5463_v1 = vmul.f32 %v7526_v10, %v5447_v23  ;;  %v7299_v23 = vpack.c.bf16 %v5717_v12, %v5715_v40  ;;  %v7311_v10 = vpack.c.bf16 %v5729_v51, %v5727_v48 }
0x270e   :  { %v5462_v53 = vmul.f32 %v7528_v60, %v5446_v43  ;;  %v7301_v43 = vpack.c.bf16 %v5722_v42, %v5720_v17  ;;  %v5731_v60 = vld [vmem:[%s8866_s19 + $0x80] sm:$0xff] }
0x270f   :  { %v5471_v2 = vmul.f32 %v6356_v59, %v5463_v1  ;;  %7300 = vmatpush1.bf16.xpose.msra.mxu0 %v7299_v23  ;;  %v5733_v1 = vld [vmem:[%s8866_s19 + $0x90] sm:$0xff]  ;;  %v5743_v23 = vld [vmem:[%s8866_s19 + $0xe0] sm:$0xff] }
0x2710   :  { %v5470_v27 = vmul.f32 %v6356_v59, %v5462_v53  ;;  %7302 = vmatprep.subr.bf16.mxu0 %v7301_v43  ;;  %v7313_v59 = vpack.c.bf16 %v5734_v58, %v5732_v54  ;;  %v5736_v53 = vld [vmem:[%s8866_s19 + $0xa8] sm:$0xff] }
0x2711   :  { %v5479_v5 = vadd.f32 %v6357_v33, %v5471_v2  ;;  %v7315_v2 = vpack.c.bf16 %v5733_v1, %v5731_v60 }
0x2712   :  { %v5478_v4 = vadd.f32 %v6357_v33, %v5470_v27  ;;  %v5738_v33 = vld [vmem:[%s8866_s19 + $0xb8] sm:$0xff] }
0x2713   :  { %v7317_v27 = vpack.c.bf16 %v5738_v33, %v5736_v53 }
0x2714   :  { %7034 = vmatprep.mubr.msk.f32.mxu1 %vm258_vm0, %v5478_v4  ;;  %v5735_v4 = vld [vmem:[%s8866_s19 + $0xa0] sm:$0xff] }
0x2715   :  { %7035 = vmatmul.mubr.msk.f32.vlgmr.msra.gmra.mrb[82].mxu1 %vm258_vm0, %v5479_v5  ;;  %v5737_v5 = vld [vmem:[%s8866_s19 + $0xb0] sm:$0xff] }
0x2716   :  { %7047 = vmatprep.mubr.msk.f32.mxu1 %vm7635_vm2, %v7636_v8  ;;  %7328 = vmatpush3.bf16.xpose.msk.msra.mxu1 %vm7327_vm5, %v7326_v50 }
0x2717   :  { %7304 = vmatpush1.bf16.xpose.msra.mxu0 %v7303_v36  ;;  %7329 = vmatprep.subr.bf16.mxu1 %v7634_v6 }
0x2718   :  { %7306 = vmatprep.subr.bf16.mxu0 %v7305_v37 }
0x271e   :  { %7332 = vmatpush3.bf16.xpose.msk.msra.mxu1 %vm7327_vm5, %v7330_v62 }
0x271f   :  { %7308 = vmatpush1.bf16.xpose.msra.mxu0 %v7307_v39  ;;  %7045 = vmatprep.subr.mxu1 %v7636_v8 }
0x2720   :  { %7310 = vmatprep.subr.bf16.mxu0 %v7309_v47 }
0x2727   :  { %7312 = vmatpush1.bf16.xpose.msra.mxu0 %v7311_v10 }
0x2728   :  { %7314 = vmatprep.subr.bf16.mxu0 %v7313_v59 }
0x272f   :  { %7316 = vmatpush1.bf16.xpose.msra.mxu0 %v7315_v2 }
0x2730   :  { %7318 = vmatprep.subr.bf16.mxu0 %v7317_v27 }
0x27e8   :  { %v7036_v55 = vpop.f32.mrb[82].mxu1 }
0x27e9   :  { %v5581_v57 = vadd.f32 %v7036_v55, %v6358_v7  ;;  %v5575_v9 = vpop.f32.mrb[83].mxu1 }
0x27ea   :  { %v5576_v11 = vadd.f32 %v6358_v7, %v5575_v9  ;;  %v7319_v7 = vpack.c.bf16 %v5737_v5, %v5735_v4 }
0x27eb   :  { %5585 = vst.msk [vmem:[#allocation4 + $0x8] sm:$0xff] %vm2198_vm6, %v5581_v57  ;;  %v5589_v13 = vsel %vm2198_vm6, %v5581_v57, -inf }
0x27ec   :  { %5584 = vst.msk [vmem:[#allocation4] sm:$0xff] %vm2198_vm6, %v5576_v11  ;;  %5590 = vmax.xlane.f32.xlu1 %v5589_v13  ;;  %v5586_v14 = vsel %vm2198_vm6, %v5576_v11, -inf  ;;  %7320 = vmatpush1.bf16.xpose.msra.mxu0 %v7319_v7 }
0x27ed   :  { %5587 = vmax.xlane.f32.xlu0 %v5586_v14 }
0x2879   :  { %v5591_v18 = vpop.xlane.xlu1 %5590 }
0x287a   :  { %vm5595_vm10 = vcmp.ge.f32.partialorder %v5581_v57, %v5591_v18  ;;  %v5588_v63 = vpop.xlane.xlu0 %5587 }
0x287b   :  { %v5597_v19 = vsel %vm5595_vm10, %v8690_v16, 32  ;;  %vm5594_vm11 = vcmp.ge.f32.partialorder %v5576_v11, %v5588_v63 }
0x287c   :  { %v5613_v20 = vsel %vm2198_vm6, %v5597_v19, 2147483647  ;;  %v5596_v21 = vsel %vm5594_vm11, %v8690_v16, 32 }
0x287d   :  { %v5615_v22 = vshra.s32 %v5613_v20, 16  ;;  %v5598_v24 = vsel %vm2198_vm6, %v5596_v21, 2147483647  ;;  %v5614_v61 = vand.u32 65535, %v5613_v20  ;;  %v5740_v21 = vld [vmem:[%s8866_s19 + $0xc8] sm:$0xff] }
0x287e   :  { %v5600_v26 = vshra.s32 %v5598_v24, 16  ;;  %v5599_v29 = vand.u32 65535, %v5598_v24 }
0x287f   :  { %v5617_v28 = vcvt.s32.f32 %v5615_v22  ;;  %v5616_v31 = vcvt.s32.f32 %v5614_v61  ;;  %v5742_v22 = vld [vmem:[%s8866_s19 + $0xd8] sm:$0xff] }
0x2880   :  { %v5602_v25 = vcvt.s32.f32 %v5600_v26  ;;  %v5601_v34 = vcvt.s32.f32 %v5599_v29  ;;  %v7321_v24 = vpack.c.bf16 %v5742_v22, %v5740_v21  ;;  %v5739_v26 = vld [vmem:[%s8866_s19 + $0xc0] sm:$0xff] }
0x2881   :  { %5618 = vmin.xlane.f32.xlu1 %v5617_v28 }
0x2882   :  { %5603 = vmin.xlane.f32.xlu0 %v5602_v25  ;;  %7322 = vmatprep.subr.bf16.mxu0 %v7321_v24 }
0x290e   :  { %v5619_v30 = vpop.xlane.xlu1 %5618 }
0x290f   :  { %vm5620_vm12 = vcmp.eq.f32.partialorder %v5617_v28, %v5619_v30  ;;  %v5604_v32 = vpop.xlane.xlu0 %5603  ;;  %v5625_v55 = vcvt.f32.s32 %v5619_v30  ;;  %v5741_v28 = vld [vmem:[%s8866_s19 + $0xd0] sm:$0xff] }
0x2910   :  { %vm5605_vm13 = vcmp.eq.f32.partialorder %v5602_v25, %v5604_v32  ;;  %v5621_v35 = vsel %vm5620_vm12, %v5616_v31, inf  ;;  %v5610_v57 = vcvt.f32.s32 %v5604_v32  ;;  %v7323_v61 = vpack.c.bf16 %v5741_v28, %v5739_v26 }
0x2911   :  { %5622 = vmin.xlane.f32.xlu1 %v5621_v35  ;;  %v5606_v15 = vsel %vm5605_vm13, %v5601_v34, inf  ;;  %v5626_v11 = vshll.u32 %v5625_v55, 16 }
0x2912   :  { %5607 = vmin.xlane.f32.xlu0 %v5606_v15  ;;  %v5611_v18 = vshll.u32 %v5610_v57, 16  ;;  %7324 = vmatpush1.bf16.xpose.msra.mxu0 %v7323_v61 }
0x2913   :  { %5780 = vmatprep.subr.mxu0 %v5744_v41 }
0x291a   :  { %5781 = vmatpush1.xpose.msra.mxu0 %v5743_v23 }
0x291b   :  { %7333 = vmatprep.subr.bf16.mxu0 %v7634_v6 }
0x299e   :  { %v5623_v9 = vpop.xlane.xlu1 %5622 }
0x299f   :  { %v5624_v13 = vcvt.f32.s32 %v5623_v9  ;;  %v5608_v14 = vpop.xlane.xlu0 %5607 }
0x29a0   :  { %v5609_v63 = vcvt.f32.s32 %v5608_v14 }
0x29a1   :  { %v5627_v19 = vadd.s32 %v5626_v11, %v5624_v13 }
0x29a2   :  { %v5612_v20 = vadd.s32 %v5611_v18, %v5609_v63 }
0x29a3   :  { %vm5629_vm15 = vcmp.eq.s32.totalorder %v8690_v16, %v5627_v19  ;;  %5638 = vst.msk [vmem:[%s7840_s20 + $0x8] sm:$0xff] %vm5636_vm14, %v5627_v19 }
0x29a4   :  { %v6366_v25 = vsel %vm5629_vm15, 1.0, %v7636_v8  ;;  %vm5628_vm3 = vcmp.eq.s32.totalorder %v8690_v16, %v5612_v20  ;;  %5637 = vst.msk [vmem:[%s7840_s20] sm:$0xff] %vm5636_vm14, %v5612_v20  ;;  %s8870_s20 = sld [smem:[#allocation24_spill]] }
0x29a5   :  { %5635 = vst.msk [vmem:[#allocation6 + $0x8] sm:$0xff] %vm2198_vm6, %v6366_v25  ;;  %v8731_v29 = vsel %vm5628_vm3, 1.0, %v7636_v8  ;;  %v5674_v30 = vrot.slane %v6366_v25, 1  ;;  %v5688_v31 = vrot.slane %v6366_v25, 5  ;;  %v5678_v32 = vrot.slane %v6366_v25, 2 }
0x29a6   :  { %5634 = vst.msk [vmem:[#allocation6] sm:$0xff] %vm2198_vm6, %v8731_v29  ;;  %v5692_v34 = vrot.slane %v6366_v25, 6  ;;  %v5682_v16 = vrot.slane %v6366_v25, 3  ;;  %v5696_v15 = vrot.slane %v6366_v25, 7  ;;  %v5644_v0 = vrot.slane %v8731_v29, 2 }
0x29a7   :  { %v7395_v35 = vpack.i.bf16 %v5674_v30, %v5688_v31  ;;  %v5658_v40 = vrot.slane %v8731_v29, 6  ;;  %v5640_v17 = vrot.slane %v8731_v29, 1  ;;  %v5654_v42 = vrot.slane %v8731_v29, 5  ;;  %v5827_v30 = vld [vmem:[%s8867_s24 + $0x20] sm:$0xff] }
0x29a8   :  { %v7400_v49 = vpack.i.bf16 %v5678_v32, %v5692_v34  ;;  %v7405_v12 = vpack.i.bf16 %v5682_v16, %v5696_v15  ;;  %v5648_v36 = vrot.slane %v8731_v29, 3  ;;  %v5662_v37 = vrot.slane %v8731_v29, 7  ;;  %7046 = vmatpush3.xpose.msk.msra.mxu1 %vm5835_vm4, %v5827_v30  ;;  %v5925_v31 = vld [vmem:[%s8868_s30] sm:$0xff]  ;;  %v5926_v32 = vld [vmem:[%s8868_s30 + $0x8] sm:$0xff] }
0x29a9   :  { %7396 = vrot.lane.b32.xlu1 %v7395_v35, %s7644_s23  ;;  %v7415_v43 = vpack.i.bf16 %v5644_v0, %v5658_v40  ;;  %v7410_v38 = vpack.i.bf16 %v5640_v17, %v5654_v42  ;;  %v5686_v58 = vrot.slane %v6366_v25, 4  ;;  %v5652_v27 = vrot.slane %v8731_v29, 4  ;;  %v6367_v35 = vld [vmem:[%s8869_s6] ss:$0 sm:$0xff] }
0x29aa   :  { %7401 = vrot.lane.b32.xlu0 %v7400_v49, %s7645_s26  ;;  %v7420_v56 = vpack.i.bf16 %v5648_v36, %v5662_v37  ;;  %v7334_v34 = vpack.c.bf16 %v5926_v32, %v5925_v31  ;;  %v6368_v40 = vld [vmem:[%s8870_s20] ss:$0 sm:$0xff] }
0x29ad   :  { %7406 = vrot.lane.b32.xlu1 %v7405_v12, %s8861_s9 }
0x29ae   :  { %7416 = vrot.lane.b32.xlu0 %v7415_v43, %s7645_s26 }
0x29b1   :  { %7411 = vrot.lane.b32.xlu1 %v7410_v38, %s7644_s23 }
0x29b5   :  { %7421 = vrot.lane.b32.xlu1 %v7420_v56, %s8861_s9 }
0x2a1b   :  { %v7397_v39 = vpop.permute.xlu1 %7396 }
0x2a1c   :  { %v7399_v47 = vunpack.i.h.bf16 %v7397_v39  ;;  %v7398_v48 = vunpack.i.l.bf16 %v7397_v39  ;;  %v7402_v51 = vpop.permute.xlu0 %7401 }
0x2a1d   :  { %v7404_v10 = vunpack.i.h.bf16 %v7402_v51  ;;  %v7403_v59 = vunpack.i.l.bf16 %v7402_v51 }
0x2a1e   :  { %v5700_v60 = vsel %vm2198_vm6, %v6366_v25, %v7399_v47  ;;  %v5703_v6 = vsel %vm2198_vm6, %v5686_v58, %v7398_v48 }
0x2a1f   :  { %v7407_v54 = vpop.permute.xlu1 %7406  ;;  %v5701_v7 = vsel %vm2765_vm8, %v5700_v60, %v7404_v10  ;;  %v5704_v55 = vsel %vm2765_vm8, %v5703_v6, %v7403_v59 }
0x2a20   :  { %v7409_v1 = vunpack.i.h.bf16 %v7407_v54  ;;  %v7408_v53 = vunpack.i.l.bf16 %v7407_v54  ;;  %v7417_v2 = vpop.permute.xlu0 %7416 }
0x2a21   :  { %v7419_v14 = vunpack.i.h.bf16 %v7417_v2  ;;  %v7418_v18 = vunpack.i.l.bf16 %v7417_v2 }
0x2a22   :  { %v5702_v57 = vsel %vm5668_vm7, %v5701_v7, %v7409_v1  ;;  %v5705_v9 = vsel %vm5668_vm7, %v5704_v55, %v7408_v53 }
0x2a23   :  { %v7412_v33 = vpop.permute.xlu1 %7411  ;;  %v5708_v21 = vrot.slane %v5702_v57, 7  ;;  %v5709_v26 = vrot.slane %v5705_v9, 7 }
0x2a24   :  { %v7414_v4 = vunpack.i.h.bf16 %v7412_v33  ;;  %v7413_v5 = vunpack.i.l.bf16 %v7412_v33 }
0x2a26   :  { %v5666_v11 = vsel %vm2198_vm6, %v8731_v29, %v7414_v4  ;;  %v5670_v13 = vsel %vm2198_vm6, %v5652_v27, %v7413_v5 }
0x2a27   :  { %v7422_v63 = vpop.permute.xlu1 %7421  ;;  %v5667_v22 = vsel %vm2765_vm8, %v5666_v11, %v7419_v14  ;;  %v5671_v24 = vsel %vm2765_vm8, %v5670_v13, %v7418_v18 }
0x2a28   :  { %v7424_v19 = vunpack.i.h.bf16 %v7422_v63  ;;  %v7423_v20 = vunpack.i.l.bf16 %v7422_v63 }
0x2a2a   :  { %v5669_v28 = vsel %vm5668_vm7, %v5667_v22, %v7424_v19  ;;  %v5672_v25 = vsel %vm5668_vm7, %v5671_v24, %v7423_v20 }
0x2a2b   :  { %v5714_v61 = vsel %vm5712_vm9, %v5672_v25, %v5709_v26  ;;  %v5713_v29 = vsel %vm5712_vm9, %v5669_v28, %v5708_v21 }
0x2a2c   :  { %5816 = vmatprep.mubr.f32.mxu0 %v5714_v61 }
0x2a2d   :  { %5817 = vmatmul.mubr.f32.vlgmr.msra.gmra.mrb[26].mxu0 %v5713_v29 }
0x2a2e   :  { %7054 = vmatprep.mubr.msk.f32.mxu0 %vm7635_vm2, %v7636_v8  ;;  %7336 = vmatpush3.bf16.xpose.msk.msra.mxu0 %vm7847_vm1, %v7334_v34 }
0x2b00   :  { %v5818_v16 = vpop.f32.mrb[26].mxu0 }
0x2b01   :  { %v5819_v15 = vadd.f32 %v6367_v35, %v5818_v16  ;;  %v5820_v49 = vpop.f32.mrb[27].mxu0 }
0x2b03   :  { %v5822_v0 = vmax.f32 %v5819_v15, 0.0 }
0x2b05   :  { %7048 = vmatmul.mubr.msk.f32.vlgmr.msra.gmra.mrb[84].mxu1 %vm5835_vm4, %v5822_v0 }
0x2bd8   :  { %v5920_v41 = vpop.f32.mrb[84].mxu1 }
0x2bd9   :  { %v5921_v12 = vadd.f32 %v6368_v40, %v5920_v41  ;;  %v7049_v8 = vpop.f32.mrb[85].mxu1 }
0x2bdb   :  { %v5924_v17 = vmax.f32 %v5921_v12, 0.0 }
0x2bdd   :  { %7055 = vmatmul.mubr.msk.f32.vlgmr.msra.gmra.mrb[28].mxu0 %vm258_vm0, %v5924_v17 }
0x2bde   :  { %7540 = shalt.err (!%p7537_p4)
}
0x2bdf   :  { %s7541_s23 = scalar_lea.hbm %s7830_s4, 256 }
0x2be0   :  { %p7542_p5 = scmp.ne.s32.totalorder %s7830_s4, %s7541_s23  ;;  %p7545_p6 = scmp.lt.u32.totalorder %s7541_s23, %s7830_s4 }
0x2be2   :  { %p7547_p7 = pnand %p7545_p6, %p7542_p5 }
0x2be4   :  { %7550 = shalt.err (!%p7547_p7)
}
0x2be5   :  { %s7654_s26 = smov 128   ;;  %s7655_s28 = smov [#allocation6]  }
0x2be6   :  { %6036 = dma.vmem_to_hbm [thread:$0]  %s6031_s25, 256, %s7830_s4, [#allocation5], %s7654_s26, %s7654_s26, %s8863_s17  }
0x2be7   :  { %s6042_s1 = sshll.u32 %s7655_s28, 4  ;;  %s6043_s1 = int_to_ptr.vmem [resolvable:$true] %s6042_s1 }
0x2be8   :  { %s7551_s2 = scalar_lea.vmem %s6043_s1, 256  ;;  %p7556_p9 = scmp.lt.s32.totalorder %s6043_s1, %s6043_s1 }
0x2be9   :  { %p7552_p8 = scmp.ne.s32.totalorder %s6043_s1, %s7551_s2  ;;  %p7557_p10 = scmp.lt.s32.totalorder %s7551_s2, %s7551_s2 }
0x2beb   :  { %p7558_p11 = por %p7557_p10, %p7556_p9 }
0x2bed   :  { %p7559_p12 = pnand %p7558_p11, %p7552_p8 }
0x2bef   :  { %7562 = shalt.err (!%p7559_p12)
}
0x2bf0   :  { %s7563_s7 = scalar_lea.hbm %s7835_s12, 256 }
0x2bf1   :  { %p7564_p13 = scmp.ne.s32.totalorder %s7835_s12, %s7563_s7  ;;  %p7567_p0 = scmp.lt.u32.totalorder %s7563_s7, %s7835_s12 }
0x2bf3   :  { %p7569_p1 = pnand %p7567_p0, %p7564_p13 }
0x2bf5   :  { %7572 = shalt.err (!%p7569_p1)
}
0x2bf6   :  { %s8871_s4 = sld [smem:[#allocation26_spill]]  ;;  %s7656_s10 = smov [#allocation2]   ;;  %vm6013_vm0 = vcmask 123904  }
0x2bf7   :  { %6048 = dma.vmem_to_hbm [thread:$0]  %s6043_s1, 256, %s7835_s12, [#allocation5], %s7654_s26, %s7654_s26, %s8863_s17  }
0x2bf8   :  { %s6021_s11 = sshll.u32 %s7656_s10, 4  ;;  %s6022_s11 = int_to_ptr.vmem [resolvable:$true] %s6021_s11 }
0x2bf9   :  { %s7573_s21 = scalar_lea.vmem %s6022_s11, 32  ;;  %p7578_p3 = scmp.lt.s32.totalorder %s6022_s11, %s6022_s11 }
0x2bfa   :  { %p7574_p2 = scmp.ne.s32.totalorder %s6022_s11, %s7573_s21  ;;  %p7579_p4 = scmp.lt.s32.totalorder %s7573_s21, %s7573_s21 }
0x2bfc   :  { %v6375_v3 = vld [vmem:[%s8871_s4] ss:$0 sm:$0xff]  ;;  %p7580_p5 = por %p7579_p4, %p7578_p3 }
0x2bfe   :  { %p7581_p6 = pnand %p7580_p5, %p7574_p2 }
0x2cb0   :  { %v6009_v42 = vpop.f32.mrb[28].mxu0 }
0x2cb1   :  { %v6010_v23 = vadd.f32 %v6375_v3, %v6009_v42  ;;  %v7056_v43 = vpop.f32.mrb[29].mxu0 }
0x2cb3   :  { %6014 = vst.msk [vmem:[#allocation2] sm:$0x3] %vm6013_vm0, %v6010_v23 }
0x2cb4   :  { %7584 = shalt.err (!%p7581_p6)
}
0x2cb5   :  { %s7585_s12 = scalar_lea.hbm %s7825_s27, 32 }
0x2cb6   :  { %p7586_p7 = scmp.ne.s32.totalorder %s7825_s27, %s7585_s12  ;;  %p7589_p8 = scmp.lt.u32.totalorder %s7585_s12, %s7825_s27 }
0x2cb8   :  { %p7591_p9 = pnand %p7589_p8, %p7586_p7 }
0x2cba   :  { %7594 = shalt.err (!%p7591_p9)
}
0x2cbb   :  { %6024 = dma.vmem_to_hbm [thread:$0]  %s6022_s11, 32, %s7825_s27, [#allocation3]  }
0x2cbc   :  { %7595 = dma.done.wait [#allocation3], 32  }
0x2cbd   :  { %7596 = vsyncadd [#allocation3], 4294967264 }
0x2cbe   :  { %7597 = dma.done.wait [#allocation5], 512  }
0x2cbf   :  { %7598 = vsyncadd [#allocation5], 4294966784 }
0x2cc0   :  { %6062 = vsyncpa [#allocation3], 1 }
0x2cc1   :  { %6063 = vsyncpa [#allocation5], 1 }

</bundles_post_ra>
